<compile_context>
chip_gen: v5e
topology: v5e:2x2
jax: 0.10.0
libtpu: 0.0.40
codegen_flags: <defaults>
</compile_context>

<pallas_src>
import functools
import math

import jax
import jax.numpy as jnp
from jax import lax
from jax.experimental import pallas as pl
from jax.experimental.pallas import tpu as pltpu


_INV_SQRT2 = 1.0 / math.sqrt(2.0)


# ---------------------------------------------------------------------------
# Fused Linear (+ optional exact GELU) Pallas kernel.
# Grid: (N // tn, K // tk)  -- reduction axis (K) last, per convention.
# The batch dim M is tiny (full extent in one block). The output block's
# index_map ignores k, so it stays resident in VMEM across the K axis and we
# accumulate directly into it (no scratch accumulator).
# ---------------------------------------------------------------------------
def _linear_kernel(x_ref, w_ref, b_ref, o_ref, *, apply_gelu):
    k = pl.program_id(1)

    @pl.when(k == 0)
    def _():
        o_ref[...] = jnp.zeros_like(o_ref)

    # Weights are streamed from HBM as bf16; cast the (tiny) activation block
    # to bf16 so the MXU uses its native bf16 x bf16 -> f32 path.
    o_ref[...] += jnp.dot(
        x_ref[...].astype(jnp.bfloat16),
        w_ref[...],
        preferred_element_type=jnp.float32,
    )

    @pl.when(k == pl.num_programs(1) - 1)
    def _():
        y = o_ref[...] + b_ref[...]  # bias broadcast (1, tn) -> (M, tn)
        if apply_gelu:
            # Exact GELU (matches nn.GELU() default, approximate='none')
            y = 0.5 * y * (1.0 + lax.erf(y * _INV_SQRT2))
        o_ref[...] = y


def linear_pallas(x, w, b, *, apply_gelu=False, tn=512, tk=2048):
    """y = gelu?(x @ w + b). x:(M,K) f32, w:(K,N) bf16, b:(N,) f32 -> (M,N) f32."""
    M, K = x.shape
    Kw, N = w.shape
    assert K == Kw and b.shape == (N,)
    tn = min(tn, N)
    tk = min(tk, K)
    assert N % tn == 0 and K % tk == 0

    b2 = b.reshape(1, N).astype(jnp.float32)

    kernel = functools.partial(_linear_kernel, apply_gelu=apply_gelu)

    flops = 2 * M * K * N
    transcendentals = M * N if apply_gelu else 0
    bytes_accessed = (
        M * K * x.dtype.itemsize        # activations in
        + K * N * w.dtype.itemsize      # weights (the dominant term)
        + N * 4                         # bias
        + M * N * 4                     # output
    )

    return pl.pallas_call(
        kernel,
        out_shape=jax.ShapeDtypeStruct((M, N), jnp.float32),
        grid_spec=pltpu.PrefetchScalarGridSpec(
            num_scalar_prefetch=0,
            grid=(N // tn, K // tk),
            in_specs=[
                pl.BlockSpec((M, tk), lambda j, k: (0, k)),   # activation tile
                pl.BlockSpec((tk, tn), lambda j, k: (k, j)),  # bf16 weight tile
                pl.BlockSpec((1, tn), lambda j, k: (0, j)),   # f32 bias tile
            ],
            out_specs=pl.BlockSpec((M, tn), lambda j, k: (0, j)),
        ),
        compiler_params=pltpu.CompilerParams(
            dimension_semantics=("parallel", "arbitrary"),
            # Largest layer: 4 MB bf16 weight block double-buffered = 8 MB.
            # 32 MiB scoped VMEM covers it with headroom on v5e/v6e/v7x.
            vmem_limit_bytes=32 * 1024 * 1024,
        ),
        cost_estimate=pl.CostEstimate(
            flops=flops,
            transcendentals=transcendentals,
            bytes_accessed=bytes_accessed,
        ),
    )(x, w, b2)


# ---------------------------------------------------------------------------
# Parameter init (deterministic, PyTorch-Linear-style uniform bounds).
# Weights are stored in bf16 (they are re-streamed from HBM every call and the
# workload is memory-bound); biases stay f32.
# ---------------------------------------------------------------------------
def init_params(key, input_dim, hidden_dim, output_dim):
    dims = [(input_dim, hidden_dim), (hidden_dim, hidden_dim), (hidden_dim, output_dim)]
    params = []
    for fan_in, fan_out in dims:
        key, kw, kb = jax.random.split(key, 3)
        bound = 1.0 / math.sqrt(fan_in)
        w = jax.random.uniform(kw, (fan_in, fan_out), jnp.float32, -bound, bound)
        b = jax.random.uniform(kb, (fan_out,), jnp.float32, -bound, bound)
        params.append((w.astype(jnp.bfloat16), b))
    return params


# ---------------------------------------------------------------------------
# Full forward pass: Flatten -> 3x Linear (GELU between) -> Unflatten
# ---------------------------------------------------------------------------
def flatten_ann_forward(x_nchw, params):
    B = x_nchw.shape[0]
    x = x_nchw.reshape(B, -1)  # nn.Flatten (row-major, matches torch)
    (w1, b1), (w2, b2), (w3, b3) = params
    # Tile choices: >=2 N-blocks per layer (v7x megacore shards the "parallel"
    # N axis across its 2 TCs), large K tiles so the whole net is 8 grid steps,
    # and bf16 weight blocks <= 4 MB so double-buffering stays v7x-safe.
    h = linear_pallas(x, w1, b1, apply_gelu=True, tn=512, tk=2048)    # grid (2, 2)
    h = linear_pallas(h, w2, b2, apply_gelu=True, tn=512, tk=1024)    # grid (2, 1)
    y = linear_pallas(h, w3, b3, apply_gelu=False, tn=2048, tk=1024)  # grid (2, 1)
    return y.reshape(B, 4, 32, 32)  # nn.Unflatten(1, (4, 32, 32))


def flatten_ann_reference(x_nchw, params):
    B = x_nchw.shape[0]
    x = x_nchw.reshape(B, -1).astype(jnp.float32)
    (w1, b1), (w2, b2), (w3, b3) = params
    w1, w2, w3 = (w.astype(jnp.float32) for w in (w1, w2, w3))
    gelu = lambda v: 0.5 * v * (1.0 + lax.erf(v * _INV_SQRT2))
    h = gelu(x @ w1 + b1)
    h = gelu(h @ w2 + b2)
    y = h @ w3 + b3
    return y.reshape(B, 4, 32, 32)


if __name__ == "__main__":
    key = jax.random.PRNGKey(0)
    key, kx = jax.random.split(key)

    B = 2
    input_dim = 4 * 32 * 32   # 4096
    hidden_dim = 1024
    output_dim = 4 * 32 * 32  # 4096

    x = jax.random.normal(kx, (B, 4, 32, 32), dtype=jnp.float32)
    params = init_params(key, input_dim, hidden_dim, output_dim)

    out = jax.block_until_ready(flatten_ann_forward(x, params))
    assert out.shape == (B, 4, 32, 32), out.shape

    ref = jax.block_until_ready(flatten_ann_reference(x, params))
    max_err = float(jnp.max(jnp.abs(out - ref)))
    # Activations ride the MXU in bf16, so compare against the f32 reference
    # (built from the same bf16-rounded weights) at a loosened tolerance.
    assert jnp.allclose(out, ref, atol=1e-2, rtol=1e-2), max_err

    print("KERNEL_OK")
</pallas_src>

<mosaic_0001>
module attributes {stable_mosaic.version = 11 : i64} {
  func.func @_linear_kernel(%arg0: i32, %arg1: i32, %arg2: memref<2x2048xf32, #tpu.memory_space<vmem>>, %arg3: memref<2048x512xbf16, #tpu.memory_space<vmem>>, %arg4: memref<1x512xf32, #tpu.memory_space<vmem>>, %arg5: memref<2x512xf32, #tpu.memory_space<vmem>>) attributes {dimension_semantics = [#tpu.dimension_semantics<parallel>, #tpu.dimension_semantics<arbitrary>], iteration_bounds = array<i64: 2, 2>, scalar_prefetch = 0 : i64, scratch_operands = 0 : i64, tpu.core_type = #tpu.core_type<tc>, window_params = [{transform_indices = @transform_0, window_bounds = array<i64: 2, 2048>}, {transform_indices = @transform_1, window_bounds = array<i64: 2048, 512>}, {transform_indices = @transform_2, window_bounds = array<i64: 1, 512>}, {transform_indices = @transform_3, window_bounds = array<i64: 2, 512>}]} {
    %c0_i32 = arith.constant 0 : i32
    %0 = arith.cmpi eq, %arg1, %c0_i32 : i32
    %1 = arith.extui %0 : i1 to i32
    %c0_i32_0 = arith.constant 0 : i32
    %2 = arith.cmpi ne, %1, %c0_i32_0 : i32
    scf.if %2 {
      %cst_9 = arith.constant 0.000000e+00 : f32
      %13 = vector.broadcast %cst_9 : f32 to vector<2x512xf32>
      %c0_10 = arith.constant 0 : index
      %c0_11 = arith.constant 0 : index
      %14 = vector.load %arg5[%c0_10, %c0_11] : memref<2x512xf32, #tpu.memory_space<vmem>>, vector<2x512xf32>
      tpu.vector_store %arg5[%c0_10, %c0_11], %13 {strides = array<i32>} : memref<2x512xf32, #tpu.memory_space<vmem>>, vector<2x512xf32>,
    } else {
    }
    %c0 = arith.constant 0 : index
    %c0_1 = arith.constant 0 : index
    %3 = vector.load %arg5[%c0, %c0_1] : memref<2x512xf32, #tpu.memory_space<vmem>>, vector<2x512xf32>
    %c0_2 = arith.constant 0 : index
    %c0_3 = arith.constant 0 : index
    %4 = vector.load %arg2[%c0_2, %c0_3] : memref<2x2048xf32, #tpu.memory_space<vmem>>, vector<2x2048xf32>
    %5 = arith.truncf %4 : vector<2x2048xf32> to vector<2x2048xbf16>
    %c0_4 = arith.constant 0 : index
    %c0_5 = arith.constant 0 : index
    %6 = vector.load %arg3[%c0_4, %c0_5] : memref<2048x512xbf16, #tpu.memory_space<vmem>>, vector<2048x512xbf16>
    %cst = arith.constant dense<0.000000e+00> : vector<2x512xf32>
    %7 = tpu.matmul %5, %6, %cst {dimension_numbers = #tpu.dot_dimension_numbers<[1], [0], [0], [1], [0, 0, 1, 1], [], []>} : vector<2x2048xbf16>, vector<2048x512xbf16>, vector<2x512xf32> -> vector<2x512xf32>
    %8 = arith.addf %3, %7 : vector<2x512xf32>
    %c0_6 = arith.constant 0 : index
    %c0_7 = arith.constant 0 : index
    %9 = vector.load %arg5[%c0_6, %c0_7] : memref<2x512xf32, #tpu.memory_space<vmem>>, vector<2x512xf32>
    tpu.vector_store %arg5[%c0_6, %c0_7], %8 {strides = array<i32>} : memref<2x512xf32, #tpu.memory_space<vmem>>, vector<2x512xf32>,
    %c1_i32 = arith.constant 1 : i32
    %10 = arith.cmpi eq, %arg1, %c1_i32 : i32
    %11 = arith.extui %10 : i1 to i32
    %c0_i32_8 = arith.constant 0 : i32
    %12 = arith.cmpi ne, %11, %c0_i32_8 : i32
    scf.if %12 {
      %c0_9 = arith.constant 0 : index
      %c0_10 = arith.constant 0 : index
      %13 = vector.load %arg5[%c0_9, %c0_10] : memref<2x512xf32, #tpu.memory_space<vmem>>, vector<2x512xf32>
      %c0_11 = arith.constant 0 : index
      %c0_12 = arith.constant 0 : index
      %14 = vector.load %arg4[%c0_11, %c0_12] : memref<1x512xf32, #tpu.memory_space<vmem>>, vector<1x512xf32>
      %15 = vector.broadcast %14 : vector<1x512xf32> to vector<2x512xf32>
      %16 = arith.addf %13, %15 : vector<2x512xf32>
      %cst_13 = arith.constant 5.000000e-01 : f32
      %17 = vector.broadcast %cst_13 : f32 to vector<2x512xf32>
      %18 = arith.mulf %17, %16 : vector<2x512xf32>
      %cst_14 = arith.constant 0.707106769 : f32
      %19 = vector.broadcast %cst_14 : f32 to vector<2x512xf32>
      %20 = arith.mulf %16, %19 : vector<2x512xf32>
      %21 = math.erf %20 : vector<2x512xf32>
      %cst_15 = arith.constant 1.000000e+00 : f32
      %22 = vector.broadcast %cst_15 : f32 to vector<2x512xf32>
      %23 = arith.addf %22, %21 : vector<2x512xf32>
      %24 = arith.mulf %18, %23 : vector<2x512xf32>
      %c0_16 = arith.constant 0 : index
      %c0_17 = arith.constant 0 : index
      %25 = vector.load %arg5[%c0_16, %c0_17] : memref<2x512xf32, #tpu.memory_space<vmem>>, vector<2x512xf32>
      tpu.vector_store %arg5[%c0_16, %c0_17], %24 {strides = array<i32>} : memref<2x512xf32, #tpu.memory_space<vmem>>, vector<2x512xf32>,
    } else {
    }
    return
  }
  func.func @transform_0(%arg0: i32, %arg1: i32) -> (i32, i32) {
    %c0_i32 = arith.constant 0 : i32
    %c0_i32_0 = arith.constant 0 : i32
    return %c0_i32, %arg1 : i32, i32
  }
  func.func @transform_1(%arg0: i32, %arg1: i32) -> (i32, i32) {
    %c0_i32 = arith.constant 0 : i32
    return %arg1, %arg0 : i32, i32
  }
  func.func @transform_2(%arg0: i32, %arg1: i32) -> (i32, i32) {
    %c0_i32 = arith.constant 0 : i32
    %c0_i32_0 = arith.constant 0 : i32
    return %c0_i32, %arg0 : i32, i32
  }
  func.func @transform_3(%arg0: i32, %arg1: i32) -> (i32, i32) {
    %c0_i32 = arith.constant 0 : i32
    %c0_i32_0 = arith.constant 0 : i32
    return %c0_i32, %arg0 : i32, i32
  }
}

</mosaic_0001>

<bundles_post_ra>
// kernel: tpu_custom_call.1
= control target key start
LH: loop header
LB: loop body
LE: loop exit
PB: predicated region body
PF: predicated region fallthrough
CT: control target
= control target key end

     0   :  { %s8949_s0 = inlined_call_operand.hbm [shape: f32[2,4096], index: 0, kind: input, shape index: {}]   ;;  %s8950_s1 = inlined_call_operand.hbm [shape: bf16[4096,1024], index: 1, kind: input, shape index: {}]   ;;  %s8951_s2 = inlined_call_operand.hbm [shape: f32[1,1024], index: 2, kind: input, shape index: {}]   ;;  %s8952_s3 = inlined_call_operand.hbm [shape: f32[2,1024], index: 3, kind: output, shape index: {}]  }
   0x1   :  { %8961 = sst [smem:[#allocation21_spill]] %s8949_s0 }
   0x2   :  { %8962 = sst [smem:[#allocation22_spill]] %s8950_s1 }
   0x3   :  { %8963 = sst [smem:[#allocation23_spill]] %s8952_s3 }
   0x4   :  { %8 = vsyncpa [#allocation3], 0 }
   0x5   :  { %10 = vsyncpa [#allocation3 + $0x1], 0 }
   0x6   :  { %11 = vsyncpa [#allocation6], 0 }
   0x7   :  { %13 = vsyncpa [#allocation6 + $0x1], 0 }
   0x8   :  { %14 = vsyncpa [#allocation4], 0 }
   0x9   :  { %16 = vsyncpa [#allocation4 + $0x1], 0  ;;  %s7486_s12 = smov 0   ;;  %s7488_s13 = smov 0  }
   0xa   :  { %s7490_s14 = smov 0   ;;  %s7492_s15 = smov 0  }
   0xb   :  { %s7494_s16 = smov 0   ;;  %s7496_s17 = smov 0  }
   0xc   :  { %s7498_s18 = smov 0   ;;  %s7500_s19 = smov 0  }
   0xd   :  { %s7502_s20 = smov 0   ;;  %s7504_s21 = smov 0  }
   0xe   :  { %s7506_s22 = smov 0   ;;  %s7508_s23 = smov 0  }
   0xf   :  { %s7510_s24 = smov 0   ;;  %s7512_s25 = smov 0  }
  0x10 LB: > { %8964 = sst [smem:[#allocation13_spill]] %s7428_s17  ;;  %s34_s26 = sadd.s32 1, %s7456_s24  ;;  %s7460_s25 = sphi %s7512_s25, %s22_s25   ;;  %s7456_s24 = sphi %s7510_s24, %s8993_s24   ;;  %s7452_s23 = sphi %s7508_s23, %s8992_s23   ;;  %s7448_s22 = sphi %s7506_s22, %s8991_s22   ;;  %s7444_s21 = sphi %s7504_s21, %s8990_s21   ;;  %s7440_s20 = sphi %s7502_s20, %s8989_s20   ;;  %s7436_s19 = sphi %s7500_s19, %s9001_s19   ;;  %s7432_s18 = sphi %s7498_s18, %s9000_s18   ;;  %s7428_s17 = sphi %s7496_s17, %s8987_s17   ;;  %s7424_s16 = sphi %s7494_s16, %s8999_s16   ;;  %s7420_s15 = sphi %s7492_s15, %s8998_s15   ;;  %s7416_s14 = sphi %s7490_s14, %s8997_s14   ;;  %s7412_s13 = sphi %s7488_s13, %s8996_s13   ;;  %s7408_s12 = sphi %s7486_s12, %s8995_s12  }
  0x11   : > { %8965 = sst [smem:[#allocation14_spill]] %s7440_s20  ;;  %p49_p0 = scmp.eq.s32.totalorder %s7460_s25, 0 }
  0x12   : > { %8966 = sst [smem:[#allocation15_spill]] %s7452_s23  ;;  %p76_p1 = scmp.ne.s32.totalorder %s7428_s17, %s7424_s16 }
  0x13   : > { %8967 = sst [smem:[#allocation16_spill]] %s7456_s24  ;;  %p82_p2 = scmp.ne.s32.totalorder %s7424_s16, %s7420_s15 }
  0x14   : > { %p78_p3 = por %p76_p1, %p49_p0  ;;  %p7096_p4 = scmp.lt.s32.totalorder %s7460_s25, 4 }
  0x15   : > { %s178_s28 = sand.u32 1, %s7460_s25   ;;  %s180_s29 = sand.u32 1, %s7428_s17  }
  0x16   : > { %s4491_s30 = sshll.u32 %s180_s29, 12  ;;  %s8953_s4 = sshll.u32 %s7456_s24, 2 }
  0x17   : > { %s6560_s5 = sshll.u32 %s7452_s23, 11  ;;  %s182_s6 = scalar_lea.vmem [#allocation5], %s4491_s30 }
  0x18   : > { %s193_s7 = sshll.u32 %s182_s6, 4  ;;  %s188_s8 = sadd.s32 %s6560_s5, %s8953_s4  ;;  %s194_s7 = int_to_ptr.vmem [resolvable:$true] %s193_s7 }
  0x19   : > { %s4495_s9 = sshll.u32 %s188_s8, 2  ;;  %p7086_p5 = pnand %p7096_p4, %p78_p3 }
  0x1a   : > { %s8968_s1 = sld [smem:[#allocation22_spill]]  ;;  %p4498_p6 = scmp.ge.s32.totalorder %s7460_s25, 1 }
  0x1b   : > { %s7578_s30 = scalar_lea.sflag [#allocation6], %s178_s28  ;;  %s7462_s5 = smov 512  }
  0x1c   : > { %s7463_s6 = smov 256   ;;  %s7464_s8 = smov 16  }
  0x1d   : > { %p220_p7 = scmp.lt.s32.totalorder %s7460_s25, 5  ;;  %s7587_s10 = sadd.s32 4294967295, %s7460_s25  }
  0x1e   : > { %s31_s11 = sadd.s32 1, %s7452_s23  ;;  %s41_s28 = sadd.s32 1, %s7440_s20 }
  0x1f   : > { %p7582_p8 = pnand %p4498_p6, %p220_p7  ;;  %p32_p9 = scmp.ge.s32.totalorder %s31_s11, 2 }
  0x20   : > { %s190_s29 = scalar_lea.hbm %s8968_s1, %s4495_s9  ;;  %p48_p10 = scmp.ne.s32.totalorder %s7440_s20, %s7436_s19 }
  0x21   : > { %s191_s27 = sshll.u32 %s190_s29, 4  ;;  %p54_p11 = scmp.ne.s32.totalorder %s7436_s19, %s7432_s18  ;;  %s192_s27 = int_to_ptr.hbm [resolvable:$true] %s191_s27 }
  0x22   : > { %7088 = dma.hbm_to_vmem [thread:$0]  (!%p7086_p5), %s192_s27, 65536, %s194_s7, %s7578_s30, %s7462_s5, %s7463_s6, %s7464_s8  }
  0x23   : > { %s9003_s11 = smov (%p32_p9, %s31_s11), 0  ;;  %s9005_s26 = smov (!%p32_p9, %s34_s26), %s7456_s24 }
  0x24   : > { %8970 = sst [smem:[#allocation17_spill]] %s9003_s11  ;;  %s38_s27 = ssub.s32 %s7452_s23, %s9003_s11 }
  0x25   : > { %p7604_p12 = por %p49_p0, %p48_p10  ;;  %p36_p13 = scmp.ge.s32.totalorder %s9005_s26, 2 }
  0x26   : > { %p39_p1 = scmp.eq.s32.totalorder %s38_s27, 0  ;;  %p55_p3 = scmp.eq.s32.totalorder %s7587_s10, 0 }
  0x27   : > { %s158_s29 = sand.u32 1, %s7440_s20   ;;  %s9007_s26 = smov (%p36_p13, %s9005_s26), 0 }
  0x28   : > { %8972 = sst [smem:[#allocation18_spill]] %s9007_s26  ;;  %p7617_p5 = por %p55_p3, %p54_p11 }
  0x29   : > { %s7613_s18 = scalar_select %p39_p1, %s7440_s20, %s41_s28  }
  0x2a   : > { %s65_s6 = ssub.s32 %s7456_s24, %s9007_s26  ;;  %p7628_p6 = por %p82_p2, %p55_p3 }
  0x2b   : > { %8973 = sst [smem:[#allocation19_spill]] %s7613_s18  ;;  %s66_s8 = sor.u32 %s65_s6, %s38_s27 }
  0x2c   : > { %p67_p7 = scmp.eq.s32.totalorder %s66_s8, 0  ;;  %s4488_s28 = sshll.u32 %s158_s29, 5 }
  0x2d   : > { %s6559_s1 = sshll.u32 %s7452_s23, 5  ;;  %s8976_s11 = sadd.s32 1, %s7428_s17 }
  0x2e   : > { %s7636_s18 = scalar_select %p67_p7, %s7428_s17, %s8976_s11  }
  0x2f   : > { %s8978_s0 = sld [smem:[#allocation21_spill]]  ;;  %s162_s3 = scalar_lea.vmem [#allocation2], %s4488_s28 }
  0x30   : > { %8977 = sst [smem:[#allocation20_spill]] %s7636_s18  ;;  %s171_s8 = sshll.u32 %s162_s3, 4  ;;  %s172_s8 = int_to_ptr.vmem [resolvable:$true] %s171_s8 }
  0x31   : > { %p7083_p2 = pnand %p7096_p4, %p7604_p12  ;;  %s159_s23 = scalar_lea.sflag [#allocation3], %s158_s29 }
  0x32   : > { %s4485_s11 = sadd.s32 4294967294, %s7460_s25   ;;  %p93_p9 = scmp.eq.s32.totalorder %s65_s6, 0 }
  0x33   : > { %s95_s20 = sadd.s32 1, %s7416_s14  ;;  %p102_p10 = scmp.ne.s32.totalorder %s7416_s14, %s7412_s13 }
  0x34   : > { %s7650_s26 = scalar_select %p93_p9, %s7416_s14, %s95_s20  }
  0x35   : > { %s167_s15 = scalar_lea.hbm %s8978_s0, %s6559_s1  ;;  %p7654_p11 = por %p102_p10, %p49_p0 }
  0x36   : > { %s169_s27 = sshll.u32 %s167_s15, 4  ;;  %p108_p13 = scmp.ne.s32.totalorder %s7412_s13, %s7408_s12  ;;  %s170_s27 = int_to_ptr.hbm [resolvable:$true] %s169_s27 }
  0x37   : > { %7085 = dma.hbm_to_vmem [thread:$0]  (!%p7083_p2), %s170_s27, 512, %s172_s8, %s159_s23  }
  0x38   : > { %p132_p1 = scmp.eq.s32.totalorder %s7587_s10, 3  ;;  %p138_p12 = scmp.eq.s32.totalorder %s4485_s11, 3 }
  0x39   : > { %p7663_p7 = por %p108_p13, %p55_p3  ;;  %s205_s23 = sand.u32 1, %s7416_s14  }
  0x3a   : > { %p7668_p2 = por %p132_p1, %p102_p10  ;;  %p7672_p9 = por %p138_p12, %p108_p13 }
  0x3b   : > { %s4496_s6 = sshll.u32 %s205_s23, 2  ;;  %s8983_s28 = sshll.u32 %s7456_s24, 2 }
  0x3c   : > { %s211_s8 = scalar_lea.hbm %s8951_s2, %s8983_s28  ;;  %s207_s20 = scalar_lea.vmem [#allocation7], %s4496_s6 }
  0x3d   : > { %s213_s11 = sshll.u32 %s211_s8, 4  ;;  %s215_s0 = sshll.u32 %s207_s20, 4  ;;  %s214_s11 = int_to_ptr.hbm [resolvable:$true] %s213_s11  ;;  %s216_s0 = int_to_ptr.vmem [resolvable:$true] %s215_s0 }
  0x3e   : > { %p7089_p0 = pnand %p7096_p4, %p7654_p11  ;;  %224 = sbr.rel (%p7582_p8) target bundleno = 832 (0x340), region = 32 }
  0x3f   : > { %s226_s23 = sand.u32 (!%p7582_p8), 1, %s7436_s19  }
  0x40   : > { %7091 = dma.hbm_to_vmem [thread:$0]  (!%p7089_p0), %s214_s11, 64, %s216_s0, %s7578_s30  }
  0x41   : > { %s4499_s24 = sshll.u32 (!%p7582_p8), %s226_s23, 5  ;;  %s227_s18 = scalar_lea.sflag (!%p7582_p8), [#allocation3], %s226_s23 }
  0x42   : > { %s7689_s17 = scalar_lea.vmem (!%p7582_p8), [#allocation2], %s4499_s24 }
  0x43   : > { %7391 = dma.done.wait (%p7617_p5), %s227_s18, 512  }
  0x44   : > { %7393 = vsyncadd (%p7617_p5), %s227_s18, 4294966784  ;;  %s236_s1 = sand.u32 1, %s7587_s10   ;;  %s238_s0 = sand.u32 1, %s7424_s16  }
  0x45   : > { %s4500_s30 = sshll.u32 %s238_s0, 12  ;;  %s237_s9 = scalar_lea.sflag [#allocation6], %s236_s1 }
  0x46   : > { %s7697_s6 = scalar_lea.vmem [#allocation5], %s4500_s30 }
  0x47   : > { %7395 = dma.done.wait (%p7628_p6), %s237_s9, 65536  }
  0x48   : > { %7397 = vsyncadd (%p7628_p6), %s237_s9, 4294901760  ;;  %s7704_s24 = sand.u32 1, %s7412_s13  }
  0x49   : > { %s4501_s18 = sshll.u32 %s7704_s24, 2 }
  0x4a   : > { %s7707_s5 = scalar_lea.vmem [#allocation7], %s4501_s18 }
  0x4b   : > { %7399 = dma.done.wait (%p7663_p7), %s237_s9, 64  }
  0x4c   : > { %7401 = vsyncadd (%p7663_p7), %s237_s9, 4294967232  ;;  %s4502_s10 = sshll.u32 %s7704_s24, 3  ;;  %p4503_p4 = scmp.ne.s32.totalorder %s7444_s21, 0 }
  0x4d   : > { %s7714_s28 = scalar_lea.vmem [#allocation8], %s4502_s10 }
  0x4e   : > { %292 = sbr.rel (%p4503_p4) target bundleno = 85 (0x55), region = 48 }
  0x53   : > { %v7465_v0 = vmov 0.0  }
  0x54   : > { %293 = vst [vmem:[%s7714_s28] sm:$0xff] %v7465_v0 }
  0x55 PF: > { %v4618_v1 = vld [vmem:[%s7697_s6 + $0xe0] sm:$0xf]  ;;  %v6591_v2 = vld [vmem:[%s7697_s6 + $0xec] sm:$0xf0]  ;;  %vm4267_vm0 = vcmask 1041408   ;;  %vm4269_vm1 = vcmask 1045508  }
  0x56   : > { %v4746_v3 = vld [vmem:[%s7697_s6 + $0x1e0] sm:$0xf]  ;;  %v4619_v4 = vor.u32 %v6591_v2, %v4618_v1  ;;  %v6623_v5 = vld [vmem:[%s7697_s6 + $0x1ec] sm:$0xf0]  ;;  %vm4271_vm2 = vcmask 1043456   ;;  %p6552_p8 = scmp.ne.s32.totalorder %s7444_s21, 1 }
  0x57   : > { %v4874_v6 = vld [vmem:[%s7697_s6 + $0x2e0] sm:$0xf]  ;;  %v6655_v7 = vld [vmem:[%s7697_s6 + $0x2ec] sm:$0xf0]  ;;  %v4747_v8 = vor.u32 %v6623_v5, %v4746_v3 }
  0x58   : > { %v4875_v9 = vor.u32 %v6655_v7, %v4874_v6  ;;  %v5002_v10 = vld [vmem:[%s7697_s6 + $0x3e0] sm:$0xf]  ;;  %v6687_v11 = vld [vmem:[%s7697_s6 + $0x3ec] sm:$0xf0]  ;;  %3428 = vmatpush.bf16.msra.mxu0 %v4619_v4 }
  0x59   : > { %v4602_v12 = vld [vmem:[%s7697_s6 + $0xc0] sm:$0xf]  ;;  %v5003_v13 = vor.u32 %v6687_v11, %v5002_v10  ;;  %v6587_v14 = vld [vmem:[%s7697_s6 + $0xcc] sm:$0xf0]  ;;  %3441 = vmatpush.bf16.msra.mxu1 %v4747_v8 }
  0x5a   : > { %v4730_v15 = vld [vmem:[%s7697_s6 + $0x1c0] sm:$0xf]  ;;  %v6619_v16 = vld [vmem:[%s7697_s6 + $0x1cc] sm:$0xf0]  ;;  %3454 = vmatpush.bf16.msra.mxu2 %v4875_v9  ;;  %v4603_v17 = vor.u32 %v6587_v14, %v4602_v12 }
  0x5b   : > { %v4731_v18 = vor.u32 %v6619_v16, %v4730_v15  ;;  %v4858_v19 = vld [vmem:[%s7697_s6 + $0x2c0] sm:$0xf]  ;;  %v6651_v20 = vld [vmem:[%s7697_s6 + $0x2cc] sm:$0xf0]  ;;  %3467 = vmatpush.bf16.msra.mxu3 %v5003_v13 }
  0x5c   : > { %v4986_v21 = vld [vmem:[%s7697_s6 + $0x3c0] sm:$0xf]  ;;  %v4859_v22 = vor.u32 %v6651_v20, %v4858_v19  ;;  %v6683_v23 = vld [vmem:[%s7697_s6 + $0x3cc] sm:$0xf0]  ;;  %3429 = vmatpush.bf16.msra.mxu0 %v4603_v17 }
  0x5d   : > { %v4586_v24 = vld [vmem:[%s7697_s6 + $0xa0] sm:$0xf]  ;;  %v6583_v25 = vld [vmem:[%s7697_s6 + $0xac] sm:$0xf0]  ;;  %v4987_v26 = vor.u32 %v6683_v23, %v4986_v21  ;;  %3442 = vmatpush.bf16.msra.mxu1 %v4731_v18 }
  0x5e   : > { %v4714_v27 = vld [vmem:[%s7697_s6 + $0x1a0] sm:$0xf]  ;;  %v6615_v28 = vld [vmem:[%s7697_s6 + $0x1ac] sm:$0xf0]  ;;  %v4587_v30 = vor.u32 %v6583_v25, %v4586_v24  ;;  %3455 = vmatpush.bf16.msra.mxu2 %v4859_v22 }
  0x5f   : > { %v4842_v29 = vld [vmem:[%s7697_s6 + $0x2a0] sm:$0xf]  ;;  %v6647_v31 = vld [vmem:[%s7697_s6 + $0x2ac] sm:$0xf0]  ;;  %v4715_v34 = vor.u32 %v6615_v28, %v4714_v27  ;;  %3468 = vmatpush.bf16.msra.mxu3 %v4987_v26 }
  0x60   : > { %v4970_v32 = vld [vmem:[%s7697_s6 + $0x3a0] sm:$0xf]  ;;  %v6679_v33 = vld [vmem:[%s7697_s6 + $0x3ac] sm:$0xf0]  ;;  %v4843_v35 = vor.u32 %v6647_v31, %v4842_v29  ;;  %3430 = vmatpush.bf16.msra.mxu0 %v4587_v30 }
  0x61   : > { %v4570_v36 = vld [vmem:[%s7697_s6 + $0x80] sm:$0xf]  ;;  %v6579_v37 = vld [vmem:[%s7697_s6 + $0x8c] sm:$0xf0]  ;;  %v4971_v39 = vor.u32 %v6679_v33, %v4970_v32  ;;  %3443 = vmatpush.bf16.msra.mxu1 %v4715_v34 }
  0x62   : > { %v4698_v38 = vld [vmem:[%s7697_s6 + $0x180] sm:$0xf]  ;;  %v6611_v40 = vld [vmem:[%s7697_s6 + $0x18c] sm:$0xf0]  ;;  %v4571_v45 = vor.u32 %v6579_v37, %v4570_v36  ;;  %3456 = vmatpush.bf16.msra.mxu2 %v4843_v35 }
  0x63   : > { %v4826_v41 = vld [vmem:[%s7697_s6 + $0x280] sm:$0xf]  ;;  %v6643_v42 = vld [vmem:[%s7697_s6 + $0x28c] sm:$0xf0]  ;;  %v4699_v46 = vor.u32 %v6611_v40, %v4698_v38  ;;  %3469 = vmatpush.bf16.msra.mxu3 %v4971_v39 }
  0x64   : > { %v4954_v43 = vld [vmem:[%s7697_s6 + $0x380] sm:$0xf]  ;;  %v6675_v44 = vld [vmem:[%s7697_s6 + $0x38c] sm:$0xf0]  ;;  %v4827_v47 = vor.u32 %v6643_v42, %v4826_v41  ;;  %3431 = vmatpush.bf16.msra.mxu0 %v4571_v45 }
  0x65   : > { %v4554_v48 = vld [vmem:[%s7697_s6 + $0x60] sm:$0xf]  ;;  %v6575_v49 = vld [vmem:[%s7697_s6 + $0x6c] sm:$0xf0]  ;;  %v4955_v51 = vor.u32 %v6675_v44, %v4954_v43  ;;  %3444 = vmatpush.bf16.msra.mxu1 %v4699_v46 }
  0x66   : > { %v4682_v50 = vld [vmem:[%s7697_s6 + $0x160] sm:$0xf]  ;;  %v6607_v52 = vld [vmem:[%s7697_s6 + $0x16c] sm:$0xf0]  ;;  %v4555_v57 = vor.u32 %v6575_v49, %v4554_v48  ;;  %3457 = vmatpush.bf16.msra.mxu2 %v4827_v47 }
  0x67   : > { %v4810_v53 = vld [vmem:[%s7697_s6 + $0x260] sm:$0xf]  ;;  %v6639_v54 = vld [vmem:[%s7697_s6 + $0x26c] sm:$0xf0]  ;;  %v4683_v58 = vor.u32 %v6607_v52, %v4682_v50  ;;  %3470 = vmatpush.bf16.msra.mxu3 %v4955_v51 }
  0x68   : > { %v4938_v55 = vld [vmem:[%s7697_s6 + $0x360] sm:$0xf]  ;;  %v6671_v56 = vld [vmem:[%s7697_s6 + $0x36c] sm:$0xf0]  ;;  %v4811_v59 = vor.u32 %v6639_v54, %v4810_v53  ;;  %3432 = vmatpush.bf16.msra.mxu0 %v4555_v57 }
  0x69   : > { %v4538_v60 = vld [vmem:[%s7697_s6 + $0x40] sm:$0xf]  ;;  %v6571_v61 = vld [vmem:[%s7697_s6 + $0x4c] sm:$0xf0]  ;;  %v4939_v63 = vor.u32 %v6671_v56, %v4938_v55  ;;  %3445 = vmatpush.bf16.msra.mxu1 %v4683_v58 }
  0x6a   : > { %v4666_v62 = vld [vmem:[%s7697_s6 + $0x140] sm:$0xf]  ;;  %v6603_v0 = vld [vmem:[%s7697_s6 + $0x14c] sm:$0xf0]  ;;  %v4539_v5 = vor.u32 %v6571_v61, %v4538_v60  ;;  %3458 = vmatpush.bf16.msra.mxu2 %v4811_v59 }
  0x6b   : > { %v4794_v1 = vld [vmem:[%s7697_s6 + $0x240] sm:$0xf]  ;;  %v6635_v2 = vld [vmem:[%s7697_s6 + $0x24c] sm:$0xf0]  ;;  %v4667_v6 = vor.u32 %v6603_v0, %v4666_v62  ;;  %3471 = vmatpush.bf16.msra.mxu3 %v4939_v63 }
  0x6c   : > { %v4922_v3 = vld [vmem:[%s7697_s6 + $0x340] sm:$0xf]  ;;  %v6667_v4 = vld [vmem:[%s7697_s6 + $0x34c] sm:$0xf0]  ;;  %v4795_v7 = vor.u32 %v6635_v2, %v4794_v1  ;;  %3433 = vmatpush.bf16.msra.mxu0 %v4539_v5 }
  0x6d   : > { %v4522_v8 = vld [vmem:[%s7697_s6 + $0x20] sm:$0xf]  ;;  %v6567_v9 = vld [vmem:[%s7697_s6 + $0x2c] sm:$0xf0]  ;;  %v4923_v11 = vor.u32 %v6667_v4, %v4922_v3  ;;  %3446 = vmatpush.bf16.msra.mxu1 %v4667_v6 }
  0x6e   : > { %v4650_v10 = vld [vmem:[%s7697_s6 + $0x120] sm:$0xf]  ;;  %v6599_v12 = vld [vmem:[%s7697_s6 + $0x12c] sm:$0xf0]  ;;  %v4523_v17 = vor.u32 %v6567_v9, %v4522_v8  ;;  %3459 = vmatpush.bf16.msra.mxu2 %v4795_v7 }
  0x6f   : > { %v4778_v13 = vld [vmem:[%s7697_s6 + $0x220] sm:$0xf]  ;;  %v6631_v14 = vld [vmem:[%s7697_s6 + $0x22c] sm:$0xf0]  ;;  %v4651_v20 = vor.u32 %v6599_v12, %v4650_v10  ;;  %3472 = vmatpush.bf16.msra.mxu3 %v4923_v11 }
  0x70   : > { %v4906_v15 = vld [vmem:[%s7697_s6 + $0x320] sm:$0xf]  ;;  %v6663_v16 = vld [vmem:[%s7697_s6 + $0x32c] sm:$0xf0]  ;;  %v4779_v21 = vor.u32 %v6631_v14, %v4778_v13  ;;  %3434 = vmatpush.bf16.msra.mxu0 %v4523_v17 }
  0x71   : > { %v4506_v18 = vld [vmem:[%s7697_s6] sm:$0xf]  ;;  %v6563_v19 = vld [vmem:[%s7697_s6 + $0xc] sm:$0xf0]  ;;  %v4907_v25 = vor.u32 %v6663_v16, %v4906_v15  ;;  %3447 = vmatpush.bf16.msra.mxu1 %v4651_v20 }
  0x72   : > { %v4634_v22 = vld [vmem:[%s7697_s6 + $0x100] sm:$0xf]  ;;  %v6595_v23 = vld [vmem:[%s7697_s6 + $0x10c] sm:$0xf0]  ;;  %v4507_v32 = vor.u32 %v6563_v19, %v4506_v18  ;;  %3460 = vmatpush.bf16.msra.mxu2 %v4779_v21 }
  0x73   : > { %v4762_v24 = vld [vmem:[%s7697_s6 + $0x200] sm:$0xf]  ;;  %v6627_v26 = vld [vmem:[%s7697_s6 + $0x20c] sm:$0xf0]  ;;  %v4635_v36 = vor.u32 %v6595_v23, %v4634_v22  ;;  %3473 = vmatpush.bf16.msra.mxu3 %v4907_v25 }
  0x74   : > { %v4890_v27 = vld [vmem:[%s7697_s6 + $0x300] sm:$0xf]  ;;  %v6659_v28 = vld [vmem:[%s7697_s6 + $0x30c] sm:$0xf0]  ;;  %v4763_v37 = vor.u32 %v6627_v26, %v4762_v24  ;;  %3435 = vmatpush.bf16.msra.mxu0 %v4507_v32 }
  0x75   : > { %v5130_v29 = vld [vmem:[%s7697_s6 + $0x4e0] sm:$0xf]  ;;  %v6719_v30 = vld [vmem:[%s7697_s6 + $0x4ec] sm:$0xf0]  ;;  %v4891_v40 = vor.u32 %v6659_v28, %v4890_v27  ;;  %3448 = vmatpush.bf16.msra.mxu1 %v4635_v36 }
  0x76   : > { %v5258_v31 = vld [vmem:[%s7697_s6 + $0x5e0] sm:$0xf]  ;;  %v6751_v33 = vld [vmem:[%s7697_s6 + $0x5ec] sm:$0xf0]  ;;  %v5131_v41 = vor.u32 %v6719_v30, %v5130_v29  ;;  %3461 = vmatpush.bf16.msra.mxu2 %v4763_v37 }
  0x77   : > { %v5386_v34 = vld [vmem:[%s7697_s6 + $0x6e0] sm:$0xf]  ;;  %v6783_v35 = vld [vmem:[%s7697_s6 + $0x6ec] sm:$0xf0]  ;;  %v5259_v42 = vor.u32 %v6751_v33, %v5258_v31  ;;  %3474 = vmatpush.bf16.msra.mxu3 %v4891_v40 }
  0x78   : > { %v5514_v38 = vld [vmem:[%s7697_s6 + $0x7e0] sm:$0xf]  ;;  %v6815_v39 = vld [vmem:[%s7697_s6 + $0x7ec] sm:$0xf0]  ;;  %v5387_v43 = vor.u32 %v6783_v35, %v5386_v34  ;;  %3480 = vmatpush.bf16.msrb.mxu0 %v5131_v41 }
  0x79   : > { %v5114_v44 = vld [vmem:[%s7697_s6 + $0x4c0] sm:$0xf]  ;;  %v6715_v45 = vld [vmem:[%s7697_s6 + $0x4cc] sm:$0xf0]  ;;  %v5515_v47 = vor.u32 %v6815_v39, %v5514_v38  ;;  %3493 = vmatpush.bf16.msrb.mxu1 %v5259_v42 }
  0x7a   : > { %v5242_v46 = vld [vmem:[%s7697_s6 + $0x5c0] sm:$0xf]  ;;  %v6747_v48 = vld [vmem:[%s7697_s6 + $0x5cc] sm:$0xf0]  ;;  %v5115_v53 = vor.u32 %v6715_v45, %v5114_v44  ;;  %3506 = vmatpush.bf16.msrb.mxu2 %v5387_v43 }
  0x7b   : > { %v5370_v49 = vld [vmem:[%s7697_s6 + $0x6c0] sm:$0xf]  ;;  %v6779_v50 = vld [vmem:[%s7697_s6 + $0x6cc] sm:$0xf0]  ;;  %v5243_v56 = vor.u32 %v6747_v48, %v5242_v46  ;;  %3519 = vmatpush.bf16.msrb.mxu3 %v5515_v47 }
  0x7c   : > { %v5498_v51 = vld [vmem:[%s7697_s6 + $0x7c0] sm:$0xf]  ;;  %v6811_v52 = vld [vmem:[%s7697_s6 + $0x7cc] sm:$0xf0]  ;;  %v5371_v57 = vor.u32 %v6779_v50, %v5370_v49  ;;  %3481 = vmatpush.bf16.msrb.mxu0 %v5115_v53 }
  0x7d   : > { %v5098_v54 = vld [vmem:[%s7697_s6 + $0x4a0] sm:$0xf]  ;;  %v6711_v55 = vld [vmem:[%s7697_s6 + $0x4ac] sm:$0xf0]  ;;  %v5499_v61 = vor.u32 %v6811_v52, %v5498_v51  ;;  %3494 = vmatpush.bf16.msrb.mxu1 %v5243_v56 }
  0x7e   : > { %v5226_v58 = vld [vmem:[%s7697_s6 + $0x5a0] sm:$0xf]  ;;  %v6743_v59 = vld [vmem:[%s7697_s6 + $0x5ac] sm:$0xf0]  ;;  %v5099_v2 = vor.u32 %v6711_v55, %v5098_v54  ;;  %3507 = vmatpush.bf16.msrb.mxu2 %v5371_v57 }
  0x7f   : > { %v295_v60 = vld [vmem:[%s7689_s17] sm:$0xff]  ;;  %v6775_v63 = vld [vmem:[%s7697_s6 + $0x6ac] sm:$0xf0]  ;;  %v5227_v4 = vor.u32 %v6743_v59, %v5226_v58  ;;  %3520 = vmatpush.bf16.msrb.mxu3 %v5499_v61  ;;  %v296_v58 = vld [vmem:[%s7689_s17 + $0x8] sm:$0xff] }
  0x80   : > { %v5354_v62 = vld [vmem:[%s7697_s6 + $0x6a0] sm:$0xf]  ;;  %303 = vst [vmem:[#allocation1] ss:$4 sm:$0xff] %v295_v60  ;;  %v6807_v1 = vld [vmem:[%s7697_s6 + $0x7ac] sm:$0xf0]  ;;  %3482 = vmatpush.bf16.msrb.mxu0 %v5099_v2 }
  0x81   : > { %v5482_v0 = vld [vmem:[%s7697_s6 + $0x7a0] sm:$0xf]  ;;  %v5355_v5 = vor.u32 %v6775_v63, %v5354_v62  ;;  %v6707_v6 = vld [vmem:[%s7697_s6 + $0x48c] sm:$0xf0]  ;;  %3495 = vmatpush.bf16.msrb.mxu1 %v5227_v4  ;;  %305 = vst [vmem:[#allocation1 + $0x20] ss:$4 sm:$0xff] %v296_v58 }
  0x82   : > { %v5082_v3 = vld [vmem:[%s7697_s6 + $0x480] sm:$0xf]  ;;  %v6739_v8 = vld [vmem:[%s7697_s6 + $0x58c] sm:$0xf0]  ;;  %v5483_v9 = vor.u32 %v6807_v1, %v5482_v0 }
  0x83   : > { %v5210_v7 = vld [vmem:[%s7697_s6 + $0x580] sm:$0xf]  ;;  %v6771_v11 = vld [vmem:[%s7697_s6 + $0x68c] sm:$0xf0]  ;;  %v5083_v16 = vor.u32 %v6707_v6, %v5082_v3  ;;  %3508 = vmatpush.bf16.msrb.mxu2 %v5355_v5 }
  0x84   : > { %v5338_v10 = vld [vmem:[%s7697_s6 + $0x680] sm:$0xf]  ;;  %v6803_v13 = vld [vmem:[%s7697_s6 + $0x78c] sm:$0xf0]  ;;  %v5211_v22 = vor.u32 %v6739_v8, %v5210_v7  ;;  %3521 = vmatpush.bf16.msrb.mxu3 %v5483_v9 }
  0x85   : > { %v5466_v12 = vld [vmem:[%s7697_s6 + $0x780] sm:$0xf]  ;;  %v6703_v15 = vld [vmem:[%s7697_s6 + $0x46c] sm:$0xf0]  ;;  %v5339_v23 = vor.u32 %v6771_v11, %v5338_v10  ;;  %3483 = vmatpush.bf16.msrb.mxu0 %v5083_v16 }
  0x86   : > { %v5066_v14 = vld [vmem:[%s7697_s6 + $0x460] sm:$0xf]  ;;  %v6735_v18 = vld [vmem:[%s7697_s6 + $0x56c] sm:$0xf0]  ;;  %v5467_v26 = vor.u32 %v6803_v13, %v5466_v12  ;;  %3496 = vmatpush.bf16.msrb.mxu1 %v5211_v22 }
  0x87   : > { %v5194_v17 = vld [vmem:[%s7697_s6 + $0x560] sm:$0xf]  ;;  %v6767_v20 = vld [vmem:[%s7697_s6 + $0x66c] sm:$0xf0]  ;;  %v5067_v35 = vor.u32 %v6703_v15, %v5066_v14  ;;  %3509 = vmatpush.bf16.msrb.mxu2 %v5339_v23 }
  0x88   : > { %v5322_v19 = vld [vmem:[%s7697_s6 + $0x660] sm:$0xf]  ;;  %v297_v21 = vld [vmem:[%s7689_s17 + $0x10] sm:$0xff]  ;;  %v308_v24 = vld.sshfl [vmem:[#allocation1 + $0x10] sm:$0xff pattern:$0x73625140]  ;;  %v5195_v36 = vor.u32 %v6735_v18, %v5194_v17  ;;  %3522 = vmatpush.bf16.msrb.mxu3 %v5467_v26 }
  0x89   : > { %v306_v25 = vld.sshfl [vmem:[#allocation1] sm:$0xff pattern:$0x73625140]  ;;  %v7822_v27 = vpack.c.bf16 %v308_v24, %v308_v24  ;;  %v309_v29 = vld.sshfl [vmem:[#allocation1 + $0x18] sm:$0xff pattern:$0x73625140]  ;;  %v5323_v37 = vor.u32 %v6767_v20, %v5322_v19  ;;  %3484 = vmatpush.bf16.msrb.mxu0 %v5067_v35 }
  0x8a   : > { %v7824_v28 = vpack.c.bf16 %v306_v25, %v306_v25  ;;  %v307_v30 = vld.sshfl [vmem:[#allocation1 + $0x8] sm:$0xff pattern:$0x73625140]  ;;  %v6799_v32 = vld [vmem:[%s7697_s6 + $0x76c] sm:$0xf0]  ;;  %v7828_v33 = vpack.c.bf16 %v309_v29, %v309_v29  ;;  %3497 = vmatpush.bf16.msrb.mxu1 %v5195_v36 }
  0x8b   : > { %v5450_v31 = vld [vmem:[%s7697_s6 + $0x760] sm:$0xf]  ;;  %314 = vst [vmem:[#allocation1] ss:$4 sm:$0xff] %v297_v21  ;;  %v7830_v34 = vpack.c.bf16 %v307_v30, %v307_v30  ;;  %3462 = vmatmul.bf16.vlgmr.msra.gmra.mxu2 %v7822_v27  ;;  %v6699_v39 = vld [vmem:[%s7697_s6 + $0x44c] sm:$0xf0] }
  0x8c   : > { %v5050_v38 = vld [vmem:[%s7697_s6 + $0x440] sm:$0xf]  ;;  %v5451_v41 = vor.u32 %v6799_v32, %v5450_v31  ;;  %v6731_v42 = vld [vmem:[%s7697_s6 + $0x54c] sm:$0xf0]  ;;  %3436 = vmatmul.bf16.vlgmr.msra.gmra.mxu0 %v7824_v28  ;;  %3475 = vmatmul.bf16.vlgmr.msra.gmra.mxu3 %v7828_v33  ;;  %v298_v21 = vld [vmem:[%s7689_s17 + $0x18] sm:$0xff] }
  0x8d   : > { %v5178_v40 = vld [vmem:[%s7697_s6 + $0x540] sm:$0xf]  ;;  %v6763_v44 = vld [vmem:[%s7697_s6 + $0x64c] sm:$0xf0]  ;;  %3449 = vmatmul.bf16.vlgmr.msra.gmra.mxu1 %v7830_v34  ;;  %v5051_v47 = vor.u32 %v6699_v39, %v5050_v38  ;;  %3510 = vmatpush.bf16.msrb.mxu2 %v5323_v37 }
  0x8e   : > { %v5306_v43 = vld [vmem:[%s7697_s6 + $0x640] sm:$0xf]  ;;  %v6795_v46 = vld [vmem:[%s7697_s6 + $0x74c] sm:$0xf0]  ;;  %v5179_v50 = vor.u32 %v6731_v42, %v5178_v40  ;;  %3523 = vmatpush.bf16.msrb.mxu3 %v5451_v41 }
  0x8f   : > { %v5434_v45 = vld [vmem:[%s7697_s6 + $0x740] sm:$0xf]  ;;  %v6695_v49 = vld [vmem:[%s7697_s6 + $0x42c] sm:$0xf0]  ;;  %v5307_v51 = vor.u32 %v6763_v44, %v5306_v43  ;;  %3485 = vmatpush.bf16.msrb.mxu0 %v5051_v47 }
  0x90   : > { %v5034_v48 = vld [vmem:[%s7697_s6 + $0x420] sm:$0xf]  ;;  %v6727_v53 = vld [vmem:[%s7697_s6 + $0x52c] sm:$0xf0]  ;;  %v5435_v55 = vor.u32 %v6795_v46, %v5434_v45  ;;  %3498 = vmatpush.bf16.msrb.mxu1 %v5179_v50 }
  0x91   : > { %v5162_v52 = vld [vmem:[%s7697_s6 + $0x520] sm:$0xf]  ;;  %v6759_v56 = vld [vmem:[%s7697_s6 + $0x62c] sm:$0xf0]  ;;  %v5035_v61 = vor.u32 %v6695_v49, %v5034_v48  ;;  %3511 = vmatpush.bf16.msrb.mxu2 %v5307_v51 }
  0x92   : > { %v5290_v54 = vld [vmem:[%s7697_s6 + $0x620] sm:$0xf]  ;;  %v6791_v59 = vld [vmem:[%s7697_s6 + $0x72c] sm:$0xf0]  ;;  %v5163_v1 = vor.u32 %v6727_v53, %v5162_v52  ;;  %3524 = vmatpush.bf16.msrb.mxu3 %v5435_v55 }
  0x93   : > { %v5418_v57 = vld [vmem:[%s7697_s6 + $0x720] sm:$0xf]  ;;  %v6691_v62 = vld [vmem:[%s7697_s6 + $0x40c] sm:$0xf0]  ;;  %v5291_v2 = vor.u32 %v6759_v56, %v5290_v54  ;;  %3486 = vmatpush.bf16.msrb.mxu0 %v5035_v61 }
  0x94   : > { %v5018_v60 = vld [vmem:[%s7697_s6 + $0x400] sm:$0xf]  ;;  %v6723_v0 = vld [vmem:[%s7697_s6 + $0x50c] sm:$0xf0]  ;;  %v5419_v6 = vor.u32 %v6791_v59, %v5418_v57  ;;  %3499 = vmatpush.bf16.msrb.mxu1 %v5163_v1 }
  0x95   : > { %v5146_v63 = vld [vmem:[%s7697_s6 + $0x500] sm:$0xf]  ;;  %v6755_v4 = vld [vmem:[%s7697_s6 + $0x60c] sm:$0xf0]  ;;  %v5019_v13 = vor.u32 %v6691_v62, %v5018_v60  ;;  %3512 = vmatpush.bf16.msrb.mxu2 %v5291_v2 }
  0x96   : > { %v5274_v3 = vld [vmem:[%s7697_s6 + $0x600] sm:$0xf]  ;;  %v6787_v7 = vld [vmem:[%s7697_s6 + $0x70c] sm:$0xf0]  ;;  %v5147_v17 = vor.u32 %v6723_v0, %v5146_v63  ;;  %3525 = vmatpush.bf16.msrb.mxu3 %v5419_v6 }
  0x97   : > { %v5402_v5 = vld [vmem:[%s7697_s6 + $0x700] sm:$0xf]  ;;  %v6847_v9 = vld [vmem:[%s7697_s6 + $0x8ec] sm:$0xf0]  ;;  %v5275_v18 = vor.u32 %v6755_v4, %v5274_v3  ;;  %3487 = vmatpush.bf16.msrb.mxu0 %v5019_v13 }
  0x98   : > { %v5642_v8 = vld [vmem:[%s7697_s6 + $0x8e0] sm:$0xf]  ;;  %v6879_v11 = vld [vmem:[%s7697_s6 + $0x9ec] sm:$0xf0]  ;;  %v5403_v22 = vor.u32 %v6787_v7, %v5402_v5  ;;  %3500 = vmatpush.bf16.msrb.mxu1 %v5147_v17 }
  0x99   : > { %v5770_v10 = vld [vmem:[%s7697_s6 + $0x9e0] sm:$0xf]  ;;  %v6911_v14 = vld [vmem:[%s7697_s6 + $0xaec] sm:$0xf0]  ;;  %v5643_v23 = vor.u32 %v6847_v9, %v5642_v8  ;;  %3513 = vmatpush.bf16.msrb.mxu2 %v5275_v18 }
  0x9a   : > { %v5898_v12 = vld [vmem:[%s7697_s6 + $0xae0] sm:$0xf]  ;;  %v6943_v16 = vld [vmem:[%s7697_s6 + $0xbec] sm:$0xf0]  ;;  %v5771_v30 = vor.u32 %v6879_v11, %v5770_v10  ;;  %3526 = vmatpush.bf16.msrb.mxu3 %v5403_v22 }
  0x9b   : > { %v6026_v15 = vld [vmem:[%s7697_s6 + $0xbe0] sm:$0xf]  ;;  %v6843_v20 = vld [vmem:[%s7697_s6 + $0x8cc] sm:$0xf0]  ;;  %v5899_v31 = vor.u32 %v6911_v14, %v5898_v12  ;;  %3532 = vmatpush.bf16.msra.mxu0 %v5643_v23 }
  0x9c   : > { %v5626_v19 = vld [vmem:[%s7697_s6 + $0x8c0] sm:$0xf]  ;;  %v6875_v25 = vld [vmem:[%s7697_s6 + $0x9cc] sm:$0xf0]  ;;  %v6027_v36 = vor.u32 %v6943_v16, %v6026_v15  ;;  %3545 = vmatpush.bf16.msra.mxu1 %v5771_v30 }
  0x9d   : > { %v5754_v24 = vld [vmem:[%s7697_s6 + $0x9c0] sm:$0xf]  ;;  %v312_v26 = vld.sshfl [vmem:[#allocation1 + $0x30] sm:$0xff pattern:$0x73625140]  ;;  %v5627_v44 = vor.u32 %v6843_v20, %v5626_v19  ;;  %3558 = vmatpush.bf16.msra.mxu2 %v5899_v31 }
  0x9e   : > { %v310_v29 = vld.sshfl [vmem:[#allocation1 + $0x20] sm:$0xff pattern:$0x73625140]  ;;  %v313_v32 = vld.sshfl [vmem:[#allocation1 + $0x38] sm:$0xff pattern:$0x73625140]  ;;  %v7876_v39 = vpack.c.bf16 %v312_v26, %v312_v26  ;;  %v5755_v46 = vor.u32 %v6875_v25, %v5754_v24  ;;  %3571 = vmatpush.bf16.msra.mxu3 %v6027_v36 }
  0x9f   : > { %v311_v35 = vld.sshfl [vmem:[#allocation1 + $0x28] sm:$0xff pattern:$0x73625140]  ;;  %v6907_v38 = vld [vmem:[%s7697_s6 + $0xacc] sm:$0xf0]  ;;  %v7880_v42 = vpack.c.bf16 %v310_v29, %v310_v29  ;;  %v7882_v43 = vpack.c.bf16 %v313_v32, %v313_v32  ;;  %3533 = vmatpush.bf16.msra.mxu0 %v5627_v44 }
  0xa0   : > { %v5882_v37 = vld [vmem:[%s7697_s6 + $0xac0] sm:$0xf]  ;;  %315 = vst [vmem:[#allocation1 + $0x20] ss:$4 sm:$0xff] %v298_v21  ;;  %v6939_v41 = vld [vmem:[%s7697_s6 + $0xbcc] sm:$0xf0]  ;;  %v7884_v45 = vpack.c.bf16 %v311_v35, %v311_v35  ;;  %3514 = vmatmul.bf16.vlgmr.msrb.gmra.mxu2 %v7876_v39  ;;  %3546 = vmatpush.bf16.msra.mxu1 %v5755_v46 }
  0xa1   : > { %v6010_v40 = vld [vmem:[%s7697_s6 + $0xbc0] sm:$0xf]  ;;  %v5883_v47 = vor.u32 %v6907_v38, %v5882_v37  ;;  %v6839_v49 = vld [vmem:[%s7697_s6 + $0x8ac] sm:$0xf0]  ;;  %3488 = vmatmul.bf16.vlgmr.msrb.gmra.mxu0 %v7880_v42  ;;  %3527 = vmatmul.bf16.vlgmr.msrb.gmra.mxu3 %v7882_v43 }
  0xa2   : > { %v5610_v48 = vld [vmem:[%s7697_s6 + $0x8a0] sm:$0xf]  ;;  %v6011_v51 = vor.u32 %v6939_v41, %v6010_v40  ;;  %v6871_v52 = vld [vmem:[%s7697_s6 + $0x9ac] sm:$0xf0]  ;;  %3501 = vmatmul.bf16.vlgmr.msrb.gmra.mxu1 %v7884_v45 }
  0xa3   : > { %v5738_v50 = vld [vmem:[%s7697_s6 + $0x9a0] sm:$0xf]  ;;  %v6903_v54 = vld [vmem:[%s7697_s6 + $0xaac] sm:$0xf0]  ;;  %v5611_v57 = vor.u32 %v6839_v49, %v5610_v48  ;;  %3559 = vmatpush.bf16.msra.mxu2 %v5883_v47 }
  0xa4   : > { %v5866_v53 = vld [vmem:[%s7697_s6 + $0xaa0] sm:$0xf]  ;;  %v6935_v56 = vld [vmem:[%s7697_s6 + $0xbac] sm:$0xf0]  ;;  %v5739_v58 = vor.u32 %v6871_v52, %v5738_v50  ;;  %3572 = vmatpush.bf16.msra.mxu3 %v6011_v51 }
  0xa5   : > { %v5994_v55 = vld [vmem:[%s7697_s6 + $0xba0] sm:$0xf]  ;;  %v5867_v59 = vor.u32 %v6903_v54, %v5866_v53  ;;  %v6835_v61 = vld [vmem:[%s7697_s6 + $0x88c] sm:$0xf0]  ;;  %3534 = vmatpush.bf16.msra.mxu0 %v5611_v57 }
  0xa6   : > { %v5594_v60 = vld [vmem:[%s7697_s6 + $0x880] sm:$0xf]  ;;  %v5995_v63 = vor.u32 %v6935_v56, %v5994_v55  ;;  %v6867_v0 = vld [vmem:[%s7697_s6 + $0x98c] sm:$0xf0]  ;;  %3547 = vmatpush.bf16.msra.mxu1 %v5739_v58 }
  0xa7   : > { %v5722_v62 = vld [vmem:[%s7697_s6 + $0x980] sm:$0xf]  ;;  %v6899_v2 = vld [vmem:[%s7697_s6 + $0xa8c] sm:$0xf0]  ;;  %v5595_v5 = vor.u32 %v6835_v61, %v5594_v60  ;;  %3560 = vmatpush.bf16.msra.mxu2 %v5867_v59 }
  0xa8   : > { %v5850_v1 = vld [vmem:[%s7697_s6 + $0xa80] sm:$0xf]  ;;  %v6931_v4 = vld [vmem:[%s7697_s6 + $0xb8c] sm:$0xf0]  ;;  %v5723_v6 = vor.u32 %v6867_v0, %v5722_v62  ;;  %3573 = vmatpush.bf16.msra.mxu3 %v5995_v63 }
  0xa9   : > { %v5978_v3 = vld [vmem:[%s7697_s6 + $0xb80] sm:$0xf]  ;;  %v5851_v7 = vor.u32 %v6899_v2, %v5850_v1  ;;  %v6831_v9 = vld [vmem:[%s7697_s6 + $0x86c] sm:$0xf0]  ;;  %3535 = vmatpush.bf16.msra.mxu0 %v5595_v5 }
  0xaa   : > { %v5578_v8 = vld [vmem:[%s7697_s6 + $0x860] sm:$0xf]  ;;  %v5979_v11 = vor.u32 %v6931_v4, %v5978_v3  ;;  %v6863_v12 = vld [vmem:[%s7697_s6 + $0x96c] sm:$0xf0]  ;;  %3548 = vmatpush.bf16.msra.mxu1 %v5723_v6 }
  0xab   : > { %v5706_v10 = vld [vmem:[%s7697_s6 + $0x960] sm:$0xf]  ;;  %v6895_v14 = vld [vmem:[%s7697_s6 + $0xa6c] sm:$0xf0]  ;;  %v5579_v17 = vor.u32 %v6831_v9, %v5578_v8  ;;  %3561 = vmatpush.bf16.msra.mxu2 %v5851_v7 }
  0xac   : > { %v5834_v13 = vld [vmem:[%s7697_s6 + $0xa60] sm:$0xf]  ;;  %v6927_v16 = vld [vmem:[%s7697_s6 + $0xb6c] sm:$0xf0]  ;;  %v5707_v18 = vor.u32 %v6863_v12, %v5706_v10  ;;  %3574 = vmatpush.bf16.msra.mxu3 %v5979_v11 }
  0xad   : > { %v5962_v15 = vld [vmem:[%s7697_s6 + $0xb60] sm:$0xf]  ;;  %v5835_v19 = vor.u32 %v6895_v14, %v5834_v13  ;;  %v6827_v21 = vld [vmem:[%s7697_s6 + $0x84c] sm:$0xf0]  ;;  %3536 = vmatpush.bf16.msra.mxu0 %v5579_v17 }
  0xae   : > { %v5562_v20 = vld [vmem:[%s7697_s6 + $0x840] sm:$0xf]  ;;  %v5963_v23 = vor.u32 %v6927_v16, %v5962_v15  ;;  %v6859_v24 = vld [vmem:[%s7697_s6 + $0x94c] sm:$0xf0]  ;;  %3549 = vmatpush.bf16.msra.mxu1 %v5707_v18 }
  0xaf   : > { %v5690_v22 = vld [vmem:[%s7697_s6 + $0x940] sm:$0xf]  ;;  %v6891_v26 = vld [vmem:[%s7697_s6 + $0xa4c] sm:$0xf0]  ;;  %v5563_v31 = vor.u32 %v6827_v21, %v5562_v20  ;;  %3562 = vmatpush.bf16.msra.mxu2 %v5835_v19 }
  0xb0   : > { %v5818_v25 = vld [vmem:[%s7697_s6 + $0xa40] sm:$0xf]  ;;  %v6923_v30 = vld [vmem:[%s7697_s6 + $0xb4c] sm:$0xf0]  ;;  %v5691_v32 = vor.u32 %v6859_v24, %v5690_v22  ;;  %3575 = vmatpush.bf16.msra.mxu3 %v5963_v23 }
  0xb1   : > { %v5946_v29 = vld [vmem:[%s7697_s6 + $0xb40] sm:$0xf]  ;;  %v5819_v35 = vor.u32 %v6891_v26, %v5818_v25  ;;  %v6823_v37 = vld [vmem:[%s7697_s6 + $0x82c] sm:$0xf0]  ;;  %3537 = vmatpush.bf16.msra.mxu0 %v5563_v31 }
  0xb2   : > { %v5546_v36 = vld [vmem:[%s7697_s6 + $0x820] sm:$0xf]  ;;  %v5947_v40 = vor.u32 %v6923_v30, %v5946_v29  ;;  %v6855_v41 = vld [vmem:[%s7697_s6 + $0x92c] sm:$0xf0]  ;;  %3550 = vmatpush.bf16.msra.mxu1 %v5691_v32 }
  0xb3   : > { %v5674_v38 = vld [vmem:[%s7697_s6 + $0x920] sm:$0xf]  ;;  %v6887_v46 = vld [vmem:[%s7697_s6 + $0xa2c] sm:$0xf0]  ;;  %v5547_v50 = vor.u32 %v6823_v37, %v5546_v36  ;;  %3563 = vmatpush.bf16.msra.mxu2 %v5819_v35 }
  0xb4   : > { %v5802_v44 = vld [vmem:[%s7697_s6 + $0xa20] sm:$0xf]  ;;  %v6919_v48 = vld [vmem:[%s7697_s6 + $0xb2c] sm:$0xf0]  ;;  %v5675_v54 = vor.u32 %v6855_v41, %v5674_v38  ;;  %3576 = vmatpush.bf16.msra.mxu3 %v5947_v40 }
  0xb5   : > { %v5930_v47 = vld [vmem:[%s7697_s6 + $0xb20] sm:$0xf]  ;;  %v6819_v51 = vld [vmem:[%s7697_s6 + $0x80c] sm:$0xf0]  ;;  %v5803_v55 = vor.u32 %v6887_v46, %v5802_v44  ;;  %3538 = vmatpush.bf16.msra.mxu0 %v5547_v50 }
  0xb6   : > { %v5530_v49 = vld [vmem:[%s7697_s6 + $0x800] sm:$0xf]  ;;  %v6851_v53 = vld [vmem:[%s7697_s6 + $0x90c] sm:$0xf0]  ;;  %v5931_v59 = vor.u32 %v6919_v48, %v5930_v47  ;;  %3551 = vmatpush.bf16.msra.mxu1 %v5675_v54 }
  0xb7   : > { %v5658_v52 = vld [vmem:[%s7697_s6 + $0x900] sm:$0xf]  ;;  %v6883_v57 = vld [vmem:[%s7697_s6 + $0xa0c] sm:$0xf0]  ;;  %v5531_v2 = vor.u32 %v6819_v51, %v5530_v49  ;;  %3564 = vmatpush.bf16.msra.mxu2 %v5803_v55 }
  0xb8   : > { %v5786_v56 = vld [vmem:[%s7697_s6 + $0xa00] sm:$0xf]  ;;  %v6915_v60 = vld [vmem:[%s7697_s6 + $0xb0c] sm:$0xf0]  ;;  %v5659_v6 = vor.u32 %v6851_v53, %v5658_v52  ;;  %3577 = vmatpush.bf16.msra.mxu3 %v5931_v59 }
  0xb9   : > { %v5914_v58 = vld [vmem:[%s7697_s6 + $0xb00] sm:$0xf]  ;;  %v6975_v62 = vld [vmem:[%s7697_s6 + $0xcec] sm:$0xf0]  ;;  %v5787_v7 = vor.u32 %v6883_v57, %v5786_v56  ;;  %3539 = vmatpush.bf16.msra.mxu0 %v5531_v2 }
  0xba   : > { %v6154_v61 = vld [vmem:[%s7697_s6 + $0xce0] sm:$0xf]  ;;  %v7007_v0 = vld [vmem:[%s7697_s6 + $0xdec] sm:$0xf0]  ;;  %v5915_v10 = vor.u32 %v6915_v60, %v5914_v58  ;;  %3552 = vmatpush.bf16.msra.mxu1 %v5659_v6 }
  0xbb   : > { %v6282_v63 = vld [vmem:[%s7697_s6 + $0xde0] sm:$0xf]  ;;  %v7039_v3 = vld [vmem:[%s7697_s6 + $0xeec] sm:$0xf0]  ;;  %v6155_v11 = vor.u32 %v6975_v62, %v6154_v61  ;;  %3565 = vmatpush.bf16.msra.mxu2 %v5787_v7 }
  0xbc   : > { %v6410_v1 = vld [vmem:[%s7697_s6 + $0xee0] sm:$0xf]  ;;  %v7071_v5 = vld [vmem:[%s7697_s6 + $0xfec] sm:$0xf0]  ;;  %v6283_v14 = vor.u32 %v7007_v0, %v6282_v63  ;;  %3578 = vmatpush.bf16.msra.mxu3 %v5915_v10 }
  0xbd   : > { %v6538_v4 = vld [vmem:[%s7697_s6 + $0xfe0] sm:$0xf]  ;;  %v316_v8 = vld.sshfl [vmem:[#allocation1] sm:$0xff pattern:$0x73625140]  ;;  %v6411_v15 = vor.u32 %v7039_v3, %v6410_v1  ;;  %3584 = vmatpush.bf16.msrb.mxu0 %v6155_v11 }
  0xbe   : > { %v318_v9 = vld.sshfl [vmem:[#allocation1 + $0x10] sm:$0xff pattern:$0x73625140]  ;;  %v317_v12 = vld.sshfl [vmem:[#allocation1 + $0x8] sm:$0xff pattern:$0x73625140]  ;;  %v6539_v19 = vor.u32 %v7071_v5, %v6538_v4  ;;  %v7949_v20 = vpack.c.bf16 %v316_v8, %v316_v8  ;;  %3597 = vmatpush.bf16.msrb.mxu1 %v6283_v14 }
  0xbf   : > { %v319_v13 = vld.sshfl [vmem:[#allocation1 + $0x18] sm:$0xff pattern:$0x73625140]  ;;  %v6138_v16 = vld [vmem:[%s7697_s6 + $0xcc0] sm:$0xf]  ;;  %v7954_v24 = vpack.c.bf16 %v318_v9, %v318_v9  ;;  %v7956_v25 = vpack.c.bf16 %v317_v12, %v317_v12  ;;  %3610 = vmatpush.bf16.msrb.mxu2 %v6411_v15 }
  0xc0   : > { %v6971_v17 = vld [vmem:[%s7697_s6 + $0xccc] sm:$0xf0]  ;;  %v6266_v18 = vld [vmem:[%s7697_s6 + $0xdc0] sm:$0xf]  ;;  %v7960_v30 = vpack.c.bf16 %v319_v13, %v319_v13  ;;  %3623 = vmatpush.bf16.msrb.mxu3 %v6539_v19  ;;  %3540 = vmatmul.bf16.vlgmr.msra.gmra.mxu0 %v7949_v20 }
  0xc1   : > { %v7003_v21 = vld [vmem:[%s7697_s6 + $0xdcc] sm:$0xf0]  ;;  %v6394_v22 = vld [vmem:[%s7697_s6 + $0xec0] sm:$0xf]  ;;  %v6139_v31 = vor.u32 %v6971_v17, %v6138_v16  ;;  %3566 = vmatmul.bf16.vlgmr.msra.gmra.mxu2 %v7954_v24  ;;  %3553 = vmatmul.bf16.vlgmr.msra.gmra.mxu1 %v7956_v25 }
  0xc2   : > { %v7035_v23 = vld [vmem:[%s7697_s6 + $0xecc] sm:$0xf0]  ;;  %v6522_v26 = vld [vmem:[%s7697_s6 + $0xfc0] sm:$0xf]  ;;  %v6267_v32 = vor.u32 %v7003_v21, %v6266_v18  ;;  %3579 = vmatmul.bf16.vlgmr.msra.gmra.mxu3 %v7960_v30 }
  0xc3   : > { %v7067_v29 = vld [vmem:[%s7697_s6 + $0xfcc] sm:$0xf0]  ;;  %v6395_v35 = vor.u32 %v7035_v23, %v6394_v22  ;;  %v6122_v36 = vld [vmem:[%s7697_s6 + $0xca0] sm:$0xf]  ;;  %3585 = vmatpush.bf16.msrb.mxu0 %v6139_v31 }
  0xc4   : > { %v6967_v37 = vld [vmem:[%s7697_s6 + $0xcac] sm:$0xf0]  ;;  %v6250_v38 = vld [vmem:[%s7697_s6 + $0xda0] sm:$0xf]  ;;  %v6523_v40 = vor.u32 %v7067_v29, %v6522_v26  ;;  %3598 = vmatpush.bf16.msrb.mxu1 %v6267_v32 }
  0xc5   : > { %v6999_v41 = vld [vmem:[%s7697_s6 + $0xdac] sm:$0xf0]  ;;  %v6378_v44 = vld [vmem:[%s7697_s6 + $0xea0] sm:$0xf]  ;;  %v6123_v49 = vor.u32 %v6967_v37, %v6122_v36  ;;  %3611 = vmatpush.bf16.msrb.mxu2 %v6395_v35 }
  0xc6   : > { %v7031_v46 = vld [vmem:[%s7697_s6 + $0xeac] sm:$0xf0]  ;;  %v6506_v47 = vld [vmem:[%s7697_s6 + $0xfa0] sm:$0xf]  ;;  %v6251_v50 = vor.u32 %v6999_v41, %v6250_v38  ;;  %3624 = vmatpush.bf16.msrb.mxu3 %v6523_v40 }
  0xc7   : > { %v7063_v48 = vld [vmem:[%s7697_s6 + $0xfac] sm:$0xf0]  ;;  %v6379_v51 = vor.u32 %v7031_v46, %v6378_v44  ;;  %v6106_v52 = vld [vmem:[%s7697_s6 + $0xc80] sm:$0xf]  ;;  %3586 = vmatpush.bf16.msrb.mxu0 %v6123_v49 }
  0xc8   : > { %v6963_v53 = vld [vmem:[%s7697_s6 + $0xc8c] sm:$0xf0]  ;;  %v6234_v54 = vld [vmem:[%s7697_s6 + $0xd80] sm:$0xf]  ;;  %v6507_v55 = vor.u32 %v7063_v48, %v6506_v47  ;;  %3599 = vmatpush.bf16.msrb.mxu1 %v6251_v50 }
  0xc9   : > { %v6995_v56 = vld [vmem:[%s7697_s6 + $0xd8c] sm:$0xf0]  ;;  %v6362_v57 = vld [vmem:[%s7697_s6 + $0xe80] sm:$0xf]  ;;  %v6107_v61 = vor.u32 %v6963_v53, %v6106_v52  ;;  %3612 = vmatpush.bf16.msrb.mxu2 %v6379_v51 }
  0xca   : > { %v7027_v58 = vld [vmem:[%s7697_s6 + $0xe8c] sm:$0xf0]  ;;  %v6490_v59 = vld [vmem:[%s7697_s6 + $0xf80] sm:$0xf]  ;;  %v6235_v62 = vor.u32 %v6995_v56, %v6234_v54  ;;  %3625 = vmatpush.bf16.msrb.mxu3 %v6507_v55 }
  0xcb   : > { %v7059_v60 = vld [vmem:[%s7697_s6 + $0xf8c] sm:$0xf0]  ;;  %v6363_v63 = vor.u32 %v7027_v58, %v6362_v57  ;;  %v6090_v0 = vld [vmem:[%s7697_s6 + $0xc60] sm:$0xf]  ;;  %3587 = vmatpush.bf16.msrb.mxu0 %v6107_v61  ;;  %v6589_v57 = vld [vmem:[%s7697_s6 + $0xe4] sm:$0xf] }
  0xcc   : > { %v6959_v1 = vld [vmem:[%s7697_s6 + $0xc6c] sm:$0xf0]  ;;  %v6218_v2 = vld [vmem:[%s7697_s6 + $0xd60] sm:$0xf]  ;;  %v6491_v3 = vor.u32 %v7059_v60, %v6490_v59  ;;  %3600 = vmatpush.bf16.msrb.mxu1 %v6235_v62  ;;  %v4620_v58 = vld [vmem:[%s7697_s6 + $0xf0] sm:$0xf0] }
  0xcd   : > { %v6991_v4 = vld [vmem:[%s7697_s6 + $0xd6c] sm:$0xf0]  ;;  %v6346_v5 = vld [vmem:[%s7697_s6 + $0xe60] sm:$0xf]  ;;  %v6091_v9 = vor.u32 %v6959_v1, %v6090_v0  ;;  %3613 = vmatpush.bf16.msrb.mxu2 %v6363_v63  ;;  %v6621_v59 = vld [vmem:[%s7697_s6 + $0x1e4] sm:$0xf] }
  0xce   : > { %v7023_v6 = vld [vmem:[%s7697_s6 + $0xe6c] sm:$0xf0]  ;;  %v6474_v7 = vld [vmem:[%s7697_s6 + $0xf60] sm:$0xf]  ;;  %v6219_v10 = vor.u32 %v6991_v4, %v6218_v2  ;;  %3626 = vmatpush.bf16.msrb.mxu3 %v6491_v3  ;;  %v4748_v60 = vld [vmem:[%s7697_s6 + $0x1f0] sm:$0xf0] }
  0xcf   : > { %v7055_v8 = vld [vmem:[%s7697_s6 + $0xf6c] sm:$0xf0]  ;;  %v6347_v11 = vor.u32 %v7023_v6, %v6346_v5  ;;  %v6074_v12 = vld [vmem:[%s7697_s6 + $0xc40] sm:$0xf]  ;;  %3588 = vmatpush.bf16.msrb.mxu0 %v6091_v9  ;;  %v6653_v61 = vld [vmem:[%s7697_s6 + $0x2e4] sm:$0xf] }
  0xd0   : > { %v6955_v13 = vld [vmem:[%s7697_s6 + $0xc4c] sm:$0xf0]  ;;  %v6202_v14 = vld [vmem:[%s7697_s6 + $0xd40] sm:$0xf]  ;;  %v6475_v15 = vor.u32 %v7055_v8, %v6474_v7  ;;  %3601 = vmatpush.bf16.msrb.mxu1 %v6219_v10  ;;  %v4876_v63 = vld [vmem:[%s7697_s6 + $0x2f0] sm:$0xf0]  ;;  %v4623_v7 = vor.u32 %v6589_v57, %v4620_v58  ;;  %v4751_v10 = vor.u32 %v6621_v59, %v4748_v60 }
  0xd1   : > { %v6987_v16 = vld [vmem:[%s7697_s6 + $0xd4c] sm:$0xf0]  ;;  %v6330_v17 = vld [vmem:[%s7697_s6 + $0xe40] sm:$0xf]  ;;  %v6075_v22 = vor.u32 %v6955_v13, %v6074_v12  ;;  %3614 = vmatpush.bf16.msrb.mxu2 %v6347_v11  ;;  %v6685_v0 = vld [vmem:[%s7697_s6 + $0x3e4] sm:$0xf]  ;;  %v4879_v11 = vor.u32 %v6653_v61, %v4876_v63 }
  0xd2   : > { %v7019_v18 = vld [vmem:[%s7697_s6 + $0xe4c] sm:$0xf0]  ;;  %v6458_v19 = vld [vmem:[%s7697_s6 + $0xf40] sm:$0xf]  ;;  %v6203_v23 = vor.u32 %v6987_v16, %v6202_v14  ;;  %3627 = vmatpush.bf16.msrb.mxu3 %v6475_v15  ;;  %v5004_v1 = vld [vmem:[%s7697_s6 + $0x3f0] sm:$0xf0] }
  0xd3   : > { %v7051_v21 = vld [vmem:[%s7697_s6 + $0xf4c] sm:$0xf0]  ;;  %v6331_v26 = vor.u32 %v7019_v18, %v6330_v17  ;;  %v6058_v29 = vld [vmem:[%s7697_s6 + $0xc20] sm:$0xf]  ;;  %3589 = vmatpush.bf16.msrb.mxu0 %v6075_v22  ;;  %v6585_v12 = vld [vmem:[%s7697_s6 + $0xc4] sm:$0xf]  ;;  %v5007_v15 = vor.u32 %v6685_v0, %v5004_v1 }
  0xd4   : > { %v6951_v31 = vld [vmem:[%s7697_s6 + $0xc2c] sm:$0xf0]  ;;  %v6186_v32 = vld [vmem:[%s7697_s6 + $0xd20] sm:$0xf]  ;;  %v6459_v35 = vor.u32 %v7051_v21, %v6458_v19  ;;  %3602 = vmatpush.bf16.msrb.mxu1 %v6203_v23  ;;  %v4604_v13 = vld [vmem:[%s7697_s6 + $0xd0] sm:$0xf0] }
  0xd5   : > { %v6983_v36 = vld [vmem:[%s7697_s6 + $0xd2c] sm:$0xf0]  ;;  %v6314_v37 = vld [vmem:[%s7697_s6 + $0xe20] sm:$0xf]  ;;  %v6059_v46 = vor.u32 %v6951_v31, %v6058_v29  ;;  %3615 = vmatpush.bf16.msrb.mxu2 %v6331_v26  ;;  %v6617_v14 = vld [vmem:[%s7697_s6 + $0x1c4] sm:$0xf]  ;;  %v4607_v31 = vor.u32 %v6585_v12, %v4604_v13 }
  0xd6   : > { %v7015_v38 = vld [vmem:[%s7697_s6 + $0xe2c] sm:$0xf0]  ;;  %v6442_v40 = vld [vmem:[%s7697_s6 + $0xf20] sm:$0xf]  ;;  %v6187_v50 = vor.u32 %v6983_v36, %v6186_v32  ;;  %3628 = vmatpush.bf16.msrb.mxu3 %v6459_v35  ;;  %v4732_v17 = vld [vmem:[%s7697_s6 + $0x1d0] sm:$0xf0] }
  0xd7   : > { %v7047_v41 = vld [vmem:[%s7697_s6 + $0xf2c] sm:$0xf0]  ;;  %v6042_v44 = vld [vmem:[%s7697_s6 + $0xc00] sm:$0xf]  ;;  %v6315_v51 = vor.u32 %v7015_v38, %v6314_v37  ;;  %3590 = vmatpush.bf16.msrb.mxu0 %v6059_v46  ;;  %v6649_v18 = vld [vmem:[%s7697_s6 + $0x2c4] sm:$0xf]  ;;  %v4735_v32 = vor.u32 %v6617_v14, %v4732_v17 }
  0xd8   : > { %v6947_v47 = vld [vmem:[%s7697_s6 + $0xc0c] sm:$0xf0]  ;;  %v6170_v48 = vld [vmem:[%s7697_s6 + $0xd00] sm:$0xf]  ;;  %v6443_v55 = vor.u32 %v7047_v41, %v6442_v40  ;;  %3603 = vmatpush.bf16.msrb.mxu1 %v6187_v50  ;;  %v4860_v19 = vld [vmem:[%s7697_s6 + $0x2d0] sm:$0xf0] }
  0xd9   : > { %v6979_v49 = vld [vmem:[%s7697_s6 + $0xd0c] sm:$0xf0]  ;;  %v6298_v52 = vld [vmem:[%s7697_s6 + $0xe00] sm:$0xf]  ;;  %v6043_v62 = vor.u32 %v6947_v47, %v6042_v44  ;;  %3616 = vmatpush.bf16.msrb.mxu2 %v6315_v51  ;;  %v6681_v23 = vld [vmem:[%s7697_s6 + $0x3c4] sm:$0xf]  ;;  %v4863_v35 = vor.u32 %v6649_v18, %v4860_v19 }
  0xda   : > { %v7011_v53 = vld [vmem:[%s7697_s6 + $0xe0c] sm:$0xf0]  ;;  %v6426_v54 = vld [vmem:[%s7697_s6 + $0xf00] sm:$0xf]  ;;  %v6171_v2 = vor.u32 %v6979_v49, %v6170_v48  ;;  %3629 = vmatpush.bf16.msrb.mxu3 %v6443_v55  ;;  %v4988_v26 = vld [vmem:[%s7697_s6 + $0x3d0] sm:$0xf0] }
  0xdb   : > { %v7043_v56 = vld [vmem:[%s7697_s6 + $0xf0c] sm:$0xf0]  ;;  %v6299_v3 = vor.u32 %v7011_v53, %v6298_v52  ;;  %v320_v4 = vld.sshfl [vmem:[#allocation1 + $0x20] sm:$0xff pattern:$0x73625140]  ;;  %3591 = vmatpush.bf16.msrb.mxu0 %v6043_v62  ;;  %v4991_v40 = vor.u32 %v6681_v23, %v4988_v26 }
  0xdc   : > { %v322_v5 = vld.sshfl [vmem:[#allocation1 + $0x30] sm:$0xff pattern:$0x73625140]  ;;  %v6427_v6 = vor.u32 %v7043_v56, %v6426_v54  ;;  %v321_v8 = vld.sshfl [vmem:[#allocation1 + $0x28] sm:$0xff pattern:$0x73625140]  ;;  %v8025_v16 = vpack.c.bf16 %v320_v4, %v320_v4  ;;  %3604 = vmatpush.bf16.msrb.mxu1 %v6171_v2 }
  0xdd   : > { %v323_v9 = vld.sshfl [vmem:[#allocation1 + $0x38] sm:$0xff pattern:$0x73625140]  ;;  %3617 = vmatpush.bf16.msrb.mxu2 %v6299_v3  ;;  %v8030_v21 = vpack.c.bf16 %v322_v5, %v322_v5  ;;  %v8032_v22 = vpack.c.bf16 %v321_v8, %v321_v8  ;;  %v6581_v36 = vld [vmem:[%s7697_s6 + $0xa4] sm:$0xf] }
  0xde   : > { %3630 = vmatpush.bf16.msrb.mxu3 %v6427_v6  ;;  %v8036_v29 = vpack.c.bf16 %v323_v9, %v323_v9  ;;  %v4588_v37 = vld [vmem:[%s7697_s6 + $0xb0] sm:$0xf0]  ;;  %v6613_v38 = vld [vmem:[%s7697_s6 + $0x1a4] sm:$0xf]  ;;  %3592 = vmatmul.bf16.vlgmr.msrb.gmra.mxu0 %v8025_v16 }
  0xdf   : > { %3636 = vmatpush.bf16.msra.mxu0 %v4623_v7  ;;  %v4716_v41 = vld [vmem:[%s7697_s6 + $0x1b0] sm:$0xf0]  ;;  %v6645_v44 = vld [vmem:[%s7697_s6 + $0x2a4] sm:$0xf]  ;;  %3605 = vmatmul.bf16.vlgmr.msrb.gmra.mxu1 %v8032_v22  ;;  %v4591_v49 = vor.u32 %v6581_v36, %v4588_v37 }
  0xe0   : > { %3649 = vmatpush.bf16.msra.mxu1 %v4751_v10  ;;  %v4844_v46 = vld [vmem:[%s7697_s6 + $0x2b0] sm:$0xf0]  ;;  %3618 = vmatmul.bf16.vlgmr.msrb.gmra.mxu2 %v8030_v21  ;;  %v6677_v47 = vld [vmem:[%s7697_s6 + $0x3a4] sm:$0xf]  ;;  %v4719_v50 = vor.u32 %v6613_v38, %v4716_v41 }
  0xe1   : > { %3662 = vmatpush.bf16.msra.mxu2 %v4879_v11  ;;  %v4972_v48 = vld [vmem:[%s7697_s6 + $0x3b0] sm:$0xf0]  ;;  %3631 = vmatmul.bf16.vlgmr.msrb.gmra.mxu3 %v8036_v29  ;;  %v4847_v51 = vor.u32 %v6645_v44, %v4844_v46  ;;  %v6577_v52 = vld [vmem:[%s7697_s6 + $0x84] sm:$0xf] }
  0xe2   : > { %3675 = vmatpush.bf16.msra.mxu3 %v5007_v15  ;;  %v4572_v53 = vld [vmem:[%s7697_s6 + $0x90] sm:$0xf0]  ;;  %v6609_v54 = vld [vmem:[%s7697_s6 + $0x184] sm:$0xf]  ;;  %v4975_v55 = vor.u32 %v6677_v47, %v4972_v48 }
  0xe3   : > { %3637 = vmatpush.bf16.msra.mxu0 %v4607_v31  ;;  %v4700_v56 = vld [vmem:[%s7697_s6 + $0x190] sm:$0xf0]  ;;  %v6641_v57 = vld [vmem:[%s7697_s6 + $0x284] sm:$0xf]  ;;  %v4575_v61 = vor.u32 %v6577_v52, %v4572_v53 }
  0xe4   : > { %3650 = vmatpush.bf16.msra.mxu1 %v4735_v32  ;;  %v4828_v58 = vld [vmem:[%s7697_s6 + $0x290] sm:$0xf0]  ;;  %v6673_v59 = vld [vmem:[%s7697_s6 + $0x384] sm:$0xf]  ;;  %v4703_v62 = vor.u32 %v6609_v54, %v4700_v56 }
  0xe5   : > { %3663 = vmatpush.bf16.msra.mxu2 %v4863_v35  ;;  %v4956_v60 = vld [vmem:[%s7697_s6 + $0x390] sm:$0xf0]  ;;  %v4831_v63 = vor.u32 %v6641_v57, %v4828_v58  ;;  %v6573_v0 = vld [vmem:[%s7697_s6 + $0x64] sm:$0xf] }
  0xe6   : > { %3676 = vmatpush.bf16.msra.mxu3 %v4991_v40  ;;  %v4556_v1 = vld [vmem:[%s7697_s6 + $0x70] sm:$0xf0]  ;;  %v6605_v2 = vld [vmem:[%s7697_s6 + $0x164] sm:$0xf]  ;;  %v4959_v3 = vor.u32 %v6673_v59, %v4956_v60 }
  0xe7   : > { %3638 = vmatpush.bf16.msra.mxu0 %v4591_v49  ;;  %v4684_v4 = vld [vmem:[%s7697_s6 + $0x170] sm:$0xf0]  ;;  %v6637_v5 = vld [vmem:[%s7697_s6 + $0x264] sm:$0xf]  ;;  %v4559_v9 = vor.u32 %v6573_v0, %v4556_v1 }
  0xe8   : > { %3651 = vmatpush.bf16.msra.mxu1 %v4719_v50  ;;  %v4812_v6 = vld [vmem:[%s7697_s6 + $0x270] sm:$0xf0]  ;;  %v6669_v7 = vld [vmem:[%s7697_s6 + $0x364] sm:$0xf]  ;;  %v4687_v10 = vor.u32 %v6605_v2, %v4684_v4 }
  0xe9   : > { %3664 = vmatpush.bf16.msra.mxu2 %v4847_v51  ;;  %v4940_v8 = vld [vmem:[%s7697_s6 + $0x370] sm:$0xf0]  ;;  %v4815_v11 = vor.u32 %v6637_v5, %v4812_v6  ;;  %v6569_v12 = vld [vmem:[%s7697_s6 + $0x44] sm:$0xf] }
  0xea   : > { %3677 = vmatpush.bf16.msra.mxu3 %v4975_v55  ;;  %v4540_v13 = vld [vmem:[%s7697_s6 + $0x50] sm:$0xf0]  ;;  %v6601_v14 = vld [vmem:[%s7697_s6 + $0x144] sm:$0xf]  ;;  %v4943_v15 = vor.u32 %v6669_v7, %v4940_v8 }
  0xeb   : > { %3639 = vmatpush.bf16.msra.mxu0 %v4575_v61  ;;  %v4668_v17 = vld [vmem:[%s7697_s6 + $0x150] sm:$0xf0]  ;;  %v6633_v18 = vld [vmem:[%s7697_s6 + $0x244] sm:$0xf]  ;;  %v4543_v31 = vor.u32 %v6569_v12, %v4540_v13 }
  0xec   : > { %3652 = vmatpush.bf16.msra.mxu1 %v4703_v62  ;;  %v4796_v19 = vld [vmem:[%s7697_s6 + $0x250] sm:$0xf0]  ;;  %v6665_v23 = vld [vmem:[%s7697_s6 + $0x344] sm:$0xf]  ;;  %v4671_v32 = vor.u32 %v6601_v14, %v4668_v17 }
  0xed   : > { %3665 = vmatpush.bf16.msra.mxu2 %v4831_v63  ;;  %v4924_v26 = vld [vmem:[%s7697_s6 + $0x350] sm:$0xf0]  ;;  %v4799_v35 = vor.u32 %v6633_v18, %v4796_v19  ;;  %v6565_v36 = vld [vmem:[%s7697_s6 + $0x24] sm:$0xf] }
  0xee   : > { %3678 = vmatpush.bf16.msra.mxu3 %v4959_v3  ;;  %v4524_v37 = vld [vmem:[%s7697_s6 + $0x30] sm:$0xf0]  ;;  %v6597_v38 = vld [vmem:[%s7697_s6 + $0x124] sm:$0xf]  ;;  %v4927_v40 = vor.u32 %v6665_v23, %v4924_v26 }
  0xef   : > { %3640 = vmatpush.bf16.msra.mxu0 %v4559_v9  ;;  %v4652_v41 = vld [vmem:[%s7697_s6 + $0x130] sm:$0xf0]  ;;  %v6629_v44 = vld [vmem:[%s7697_s6 + $0x224] sm:$0xf]  ;;  %v4527_v49 = vor.u32 %v6565_v36, %v4524_v37 }
  0xf0   : > { %3653 = vmatpush.bf16.msra.mxu1 %v4687_v10  ;;  %v4780_v46 = vld [vmem:[%s7697_s6 + $0x230] sm:$0xf0]  ;;  %v6661_v47 = vld [vmem:[%s7697_s6 + $0x324] sm:$0xf]  ;;  %v4655_v52 = vor.u32 %v6597_v38, %v4652_v41 }
  0xf1   : > { %3666 = vmatpush.bf16.msra.mxu2 %v4815_v11  ;;  %v4908_v48 = vld [vmem:[%s7697_s6 + $0x330] sm:$0xf0]  ;;  %v6561_v50 = vld [vmem:[%s7697_s6 + $0x4] sm:$0xf]  ;;  %v4783_v53 = vor.u32 %v6629_v44, %v4780_v46 }
  0xf2   : > { %3679 = vmatpush.bf16.msra.mxu3 %v4943_v15  ;;  %v4508_v51 = vld [vmem:[%s7697_s6 + $0x10] sm:$0xf0]  ;;  %v6593_v54 = vld [vmem:[%s7697_s6 + $0x104] sm:$0xf]  ;;  %v4911_v57 = vor.u32 %v6661_v47, %v4908_v48 }
  0xf3   : > { %3641 = vmatpush.bf16.msra.mxu0 %v4543_v31  ;;  %v4636_v55 = vld [vmem:[%s7697_s6 + $0x110] sm:$0xf0]  ;;  %v6625_v56 = vld [vmem:[%s7697_s6 + $0x204] sm:$0xf]  ;;  %v4511_v0 = vor.u32 %v6561_v50, %v4508_v51 }
  0xf4   : > { %3654 = vmatpush.bf16.msra.mxu1 %v4671_v32  ;;  %v4764_v58 = vld [vmem:[%s7697_s6 + $0x210] sm:$0xf0]  ;;  %v6657_v59 = vld [vmem:[%s7697_s6 + $0x304] sm:$0xf]  ;;  %v4639_v4 = vor.u32 %v6593_v54, %v4636_v55 }
  0xf5   : > { %3667 = vmatpush.bf16.msra.mxu2 %v4799_v35  ;;  %v4892_v60 = vld [vmem:[%s7697_s6 + $0x310] sm:$0xf0]  ;;  %v6717_v61 = vld [vmem:[%s7697_s6 + $0x4e4] sm:$0xf]  ;;  %v4767_v5 = vor.u32 %v6625_v56, %v4764_v58 }
  0xf6   : > { %3680 = vmatpush.bf16.msra.mxu3 %v4927_v40  ;;  %v5132_v62 = vld [vmem:[%s7697_s6 + $0x4f0] sm:$0xf0]  ;;  %v6749_v63 = vld [vmem:[%s7697_s6 + $0x5e4] sm:$0xf]  ;;  %v4895_v8 = vor.u32 %v6657_v59, %v4892_v60 }
  0xf7   : > { %3642 = vmatpush.bf16.msra.mxu0 %v4527_v49  ;;  %v5260_v1 = vld [vmem:[%s7697_s6 + $0x5f0] sm:$0xf0]  ;;  %v6781_v2 = vld [vmem:[%s7697_s6 + $0x6e4] sm:$0xf]  ;;  %v5135_v9 = vor.u32 %v6717_v61, %v5132_v62 }
  0xf8   : > { %v5388_v3 = vld [vmem:[%s7697_s6 + $0x6f0] sm:$0xf0]  ;;  %3655 = vmatpush.bf16.msra.mxu1 %v4655_v52  ;;  %v6813_v6 = vld [vmem:[%s7697_s6 + $0x7e4] sm:$0xf]  ;;  %v5263_v10 = vor.u32 %v6749_v63, %v5260_v1 }
  0xf9   : > { %3668 = vmatpush.bf16.msra.mxu2 %v4783_v53  ;;  %v5516_v7 = vld [vmem:[%s7697_s6 + $0x7f0] sm:$0xf0]  ;;  %v5391_v11 = vor.u32 %v6781_v2, %v5388_v3  ;;  %v6713_v12 = vld [vmem:[%s7697_s6 + $0x4c4] sm:$0xf] }
  0xfa   : > { %3681 = vmatpush.bf16.msra.mxu3 %v4911_v57  ;;  %v5116_v13 = vld [vmem:[%s7697_s6 + $0x4d0] sm:$0xf0]  ;;  %v6745_v14 = vld [vmem:[%s7697_s6 + $0x5c4] sm:$0xf]  ;;  %v5519_v15 = vor.u32 %v6813_v6, %v5516_v7 }
  0xfb   : > { %3643 = vmatpush.bf16.msra.mxu0 %v4511_v0  ;;  %v5244_v17 = vld [vmem:[%s7697_s6 + $0x5d0] sm:$0xf0]  ;;  %v6777_v18 = vld [vmem:[%s7697_s6 + $0x6c4] sm:$0xf]  ;;  %v5119_v31 = vor.u32 %v6713_v12, %v5116_v13 }
  0xfc   : > { %v5372_v19 = vld [vmem:[%s7697_s6 + $0x6d0] sm:$0xf0]  ;;  %3656 = vmatpush.bf16.msra.mxu1 %v4639_v4  ;;  %v6809_v23 = vld [vmem:[%s7697_s6 + $0x7c4] sm:$0xf]  ;;  %v5247_v32 = vor.u32 %v6745_v14, %v5244_v17 }
  0xfd   : > { %3669 = vmatpush.bf16.msra.mxu2 %v4767_v5  ;;  %v5500_v26 = vld [vmem:[%s7697_s6 + $0x7d0] sm:$0xf0]  ;;  %v5375_v35 = vor.u32 %v6777_v18, %v5372_v19  ;;  %v6709_v36 = vld [vmem:[%s7697_s6 + $0x4a4] sm:$0xf] }
  0xfe   : > { %3682 = vmatpush.bf16.msra.mxu3 %v4895_v8  ;;  %v5100_v37 = vld [vmem:[%s7697_s6 + $0x4b0] sm:$0xf0]  ;;  %v6741_v38 = vld [vmem:[%s7697_s6 + $0x5a4] sm:$0xf]  ;;  %v5503_v40 = vor.u32 %v6809_v23, %v5500_v26  ;;  %3644 = vmatmul.bf16.vlgmr.msra.gmra.mxu0 %v7824_v28 }
  0xff   : > { %3688 = vmatpush.bf16.msrb.mxu0 %v5135_v9  ;;  %v5228_v41 = vld [vmem:[%s7697_s6 + $0x5b0] sm:$0xf0]  ;;  %v6773_v44 = vld [vmem:[%s7697_s6 + $0x6a4] sm:$0xf]  ;;  %v5103_v49 = vor.u32 %v6709_v36, %v5100_v37  ;;  %3657 = vmatmul.bf16.vlgmr.msra.gmra.mxu1 %v7830_v34 }
 0x100   : > { %3701 = vmatpush.bf16.msrb.mxu1 %v5263_v10  ;;  %v5356_v46 = vld [vmem:[%s7697_s6 + $0x6b0] sm:$0xf0]  ;;  %3670 = vmatmul.bf16.vlgmr.msra.gmra.mxu2 %v7822_v27  ;;  %v6805_v47 = vld [vmem:[%s7697_s6 + $0x7a4] sm:$0xf]  ;;  %v5231_v50 = vor.u32 %v6741_v38, %v5228_v41 }
 0x101   : > { %3714 = vmatpush.bf16.msrb.mxu2 %v5391_v11  ;;  %v5484_v48 = vld [vmem:[%s7697_s6 + $0x7b0] sm:$0xf0]  ;;  %3683 = vmatmul.bf16.vlgmr.msra.gmra.mxu3 %v7828_v33  ;;  %v5359_v51 = vor.u32 %v6773_v44, %v5356_v46  ;;  %v6705_v52 = vld [vmem:[%s7697_s6 + $0x484] sm:$0xf] }
 0x102   : > { %3727 = vmatpush.bf16.msrb.mxu3 %v5519_v15  ;;  %v5084_v53 = vld [vmem:[%s7697_s6 + $0x490] sm:$0xf0]  ;;  %v6737_v54 = vld [vmem:[%s7697_s6 + $0x584] sm:$0xf]  ;;  %v5487_v55 = vor.u32 %v6805_v47, %v5484_v48 }
 0x103   : > { %3689 = vmatpush.bf16.msrb.mxu0 %v5119_v31  ;;  %v5212_v56 = vld [vmem:[%s7697_s6 + $0x590] sm:$0xf0]  ;;  %v6769_v57 = vld [vmem:[%s7697_s6 + $0x684] sm:$0xf]  ;;  %v5087_v61 = vor.u32 %v6705_v52, %v5084_v53 }
 0x104   : > { %3702 = vmatpush.bf16.msrb.mxu1 %v5247_v32  ;;  %v5340_v58 = vld [vmem:[%s7697_s6 + $0x690] sm:$0xf0]  ;;  %v6801_v59 = vld [vmem:[%s7697_s6 + $0x784] sm:$0xf]  ;;  %v5215_v62 = vor.u32 %v6737_v54, %v5212_v56 }
 0x105   : > { %3715 = vmatpush.bf16.msrb.mxu2 %v5375_v35  ;;  %v5468_v60 = vld [vmem:[%s7697_s6 + $0x790] sm:$0xf0]  ;;  %v5343_v63 = vor.u32 %v6769_v57, %v5340_v58  ;;  %v6701_v0 = vld [vmem:[%s7697_s6 + $0x464] sm:$0xf] }
 0x106   : > { %3728 = vmatpush.bf16.msrb.mxu3 %v5503_v40  ;;  %v5068_v1 = vld [vmem:[%s7697_s6 + $0x470] sm:$0xf0]  ;;  %v6733_v2 = vld [vmem:[%s7697_s6 + $0x564] sm:$0xf]  ;;  %v5471_v3 = vor.u32 %v6801_v59, %v5468_v60 }
 0x107   : > { %3690 = vmatpush.bf16.msrb.mxu0 %v5103_v49  ;;  %v5196_v4 = vld [vmem:[%s7697_s6 + $0x570] sm:$0xf0]  ;;  %v6765_v5 = vld [vmem:[%s7697_s6 + $0x664] sm:$0xf]  ;;  %v5071_v9 = vor.u32 %v6701_v0, %v5068_v1 }
 0x108   : > { %3703 = vmatpush.bf16.msrb.mxu1 %v5231_v50  ;;  %v5324_v6 = vld [vmem:[%s7697_s6 + $0x670] sm:$0xf0]  ;;  %v6797_v7 = vld [vmem:[%s7697_s6 + $0x764] sm:$0xf]  ;;  %v5199_v10 = vor.u32 %v6733_v2, %v5196_v4 }
 0x109   : > { %3716 = vmatpush.bf16.msrb.mxu2 %v5359_v51  ;;  %v5452_v8 = vld [vmem:[%s7697_s6 + $0x770] sm:$0xf0]  ;;  %v5327_v11 = vor.u32 %v6765_v5, %v5324_v6  ;;  %v6697_v12 = vld [vmem:[%s7697_s6 + $0x444] sm:$0xf]  ;;  %v3437_v49 = vpop.f32.mrf.mxu0 }
 0x10a   : > { %3729 = vmatpush.bf16.msrb.mxu3 %v5487_v55  ;;  %v5052_v13 = vld [vmem:[%s7697_s6 + $0x450] sm:$0xf0]  ;;  %v6729_v14 = vld [vmem:[%s7697_s6 + $0x544] sm:$0xf]  ;;  %v5455_v15 = vor.u32 %v6797_v7, %v5452_v8  ;;  %v3450_v53 = vpop.f32.mrf.mxu1 }
 0x10b   : > { %3691 = vmatpush.bf16.msrb.mxu0 %v5087_v61  ;;  %v5180_v17 = vld [vmem:[%s7697_s6 + $0x550] sm:$0xf0]  ;;  %v6761_v18 = vld [vmem:[%s7697_s6 + $0x644] sm:$0xf]  ;;  %v5055_v31 = vor.u32 %v6697_v12, %v5052_v13  ;;  %v3451_v59 = vadd.f32 %v3450_v53, %v3437_v49 }
 0x10c   : > { %3704 = vmatpush.bf16.msrb.mxu1 %v5215_v62  ;;  %v5308_v19 = vld [vmem:[%s7697_s6 + $0x650] sm:$0xf0]  ;;  %v6793_v23 = vld [vmem:[%s7697_s6 + $0x744] sm:$0xf]  ;;  %v5183_v32 = vor.u32 %v6729_v14, %v5180_v17 }
 0x10d   : > { %3717 = vmatpush.bf16.msrb.mxu2 %v5343_v63  ;;  %v5436_v26 = vld [vmem:[%s7697_s6 + $0x750] sm:$0xf0]  ;;  %v5311_v35 = vor.u32 %v6761_v18, %v5308_v19  ;;  %v6693_v36 = vld [vmem:[%s7697_s6 + $0x424] sm:$0xf] }
 0x10e   : > { %3730 = vmatpush.bf16.msrb.mxu3 %v5471_v3  ;;  %v5036_v37 = vld [vmem:[%s7697_s6 + $0x430] sm:$0xf0]  ;;  %v6725_v38 = vld [vmem:[%s7697_s6 + $0x524] sm:$0xf]  ;;  %v5439_v40 = vor.u32 %v6793_v23, %v5436_v26  ;;  %v3463_v3 = vpop.f32.mrf.mxu2 }
 0x10f   : > { %3692 = vmatpush.bf16.msrb.mxu0 %v5071_v9  ;;  %v5164_v41 = vld [vmem:[%s7697_s6 + $0x530] sm:$0xf0]  ;;  %v6757_v44 = vld [vmem:[%s7697_s6 + $0x624] sm:$0xf]  ;;  %v5039_v50 = vor.u32 %v6693_v36, %v5036_v37  ;;  %v3464_v8 = vadd.f32 %v3463_v3, %v3451_v59 }
 0x110   : > { %3705 = vmatpush.bf16.msrb.mxu1 %v5199_v10  ;;  %v5292_v46 = vld [vmem:[%s7697_s6 + $0x630] sm:$0xf0]  ;;  %v6789_v47 = vld [vmem:[%s7697_s6 + $0x724] sm:$0xf]  ;;  %v5167_v54 = vor.u32 %v6725_v38, %v5164_v41 }
 0x111   : > { %3718 = vmatpush.bf16.msrb.mxu2 %v5327_v11  ;;  %v5420_v48 = vld [vmem:[%s7697_s6 + $0x730] sm:$0xf0]  ;;  %v6689_v51 = vld [vmem:[%s7697_s6 + $0x404] sm:$0xf]  ;;  %v5295_v55 = vor.u32 %v6757_v44, %v5292_v46 }
 0x112   : > { %3731 = vmatpush.bf16.msrb.mxu3 %v5455_v15  ;;  %v5020_v52 = vld [vmem:[%s7697_s6 + $0x410] sm:$0xf0]  ;;  %v6721_v56 = vld [vmem:[%s7697_s6 + $0x504] sm:$0xf]  ;;  %v5423_v60 = vor.u32 %v6789_v47, %v5420_v48  ;;  %v3476_v15 = vpop.f32.mrf.mxu3 }
 0x113   : > { %3693 = vmatpush.bf16.msrb.mxu0 %v5055_v31  ;;  %v5148_v57 = vld [vmem:[%s7697_s6 + $0x510] sm:$0xf0]  ;;  %v6753_v58 = vld [vmem:[%s7697_s6 + $0x604] sm:$0xf]  ;;  %v5023_v4 = vor.u32 %v6689_v51, %v5020_v52  ;;  %v3477_v31 = vadd.f32 %v3476_v15, %v3464_v8 }
 0x114   : > { %3706 = vmatpush.bf16.msrb.mxu1 %v5183_v32  ;;  %v5276_v61 = vld [vmem:[%s7697_s6 + $0x610] sm:$0xf0]  ;;  %v6785_v62 = vld [vmem:[%s7697_s6 + $0x704] sm:$0xf]  ;;  %v5151_v9 = vor.u32 %v6721_v56, %v5148_v57  ;;  %v3439_v32 = vpop.f32.mrf.mxu0 }
 0x115   : > { %3719 = vmatpush.bf16.msrb.mxu2 %v5311_v35  ;;  %v5404_v63 = vld [vmem:[%s7697_s6 + $0x710] sm:$0xf0]  ;;  %v6845_v0 = vld [vmem:[%s7697_s6 + $0x8e4] sm:$0xf]  ;;  %v5279_v10 = vor.u32 %v6753_v58, %v5276_v61 }
 0x116   : > { %3732 = vmatpush.bf16.msrb.mxu3 %v5439_v40  ;;  %v5644_v1 = vld [vmem:[%s7697_s6 + $0x8f0] sm:$0xf0]  ;;  %v6877_v2 = vld [vmem:[%s7697_s6 + $0x9e4] sm:$0xf]  ;;  %v5407_v13 = vor.u32 %v6785_v62, %v5404_v63  ;;  %v3452_v40 = vpop.f32.mrf.mxu1  ;;  %v3465_v52 = vpop.f32.mrf.mxu2 }
 0x117   : > { %3694 = vmatpush.bf16.msrb.mxu0 %v5039_v50  ;;  %v5772_v5 = vld [vmem:[%s7697_s6 + $0x9f0] sm:$0xf0]  ;;  %v6909_v6 = vld [vmem:[%s7697_s6 + $0xae4] sm:$0xf]  ;;  %v5647_v14 = vor.u32 %v6845_v0, %v5644_v1 }
 0x118   : > { %v5900_v7 = vld [vmem:[%s7697_s6 + $0xaf0] sm:$0xf0]  ;;  %3707 = vmatpush.bf16.msrb.mxu1 %v5167_v54  ;;  %v6941_v11 = vld [vmem:[%s7697_s6 + $0xbe4] sm:$0xf]  ;;  %v5775_v17 = vor.u32 %v6877_v2, %v5772_v5 }
 0x119   : > { %3720 = vmatpush.bf16.msrb.mxu2 %v5295_v55  ;;  %v6028_v12 = vld [vmem:[%s7697_s6 + $0xbf0] sm:$0xf0]  ;;  %v5903_v18 = vor.u32 %v6909_v6, %v5900_v7  ;;  %v6841_v19 = vld [vmem:[%s7697_s6 + $0x8c4] sm:$0xf] }
 0x11a   : > { %3733 = vmatpush.bf16.msrb.mxu3 %v5423_v60  ;;  %v5628_v23 = vld [vmem:[%s7697_s6 + $0x8d0] sm:$0xf0]  ;;  %v6873_v26 = vld [vmem:[%s7697_s6 + $0x9c4] sm:$0xf]  ;;  %v6031_v35 = vor.u32 %v6941_v11, %v6028_v12  ;;  %v3478_v60 = vpop.f32.mrf.mxu3 }
 0x11b   : > { %3695 = vmatpush.bf16.msrb.mxu0 %v5023_v4  ;;  %v5756_v36 = vld [vmem:[%s7697_s6 + $0x9d0] sm:$0xf0]  ;;  %v6905_v37 = vld [vmem:[%s7697_s6 + $0xac4] sm:$0xf]  ;;  %v5631_v46 = vor.u32 %v6841_v19, %v5628_v23 }
 0x11c   : > { %v5884_v38 = vld [vmem:[%s7697_s6 + $0xad0] sm:$0xf0]  ;;  %3708 = vmatpush.bf16.msrb.mxu1 %v5151_v9  ;;  %v6937_v41 = vld [vmem:[%s7697_s6 + $0xbc4] sm:$0xf]  ;;  %v5759_v47 = vor.u32 %v6873_v26, %v5756_v36 }
 0x11d   : > { %3721 = vmatpush.bf16.msrb.mxu2 %v5279_v10  ;;  %v6012_v44 = vld [vmem:[%s7697_s6 + $0xbd0] sm:$0xf0]  ;;  %v5887_v48 = vor.u32 %v6905_v37, %v5884_v38  ;;  %v6837_v49 = vld [vmem:[%s7697_s6 + $0x8a4] sm:$0xf] }
 0x11e   : > { %3734 = vmatpush.bf16.msrb.mxu3 %v5407_v13  ;;  %v5612_v50 = vld [vmem:[%s7697_s6 + $0x8b0] sm:$0xf0]  ;;  %v6869_v51 = vld [vmem:[%s7697_s6 + $0x9a4] sm:$0xf]  ;;  %v6015_v53 = vor.u32 %v6937_v41, %v6012_v44  ;;  %3696 = vmatmul.bf16.vlgmr.msrb.gmra.mxu0 %v7880_v42  ;;  %v3489_v9 = vpop.f32.mrf.mxu0 }
 0x11f   : > { %3740 = vmatpush.bf16.msra.mxu0 %v5647_v14  ;;  %v5740_v54 = vld [vmem:[%s7697_s6 + $0x9b0] sm:$0xf0]  ;;  %v6901_v55 = vld [vmem:[%s7697_s6 + $0xaa4] sm:$0xf]  ;;  %v5615_v59 = vor.u32 %v6837_v49, %v5612_v50  ;;  %3709 = vmatmul.bf16.vlgmr.msrb.gmra.mxu1 %v7884_v45  ;;  %v3490_v15 = vadd.f32 %v3489_v9, %v3477_v31 }
 0x120   : > { %3753 = vmatpush.bf16.msra.mxu1 %v5775_v17  ;;  %3722 = vmatmul.bf16.vlgmr.msrb.gmra.mxu2 %v7876_v39  ;;  %v5868_v56 = vld [vmem:[%s7697_s6 + $0xab0] sm:$0xf0]  ;;  %v6933_v57 = vld [vmem:[%s7697_s6 + $0xba4] sm:$0xf]  ;;  %v5743_v61 = vor.u32 %v6869_v51, %v5740_v54  ;;  %v3502_v17 = vpop.f32.mrf.mxu1 }
 0x121   : > { %3766 = vmatpush.bf16.msra.mxu2 %v5903_v18  ;;  %3735 = vmatmul.bf16.vlgmr.msrb.gmra.mxu3 %v7882_v43  ;;  %v5996_v58 = vld [vmem:[%s7697_s6 + $0xbb0] sm:$0xf0]  ;;  %v5871_v62 = vor.u32 %v6901_v55, %v5868_v56  ;;  %v6833_v63 = vld [vmem:[%s7697_s6 + $0x884] sm:$0xf]  ;;  %v3503_v36 = vadd.f32 %v3502_v17, %v3490_v15 }
 0x122   : > { %3779 = vmatpush.bf16.msra.mxu3 %v6031_v35  ;;  %v5596_v0 = vld [vmem:[%s7697_s6 + $0x890] sm:$0xf0]  ;;  %v6865_v1 = vld [vmem:[%s7697_s6 + $0x984] sm:$0xf]  ;;  %v5999_v2 = vor.u32 %v6933_v57, %v5996_v58 }
 0x123   : > { %3741 = vmatpush.bf16.msra.mxu0 %v5631_v46  ;;  %v5724_v3 = vld [vmem:[%s7697_s6 + $0x990] sm:$0xf0]  ;;  %v6897_v4 = vld [vmem:[%s7697_s6 + $0xa84] sm:$0xf]  ;;  %v5599_v8 = vor.u32 %v6833_v63, %v5596_v0  ;;  %v3515_v46 = vpop.f32.mrf.mxu2 }
 0x124   : > { %3754 = vmatpush.bf16.msra.mxu1 %v5759_v47  ;;  %v5852_v5 = vld [vmem:[%s7697_s6 + $0xa90] sm:$0xf0]  ;;  %v6929_v6 = vld [vmem:[%s7697_s6 + $0xb84] sm:$0xf]  ;;  %v5727_v10 = vor.u32 %v6865_v1, %v5724_v3  ;;  %v3516_v51 = vadd.f32 %v3515_v46, %v3503_v36  ;;  %v3528_v52 = vpop.f32.mrf.mxu3 }
 0x125   : > { %3767 = vmatpush.bf16.msra.mxu2 %v5887_v48  ;;  %v5980_v7 = vld [vmem:[%s7697_s6 + $0xb90] sm:$0xf0]  ;;  %v5855_v11 = vor.u32 %v6897_v4, %v5852_v5  ;;  %v6829_v12 = vld [vmem:[%s7697_s6 + $0x864] sm:$0xf] }
 0x126   : > { %3780 = vmatpush.bf16.msra.mxu3 %v6015_v53  ;;  %v5580_v13 = vld [vmem:[%s7697_s6 + $0x870] sm:$0xf0]  ;;  %v6861_v14 = vld [vmem:[%s7697_s6 + $0x964] sm:$0xf]  ;;  %v5983_v18 = vor.u32 %v6929_v6, %v5980_v7  ;;  %v8210_v56 = vadd.f32 %v3528_v52, %v3516_v51  ;;  %v3491_v57 = vpop.f32.mrf.mxu0 }
 0x127   : > { %3742 = vmatpush.bf16.msra.mxu0 %v5615_v59  ;;  %v5708_v19 = vld [vmem:[%s7697_s6 + $0x970] sm:$0xf0]  ;;  %v6893_v23 = vld [vmem:[%s7697_s6 + $0xa64] sm:$0xf]  ;;  %v5583_v37 = vor.u32 %v6829_v12, %v5580_v13 }
 0x128   : > { %3755 = vmatpush.bf16.msra.mxu1 %v5743_v61  ;;  %v5836_v26 = vld [vmem:[%s7697_s6 + $0xa70] sm:$0xf0]  ;;  %v6925_v32 = vld [vmem:[%s7697_s6 + $0xb64] sm:$0xf]  ;;  %v5711_v31 = vor.u32 %v6861_v14, %v5708_v19  ;;  %v3504_v63 = vpop.f32.mrf.mxu1 }
 0x129   : > { %3768 = vmatpush.bf16.msra.mxu2 %v5871_v62  ;;  %v5964_v35 = vld [vmem:[%s7697_s6 + $0xb70] sm:$0xf0]  ;;  %v5839_v38 = vor.u32 %v6893_v23, %v5836_v26  ;;  %v6825_v40 = vld [vmem:[%s7697_s6 + $0x844] sm:$0xf] }
 0x12a   : > { %3781 = vmatpush.bf16.msra.mxu3 %v5999_v2  ;;  %v5564_v41 = vld [vmem:[%s7697_s6 + $0x850] sm:$0xf0]  ;;  %v6857_v44 = vld [vmem:[%s7697_s6 + $0x944] sm:$0xf]  ;;  %v5967_v47 = vor.u32 %v6925_v32, %v5964_v35 }
 0x12b   : > { %3743 = vmatpush.bf16.msra.mxu0 %v5599_v8  ;;  %v5692_v48 = vld [vmem:[%s7697_s6 + $0x950] sm:$0xf0]  ;;  %v6889_v49 = vld [vmem:[%s7697_s6 + $0xa44] sm:$0xf]  ;;  %v5567_v55 = vor.u32 %v6825_v40, %v5564_v41  ;;  %v3517_v14 = vpop.f32.mrf.mxu2 }
 0x12c   : > { %3756 = vmatpush.bf16.msra.mxu1 %v5727_v10  ;;  %v5820_v50 = vld [vmem:[%s7697_s6 + $0xa50] sm:$0xf0]  ;;  %v6921_v53 = vld [vmem:[%s7697_s6 + $0xb44] sm:$0xf]  ;;  %v5695_v58 = vor.u32 %v6857_v44, %v5692_v48  ;;  %v3530_v23 = vpop.f32.mrf.mxu3 }
 0x12d   : > { %3769 = vmatpush.bf16.msra.mxu2 %v5855_v11  ;;  %v5948_v54 = vld [vmem:[%s7697_s6 + $0xb50] sm:$0xf0]  ;;  %v5823_v59 = vor.u32 %v6889_v49, %v5820_v50  ;;  %v6821_v60 = vld [vmem:[%s7697_s6 + $0x824] sm:$0xf] }
 0x12e   : > { %3782 = vmatpush.bf16.msra.mxu3 %v5983_v18  ;;  %v5548_v61 = vld [vmem:[%s7697_s6 + $0x830] sm:$0xf0]  ;;  %v6853_v62 = vld [vmem:[%s7697_s6 + $0x924] sm:$0xf]  ;;  %v5951_v0 = vor.u32 %v6921_v53, %v5948_v54 }
 0x12f   : > { %3744 = vmatpush.bf16.msra.mxu0 %v5583_v37  ;;  %v5676_v1 = vld [vmem:[%s7697_s6 + $0x930] sm:$0xf0]  ;;  %v6885_v2 = vld [vmem:[%s7697_s6 + $0xa24] sm:$0xf]  ;;  %v5551_v6 = vor.u32 %v6821_v60, %v5548_v61 }
 0x130   : > { %3757 = vmatpush.bf16.msra.mxu1 %v5711_v31  ;;  %v5804_v3 = vld [vmem:[%s7697_s6 + $0xa30] sm:$0xf0]  ;;  %v6917_v4 = vld [vmem:[%s7697_s6 + $0xb24] sm:$0xf]  ;;  %v5679_v9 = vor.u32 %v6853_v62, %v5676_v1 }
 0x131   : > { %3770 = vmatpush.bf16.msra.mxu2 %v5839_v38  ;;  %v5932_v5 = vld [vmem:[%s7697_s6 + $0xb30] sm:$0xf0]  ;;  %v6817_v7 = vld [vmem:[%s7697_s6 + $0x804] sm:$0xf]  ;;  %v5807_v10 = vor.u32 %v6885_v2, %v5804_v3 }
 0x132   : > { %3783 = vmatpush.bf16.msra.mxu3 %v5967_v47  ;;  %v5532_v8 = vld [vmem:[%s7697_s6 + $0x810] sm:$0xf0]  ;;  %v6849_v11 = vld [vmem:[%s7697_s6 + $0x904] sm:$0xf]  ;;  %v5935_v15 = vor.u32 %v6917_v4, %v5932_v5 }
 0x133   : > { %3745 = vmatpush.bf16.msra.mxu0 %v5567_v55  ;;  %v5660_v12 = vld [vmem:[%s7697_s6 + $0x910] sm:$0xf0]  ;;  %v6881_v13 = vld [vmem:[%s7697_s6 + $0xa04] sm:$0xf]  ;;  %v5535_v36 = vor.u32 %v6817_v7, %v5532_v8 }
 0x134   : > { %3758 = vmatpush.bf16.msra.mxu1 %v5695_v58  ;;  %v5788_v17 = vld [vmem:[%s7697_s6 + $0xa10] sm:$0xf0]  ;;  %v6913_v18 = vld [vmem:[%s7697_s6 + $0xb04] sm:$0xf]  ;;  %v5663_v40 = vor.u32 %v6849_v11, %v5660_v12 }
 0x135   : > { %3771 = vmatpush.bf16.msra.mxu2 %v5823_v59  ;;  %v5916_v19 = vld [vmem:[%s7697_s6 + $0xb10] sm:$0xf0]  ;;  %v6973_v26 = vld [vmem:[%s7697_s6 + $0xce4] sm:$0xf]  ;;  %v5791_v41 = vor.u32 %v6881_v13, %v5788_v17 }
 0x136   : > { %3784 = vmatpush.bf16.msra.mxu3 %v5951_v0  ;;  %v6156_v32 = vld [vmem:[%s7697_s6 + $0xcf0] sm:$0xf0]  ;;  %v7005_v35 = vld [vmem:[%s7697_s6 + $0xde4] sm:$0xf]  ;;  %v5919_v47 = vor.u32 %v6913_v18, %v5916_v19 }
 0x137   : > { %3746 = vmatpush.bf16.msra.mxu0 %v5551_v6  ;;  %v6284_v37 = vld [vmem:[%s7697_s6 + $0xdf0] sm:$0xf0]  ;;  %v7037_v31 = vld [vmem:[%s7697_s6 + $0xee4] sm:$0xf]  ;;  %v6159_v48 = vor.u32 %v6973_v26, %v6156_v32 }
 0x138   : > { %v6412_v38 = vld [vmem:[%s7697_s6 + $0xef0] sm:$0xf0]  ;;  %3759 = vmatpush.bf16.msra.mxu1 %v5679_v9  ;;  %v7069_v44 = vld [vmem:[%s7697_s6 + $0xfe4] sm:$0xf]  ;;  %v6287_v49 = vor.u32 %v7005_v35, %v6284_v37 }
 0x139   : > { %3772 = vmatpush.bf16.msra.mxu2 %v5807_v10  ;;  %v6540_v46 = vld [vmem:[%s7697_s6 + $0xff0] sm:$0xf0]  ;;  %v6415_v50 = vor.u32 %v7037_v31, %v6412_v38  ;;  %v6969_v51 = vld [vmem:[%s7697_s6 + $0xcc4] sm:$0xf] }
 0x13a   : > { %3785 = vmatpush.bf16.msra.mxu3 %v5935_v15  ;;  %v6140_v52 = vld [vmem:[%s7697_s6 + $0xcd0] sm:$0xf0]  ;;  %v7001_v53 = vld [vmem:[%s7697_s6 + $0xdc4] sm:$0xf]  ;;  %v6543_v54 = vor.u32 %v7069_v44, %v6540_v46 }
 0x13b   : > { %3747 = vmatpush.bf16.msra.mxu0 %v5535_v36  ;;  %v6268_v55 = vld [vmem:[%s7697_s6 + $0xdd0] sm:$0xf0]  ;;  %v7033_v57 = vld [vmem:[%s7697_s6 + $0xec4] sm:$0xf]  ;;  %v6143_v61 = vor.u32 %v6969_v51, %v6140_v52 }
 0x13c   : > { %v6396_v58 = vld [vmem:[%s7697_s6 + $0xed0] sm:$0xf0]  ;;  %3760 = vmatpush.bf16.msra.mxu1 %v5663_v40  ;;  %v7065_v59 = vld [vmem:[%s7697_s6 + $0xfc4] sm:$0xf]  ;;  %v6271_v62 = vor.u32 %v7001_v53, %v6268_v55 }
 0x13d   : > { %3773 = vmatpush.bf16.msra.mxu2 %v5791_v41  ;;  %v6524_v60 = vld [vmem:[%s7697_s6 + $0xfd0] sm:$0xf0]  ;;  %v6399_v63 = vor.u32 %v7033_v57, %v6396_v58  ;;  %v6965_v0 = vld [vmem:[%s7697_s6 + $0xca4] sm:$0xf]  ;;  %v3541_v23 = vpop.f32.mrf.mxu0 }
 0x13e   : > { %3786 = vmatpush.bf16.msra.mxu3 %v5919_v47  ;;  %v6124_v1 = vld [vmem:[%s7697_s6 + $0xcb0] sm:$0xf0]  ;;  %v6997_v2 = vld [vmem:[%s7697_s6 + $0xda4] sm:$0xf]  ;;  %3748 = vmatmul.bf16.vlgmr.msra.gmra.mxu0 %v7949_v20  ;;  %v6527_v3 = vor.u32 %v7065_v59, %v6524_v60  ;;  %v3542_v35 = vadd.f32 %v3541_v23, %v8210_v56  ;;  %v3554_v37 = vpop.f32.mrf.mxu1 }
 0x13f   : > { %3792 = vmatpush.bf16.msrb.mxu0 %v6159_v48  ;;  %v6252_v4 = vld [vmem:[%s7697_s6 + $0xdb0] sm:$0xf0]  ;;  %v7029_v5 = vld [vmem:[%s7697_s6 + $0xea4] sm:$0xf]  ;;  %3761 = vmatmul.bf16.vlgmr.msra.gmra.mxu1 %v7956_v25  ;;  %v6127_v9 = vor.u32 %v6965_v0, %v6124_v1 }
 0x140   : > { %3805 = vmatpush.bf16.msrb.mxu1 %v6287_v49  ;;  %v6380_v6 = vld [vmem:[%s7697_s6 + $0xeb0] sm:$0xf0]  ;;  %3774 = vmatmul.bf16.vlgmr.msra.gmra.mxu2 %v7954_v24  ;;  %v7061_v7 = vld [vmem:[%s7697_s6 + $0xfa4] sm:$0xf]  ;;  %v6255_v10 = vor.u32 %v6997_v2, %v6252_v4  ;;  %v3555_v47 = vadd.f32 %v3554_v37, %v3542_v35 }
 0x141   : > { %3818 = vmatpush.bf16.msrb.mxu2 %v6415_v50  ;;  %v6508_v8 = vld [vmem:[%s7697_s6 + $0xfb0] sm:$0xf0]  ;;  %3787 = vmatmul.bf16.vlgmr.msra.gmra.mxu3 %v7960_v30  ;;  %v6383_v11 = vor.u32 %v7029_v5, %v6380_v6  ;;  %v6961_v12 = vld [vmem:[%s7697_s6 + $0xc84] sm:$0xf] }
 0x142   : > { %3831 = vmatpush.bf16.msrb.mxu3 %v6543_v54  ;;  %v6108_v13 = vld [vmem:[%s7697_s6 + $0xc90] sm:$0xf0]  ;;  %v6993_v14 = vld [vmem:[%s7697_s6 + $0xd84] sm:$0xf]  ;;  %v6511_v15 = vor.u32 %v7061_v7, %v6508_v8 }
 0x143   : > { %3793 = vmatpush.bf16.msrb.mxu0 %v6143_v61  ;;  %v6236_v17 = vld [vmem:[%s7697_s6 + $0xd90] sm:$0xf0]  ;;  %v7025_v18 = vld [vmem:[%s7697_s6 + $0xe84] sm:$0xf]  ;;  %v6111_v36 = vor.u32 %v6961_v12, %v6108_v13 }
 0x144   : > { %3806 = vmatpush.bf16.msrb.mxu1 %v6271_v62  ;;  %v6364_v19 = vld [vmem:[%s7697_s6 + $0xe90] sm:$0xf0]  ;;  %v7057_v26 = vld [vmem:[%s7697_s6 + $0xf84] sm:$0xf]  ;;  %v6239_v31 = vor.u32 %v6993_v14, %v6236_v17  ;;  %v3567_v60 = vpop.f32.mrf.mxu2 }
 0x145   : > { %3819 = vmatpush.bf16.msrb.mxu2 %v6399_v63  ;;  %v6492_v32 = vld [vmem:[%s7697_s6 + $0xf90] sm:$0xf0]  ;;  %v6367_v38 = vor.u32 %v7025_v18, %v6364_v19  ;;  %v6957_v40 = vld [vmem:[%s7697_s6 + $0xc64] sm:$0xf]  ;;  %v3568_v0 = vadd.f32 %v3567_v60, %v3555_v47  ;;  %v3580_v1 = vpop.f32.mrf.mxu3  ;;  %v3543_v4 = vpop.f32.mrf.mxu0 }
 0x146   : > { %3832 = vmatpush.bf16.msrb.mxu3 %v6527_v3  ;;  %v6092_v41 = vld [vmem:[%s7697_s6 + $0xc70] sm:$0xf0]  ;;  %v6989_v44 = vld [vmem:[%s7697_s6 + $0xd64] sm:$0xf]  ;;  %v6495_v46 = vor.u32 %v7057_v26, %v6492_v32  ;;  %v3556_v6 = vpop.f32.mrf.mxu1  ;;  %v6620_v4 = vld [vmem:[%s7697_s6 + $0x1d4] sm:$0xf0] }
 0x147   : > { %3794 = vmatpush.bf16.msrb.mxu0 %v6127_v9  ;;  %v6220_v48 = vld [vmem:[%s7697_s6 + $0xd70] sm:$0xf0]  ;;  %v7021_v49 = vld [vmem:[%s7697_s6 + $0xe64] sm:$0xf]  ;;  %v6095_v52 = vor.u32 %v6957_v40, %v6092_v41  ;;  %v8281_v7 = vadd.f32 %v3580_v1, %v3568_v0  ;;  %v4610_v0 = vld [vmem:[%s7697_s6 + $0xc8] sm:$0xf] }
 0x148   : > { %3807 = vmatpush.bf16.msrb.mxu1 %v6255_v10  ;;  %v6348_v56 = vld [vmem:[%s7697_s6 + $0xe70] sm:$0xf0]  ;;  %v7053_v50 = vld [vmem:[%s7697_s6 + $0xf64] sm:$0xf]  ;;  %v6223_v53 = vor.u32 %v6989_v44, %v6220_v48  ;;  %v4626_v48 = vld [vmem:[%s7697_s6 + $0xe8] sm:$0xf] }
 0x149   : > { %3820 = vmatpush.bf16.msrb.mxu2 %v6383_v11  ;;  %v6476_v51 = vld [vmem:[%s7697_s6 + $0xf70] sm:$0xf0]  ;;  %v6351_v54 = vor.u32 %v7021_v49, %v6348_v56  ;;  %v6953_v55 = vld [vmem:[%s7697_s6 + $0xc44] sm:$0xf]  ;;  %v6592_v49 = vld [vmem:[%s7697_s6 + $0xf4] sm:$0xf0] }
 0x14a   : > { %3833 = vmatpush.bf16.msrb.mxu3 %v6511_v15  ;;  %v6076_v57 = vld [vmem:[%s7697_s6 + $0xc50] sm:$0xf0]  ;;  %v6985_v58 = vld [vmem:[%s7697_s6 + $0xd44] sm:$0xf]  ;;  %v6479_v59 = vor.u32 %v7053_v50, %v6476_v51  ;;  %v4754_v56 = vld [vmem:[%s7697_s6 + $0x1e8] sm:$0xf] }
 0x14b   : > { %3795 = vmatpush.bf16.msrb.mxu0 %v6111_v36  ;;  %v6204_v61 = vld [vmem:[%s7697_s6 + $0xd50] sm:$0xf0]  ;;  %v7017_v62 = vld [vmem:[%s7697_s6 + $0xe44] sm:$0xf]  ;;  %v6079_v5 = vor.u32 %v6953_v55, %v6076_v57  ;;  %v6588_v1 = vld [vmem:[%s7697_s6 + $0xd4] sm:$0xf0] }
 0x14c   : > { %3808 = vmatpush.bf16.msrb.mxu1 %v6239_v31  ;;  %v6332_v63 = vld [vmem:[%s7697_s6 + $0xe50] sm:$0xf0]  ;;  %v7049_v2 = vld [vmem:[%s7697_s6 + $0xf44] sm:$0xf]  ;;  %v6207_v8 = vor.u32 %v6985_v58, %v6204_v61  ;;  %v3569_v47 = vpop.f32.mrf.mxu2  ;;  %v5010_v58 = vld [vmem:[%s7697_s6 + $0x3e8] sm:$0xf]  ;;  %v4627_v61 = vor.u32 %v6592_v49, %v4626_v48 }
 0x14d   : > { %3821 = vmatpush.bf16.msrb.mxu2 %v6367_v38  ;;  %v6460_v3 = vld [vmem:[%s7697_s6 + $0xf50] sm:$0xf0]  ;;  %v6335_v9 = vor.u32 %v7017_v62, %v6332_v63  ;;  %v6949_v10 = vld [vmem:[%s7697_s6 + $0xc24] sm:$0xf]  ;;  %v3582_v50 = vpop.f32.mrf.mxu3  ;;  %v6652_v6 = vld [vmem:[%s7697_s6 + $0x2d4] sm:$0xf0] }
 0x14e   : > { %3834 = vmatpush.bf16.msrb.mxu3 %v6495_v46  ;;  %v6060_v11 = vld [vmem:[%s7697_s6 + $0xc30] sm:$0xf0]  ;;  %v6981_v12 = vld [vmem:[%s7697_s6 + $0xd24] sm:$0xf]  ;;  %v6463_v13 = vor.u32 %v7049_v2, %v6460_v3  ;;  %v4738_v2 = vld [vmem:[%s7697_s6 + $0x1c8] sm:$0xf] }
 0x14f   : > { %3796 = vmatpush.bf16.msrb.mxu0 %v6095_v52  ;;  %v6188_v14 = vld [vmem:[%s7697_s6 + $0xd30] sm:$0xf0]  ;;  %v7013_v15 = vld [vmem:[%s7697_s6 + $0xe24] sm:$0xf]  ;;  %v6063_v23 = vor.u32 %v6949_v10, %v6060_v11  ;;  %v6624_v52 = vld [vmem:[%s7697_s6 + $0x1f4] sm:$0xf0]  ;;  %v4611_v10 = vor.u32 %v6588_v1, %v4610_v0  ;;  %v4739_v11 = vor.u32 %v6620_v4, %v4738_v2 }
 0x150   : > { %3809 = vmatpush.bf16.msrb.mxu1 %v6223_v53  ;;  %v6316_v17 = vld [vmem:[%s7697_s6 + $0xe30] sm:$0xf0]  ;;  %v7045_v18 = vld [vmem:[%s7697_s6 + $0xf24] sm:$0xf]  ;;  %v6191_v35 = vor.u32 %v6981_v12, %v6188_v14  ;;  %v4882_v53 = vld [vmem:[%s7697_s6 + $0x2e8] sm:$0xf]  ;;  %v4755_v62 = vor.u32 %v6624_v52, %v4754_v56 }
 0x151   : > { %3822 = vmatpush.bf16.msrb.mxu2 %v6351_v54  ;;  %v6444_v19 = vld [vmem:[%s7697_s6 + $0xf30] sm:$0xf0]  ;;  %v6945_v26 = vld [vmem:[%s7697_s6 + $0xc04] sm:$0xf]  ;;  %v6319_v36 = vor.u32 %v7013_v15, %v6316_v17  ;;  %v6656_v54 = vld [vmem:[%s7697_s6 + $0x2f4] sm:$0xf0] }
 0x152   : > { %3835 = vmatpush.bf16.msrb.mxu3 %v6479_v59  ;;  %v6044_v32 = vld [vmem:[%s7697_s6 + $0xc10] sm:$0xf0]  ;;  %v6977_v37 = vld [vmem:[%s7697_s6 + $0xd04] sm:$0xf]  ;;  %v6447_v40 = vor.u32 %v7045_v18, %v6444_v19  ;;  %v6688_v59 = vld [vmem:[%s7697_s6 + $0x3f4] sm:$0xf0]  ;;  %v4883_v63 = vor.u32 %v6656_v54, %v4882_v53 }
 0x153   : > { %3797 = vmatpush.bf16.msrb.mxu0 %v6079_v5  ;;  %v6172_v31 = vld [vmem:[%s7697_s6 + $0xd10] sm:$0xf0]  ;;  %v7009_v38 = vld [vmem:[%s7697_s6 + $0xe04] sm:$0xf]  ;;  %v6047_v51 = vor.u32 %v6945_v26, %v6044_v32  ;;  %v5011_v3 = vor.u32 %v6688_v59, %v5010_v58  ;;  %v4866_v5 = vld [vmem:[%s7697_s6 + $0x2c8] sm:$0xf] }
 0x154   : > { %3810 = vmatpush.bf16.msrb.mxu1 %v6207_v8  ;;  %v6300_v41 = vld [vmem:[%s7697_s6 + $0xe10] sm:$0xf0]  ;;  %v7041_v44 = vld [vmem:[%s7697_s6 + $0xf04] sm:$0xf]  ;;  %v6175_v55 = vor.u32 %v6977_v37, %v6172_v31  ;;  %v4994_v8 = vld [vmem:[%s7697_s6 + $0x3c8] sm:$0xf]  ;;  %v4867_v12 = vor.u32 %v6652_v6, %v4866_v5 }
 0x155   : > { %3823 = vmatpush.bf16.msrb.mxu2 %v6335_v9  ;;  %v6428_v46 = vld [vmem:[%s7697_s6 + $0xf10] sm:$0xf0]  ;;  %v6303_v57 = vor.u32 %v7009_v38, %v6300_v41  ;;  %v6684_v9 = vld [vmem:[%s7697_s6 + $0x3d4] sm:$0xf0]  ;;  %v4722_v15 = vld [vmem:[%s7697_s6 + $0x1a8] sm:$0xf] }
 0x156   : > { %3836 = vmatpush.bf16.msrb.mxu3 %v6463_v13  ;;  %v6431_v60 = vor.u32 %v7041_v44, %v6428_v46  ;;  %v4594_v13 = vld [vmem:[%s7697_s6 + $0xa8] sm:$0xf]  ;;  %v6584_v14 = vld [vmem:[%s7697_s6 + $0xb4] sm:$0xf0]  ;;  %v4995_v17 = vor.u32 %v6684_v9, %v4994_v8 }
 0x157   : > { %3798 = vmatpush.bf16.msrb.mxu0 %v6063_v23  ;;  %v6616_v18 = vld [vmem:[%s7697_s6 + $0x1b4] sm:$0xf0]  ;;  %v4850_v19 = vld [vmem:[%s7697_s6 + $0x2a8] sm:$0xf] }
 0x158   : > { %3811 = vmatpush.bf16.msrb.mxu1 %v6191_v35  ;;  %v6648_v23 = vld [vmem:[%s7697_s6 + $0x2b4] sm:$0xf0]  ;;  %v4978_v26 = vld [vmem:[%s7697_s6 + $0x3a8] sm:$0xf]  ;;  %v4595_v35 = vor.u32 %v6584_v14, %v4594_v13 }
 0x159   : > { %3824 = vmatpush.bf16.msrb.mxu2 %v6319_v36  ;;  %v6680_v32 = vld [vmem:[%s7697_s6 + $0x3b4] sm:$0xf0]  ;;  %v4723_v36 = vor.u32 %v6616_v18, %v4722_v15  ;;  %v4851_v37 = vor.u32 %v6648_v23, %v4850_v19  ;;  %v4578_v31 = vld [vmem:[%s7697_s6 + $0x88] sm:$0xf] }
 0x15a   : > { %3837 = vmatpush.bf16.msrb.mxu3 %v6447_v40  ;;  %v6580_v38 = vld [vmem:[%s7697_s6 + $0x94] sm:$0xf0]  ;;  %v4706_v40 = vld [vmem:[%s7697_s6 + $0x188] sm:$0xf]  ;;  %v4979_v41 = vor.u32 %v6680_v32, %v4978_v26 }
 0x15b   : > { %3799 = vmatpush.bf16.msrb.mxu0 %v6047_v51  ;;  %v6612_v44 = vld [vmem:[%s7697_s6 + $0x194] sm:$0xf0]  ;;  %v4834_v46 = vld [vmem:[%s7697_s6 + $0x288] sm:$0xf]  ;;  %v3593_v48 = vpop.f32.mrf.mxu0  ;;  %v4579_v51 = vor.u32 %v6580_v38, %v4578_v31 }
 0x15c   : > { %3812 = vmatpush.bf16.msrb.mxu1 %v6175_v55  ;;  %v6644_v47 = vld [vmem:[%s7697_s6 + $0x294] sm:$0xf0]  ;;  %v4962_v49 = vld [vmem:[%s7697_s6 + $0x388] sm:$0xf]  ;;  %v3594_v50 = vadd.f32 %v3593_v48, %v8281_v7  ;;  %v3606_v52 = vpop.f32.mrf.mxu1  ;;  %v4707_v53 = vor.u32 %v6612_v44, %v4706_v40 }
 0x15d   : > { %3825 = vmatpush.bf16.msrb.mxu2 %v6303_v57  ;;  %v6676_v56 = vld [vmem:[%s7697_s6 + $0x394] sm:$0xf0]  ;;  %v4835_v54 = vor.u32 %v6644_v47, %v4834_v46  ;;  %v4562_v55 = vld [vmem:[%s7697_s6 + $0x68] sm:$0xf] }
 0x15e   : > { %3838 = vmatpush.bf16.msrb.mxu3 %v6431_v60  ;;  %3800 = vmatmul.bf16.vlgmr.msrb.gmra.mxu0 %v8025_v16  ;;  %v6576_v57 = vld [vmem:[%s7697_s6 + $0x74] sm:$0xf0]  ;;  %v4690_v58 = vld [vmem:[%s7697_s6 + $0x168] sm:$0xf]  ;;  %v4963_v59 = vor.u32 %v6676_v56, %v4962_v49  ;;  %v3607_v60 = vadd.f32 %v3606_v52, %v3594_v50 }
 0x15f   : > { %3844 = vmatpush.bf16.msra.mxu0 %v4627_v61  ;;  %3813 = vmatmul.bf16.vlgmr.msrb.gmra.mxu1 %v8032_v22  ;;  %v6608_v61 = vld [vmem:[%s7697_s6 + $0x174] sm:$0xf0]  ;;  %v4563_v1 = vor.u32 %v6576_v57, %v4562_v55  ;;  %v4546_v4 = vld [vmem:[%s7697_s6 + $0x48] sm:$0xf] }
 0x160   : > { %3857 = vmatpush.bf16.msra.mxu1 %v4755_v62  ;;  %3826 = vmatmul.bf16.vlgmr.msrb.gmra.mxu2 %v8030_v21  ;;  %v4818_v62 = vld [vmem:[%s7697_s6 + $0x268] sm:$0xf]  ;;  %v6640_v7 = vld [vmem:[%s7697_s6 + $0x274] sm:$0xf0]  ;;  %v4691_v2 = vor.u32 %v6608_v61, %v4690_v58 }
 0x161   : > { %3870 = vmatpush.bf16.msra.mxu2 %v4883_v63  ;;  %3839 = vmatmul.bf16.vlgmr.msrb.gmra.mxu3 %v8036_v29  ;;  %v4946_v63 = vld [vmem:[%s7697_s6 + $0x368] sm:$0xf]  ;;  %v6672_v0 = vld [vmem:[%s7697_s6 + $0x374] sm:$0xf0] }
 0x162   : > { %3883 = vmatpush.bf16.msra.mxu3 %v5011_v3  ;;  %v4819_v3 = vor.u32 %v6640_v7, %v4818_v62  ;;  %v6572_v5 = vld [vmem:[%s7697_s6 + $0x54] sm:$0xf0]  ;;  %v4674_v6 = vld [vmem:[%s7697_s6 + $0x148] sm:$0xf]  ;;  %v4947_v8 = vor.u32 %v6672_v0, %v4946_v63 }
 0x163   : > { %3845 = vmatpush.bf16.msra.mxu0 %v4611_v10  ;;  %v3619_v9 = vpop.f32.mrf.mxu2  ;;  %v6604_v10 = vld [vmem:[%s7697_s6 + $0x154] sm:$0xf0]  ;;  %v4930_v15 = vld [vmem:[%s7697_s6 + $0x348] sm:$0xf]  ;;  %v3595_v18 = vpop.f32.mrf.mxu0  ;;  %v4547_v19 = vor.u32 %v6572_v5, %v4546_v4 }
 0x164   : > { %3858 = vmatpush.bf16.msra.mxu1 %v4739_v11  ;;  %v4802_v11 = vld [vmem:[%s7697_s6 + $0x248] sm:$0xf]  ;;  %v3620_v13 = vadd.f32 %v3619_v9, %v3607_v60  ;;  %v3632_v14 = vpop.f32.mrf.mxu3  ;;  %v3608_v23 = vpop.f32.mrf.mxu1  ;;  %v4675_v32 = vor.u32 %v6604_v10, %v4674_v6  ;;  %v6600_v40 = vld [vmem:[%s7697_s6 + $0x134] sm:$0xf0] }
 0x165   : > { %3871 = vmatpush.bf16.msra.mxu2 %v4867_v12  ;;  %v6636_v12 = vld [vmem:[%s7697_s6 + $0x254] sm:$0xf0]  ;;  %v4658_v31 = vld [vmem:[%s7697_s6 + $0x128] sm:$0xf] }
 0x166   : > { %3884 = vmatpush.bf16.msra.mxu3 %v4995_v17  ;;  %v6668_v17 = vld [vmem:[%s7697_s6 + $0x354] sm:$0xf0]  ;;  %v8352_v26 = vadd.f32 %v3632_v14, %v3620_v13  ;;  %v4914_v46 = vld [vmem:[%s7697_s6 + $0x328] sm:$0xf]  ;;  %v4659_v50 = vor.u32 %v6600_v40, %v4658_v31 }
 0x167   : > { %3846 = vmatpush.bf16.msra.mxu0 %v4595_v35  ;;  %v4803_v35 = vor.u32 %v6636_v12, %v4802_v11  ;;  %v4931_v38 = vor.u32 %v6668_v17, %v4930_v15  ;;  %v6632_v44 = vld [vmem:[%s7697_s6 + $0x234] sm:$0xf0]  ;;  %v4514_v49 = vld [vmem:[%s7697_s6 + $0x8] sm:$0xf] }
 0x168   : > { %3859 = vmatpush.bf16.msra.mxu1 %v4723_v36  ;;  %v4530_v36 = vld [vmem:[%s7697_s6 + $0x28] sm:$0xf]  ;;  %v6664_v47 = vld [vmem:[%s7697_s6 + $0x334] sm:$0xf0] }
 0x169   : > { %3872 = vmatpush.bf16.msra.mxu2 %v4851_v37  ;;  %v6568_v37 = vld [vmem:[%s7697_s6 + $0x34] sm:$0xf0]  ;;  %v4642_v52 = vld [vmem:[%s7697_s6 + $0x108] sm:$0xf]  ;;  %v4915_v55 = vor.u32 %v6664_v47, %v4914_v46 }
 0x16a   : > { %3885 = vmatpush.bf16.msra.mxu3 %v4979_v41  ;;  %v4786_v41 = vld [vmem:[%s7697_s6 + $0x228] sm:$0xf]  ;;  %v4531_v48 = vor.u32 %v6568_v37, %v4530_v36  ;;  %v6564_v56 = vld [vmem:[%s7697_s6 + $0x14] sm:$0xf0] }
 0x16b   : > { %3847 = vmatpush.bf16.msra.mxu0 %v4579_v51  ;;  %v4787_v51 = vor.u32 %v6632_v44, %v4786_v41  ;;  %v6628_v57 = vld [vmem:[%s7697_s6 + $0x214] sm:$0xf0]  ;;  %v4898_v58 = vld [vmem:[%s7697_s6 + $0x308] sm:$0xf]  ;;  %v3621_v60 = vpop.f32.mrf.mxu2  ;;  %v4515_v0 = vor.u32 %v6564_v56, %v4514_v49 }
 0x16c   : > { %3860 = vmatpush.bf16.msra.mxu1 %v4707_v53  ;;  %v6596_v53 = vld [vmem:[%s7697_s6 + $0x114] sm:$0xf0]  ;;  %v5138_v61 = vld [vmem:[%s7697_s6 + $0x4e8] sm:$0xf]  ;;  %v3634_v63 = vpop.f32.mrf.mxu3 }
 0x16d   : > { %3873 = vmatpush.bf16.msra.mxu2 %v4835_v54  ;;  %v4770_v54 = vld [vmem:[%s7697_s6 + $0x208] sm:$0xf]  ;;  %v6720_v62 = vld [vmem:[%s7697_s6 + $0x4f4] sm:$0xf0]  ;;  %v4643_v4 = vor.u32 %v6596_v53, %v4642_v52 }
 0x16e   : > { %3886 = vmatpush.bf16.msra.mxu3 %v4963_v59  ;;  %v6660_v59 = vld [vmem:[%s7697_s6 + $0x314] sm:$0xf0]  ;;  %v5266_v7 = vld [vmem:[%s7697_s6 + $0x5e8] sm:$0xf]  ;;  %v4771_v5 = vor.u32 %v6628_v57, %v4770_v54  ;;  %v5139_v10 = vor.u32 %v6720_v62, %v5138_v61 }
 0x16f   : > { %3848 = vmatpush.bf16.msra.mxu0 %v4563_v1  ;;  %v6752_v1 = vld [vmem:[%s7697_s6 + $0x5f4] sm:$0xf0]  ;;  %v5522_v6 = vld [vmem:[%s7697_s6 + $0x7e8] sm:$0xf]  ;;  %v4899_v9 = vor.u32 %v6660_v59, %v4898_v58 }
 0x170   : > { %3861 = vmatpush.bf16.msra.mxu1 %v4691_v2  ;;  %v5394_v2 = vld [vmem:[%s7697_s6 + $0x6e8] sm:$0xf]  ;;  %v5267_v11 = vor.u32 %v6752_v1, %v5266_v7  ;;  %v6716_v14 = vld [vmem:[%s7697_s6 + $0x4d4] sm:$0xf0] }
 0x171   : > { %3874 = vmatpush.bf16.msra.mxu2 %v4819_v3  ;;  %v6784_v3 = vld [vmem:[%s7697_s6 + $0x6f4] sm:$0xf0]  ;;  %v5122_v13 = vld [vmem:[%s7697_s6 + $0x4c8] sm:$0xf] }
 0x172   : > { %3887 = vmatpush.bf16.msra.mxu3 %v4947_v8  ;;  %v6816_v8 = vld [vmem:[%s7697_s6 + $0x7f4] sm:$0xf0]  ;;  %v5395_v12 = vor.u32 %v6784_v3, %v5394_v2  ;;  %v5250_v15 = vld [vmem:[%s7697_s6 + $0x5c8] sm:$0xf]  ;;  %v5123_v36 = vor.u32 %v6716_v14, %v5122_v13 }
 0x173   : > { %3849 = vmatpush.bf16.msra.mxu0 %v4547_v19  ;;  %v5523_v17 = vor.u32 %v6816_v8, %v5522_v6  ;;  %v6748_v18 = vld [vmem:[%s7697_s6 + $0x5d4] sm:$0xf0]  ;;  %v5378_v19 = vld [vmem:[%s7697_s6 + $0x6c8] sm:$0xf] }
 0x174   : > { %3862 = vmatpush.bf16.msra.mxu1 %v4675_v32  ;;  %v6780_v23 = vld [vmem:[%s7697_s6 + $0x6d4] sm:$0xf0]  ;;  %v5506_v32 = vld [vmem:[%s7697_s6 + $0x7c8] sm:$0xf]  ;;  %v5251_v37 = vor.u32 %v6748_v18, %v5250_v15 }
 0x175   : > { %3875 = vmatpush.bf16.msra.mxu2 %v4803_v35  ;;  %v6812_v35 = vld [vmem:[%s7697_s6 + $0x7d4] sm:$0xf0]  ;;  %v5379_v31 = vor.u32 %v6780_v23, %v5378_v19  ;;  %v5234_v41 = vld [vmem:[%s7697_s6 + $0x5a8] sm:$0xf] }
 0x176   : > { %3888 = vmatpush.bf16.msra.mxu3 %v4931_v38  ;;  %v5106_v38 = vld [vmem:[%s7697_s6 + $0x4a8] sm:$0xf]  ;;  %v6712_v40 = vld [vmem:[%s7697_s6 + $0x4b4] sm:$0xf0]  ;;  %v5507_v44 = vor.u32 %v6812_v35, %v5506_v32 }
 0x177   : > { %3850 = vmatpush.bf16.msra.mxu0 %v4531_v48  ;;  %v6744_v46 = vld [vmem:[%s7697_s6 + $0x5b4] sm:$0xf0]  ;;  %v5362_v47 = vld [vmem:[%s7697_s6 + $0x6a8] sm:$0xf] }
 0x178   : > { %3863 = vmatpush.bf16.msra.mxu1 %v4659_v50  ;;  %v6776_v48 = vld [vmem:[%s7697_s6 + $0x6b4] sm:$0xf0]  ;;  %v5490_v49 = vld [vmem:[%s7697_s6 + $0x7a8] sm:$0xf]  ;;  %v5107_v50 = vor.u32 %v6712_v40, %v5106_v38 }
 0x179   : > { %3876 = vmatpush.bf16.msra.mxu2 %v4787_v51  ;;  %v6808_v56 = vld [vmem:[%s7697_s6 + $0x7b4] sm:$0xf0]  ;;  %v5235_v51 = vor.u32 %v6744_v46, %v5234_v41  ;;  %v5363_v52 = vor.u32 %v6776_v48, %v5362_v47  ;;  %v5090_v53 = vld [vmem:[%s7697_s6 + $0x488] sm:$0xf] }
 0x17a   : > { %3889 = vmatpush.bf16.msra.mxu3 %v4915_v55  ;;  %v6708_v54 = vld [vmem:[%s7697_s6 + $0x494] sm:$0xf0]  ;;  %v5218_v55 = vld [vmem:[%s7697_s6 + $0x588] sm:$0xf]  ;;  %v5491_v57 = vor.u32 %v6808_v56, %v5490_v49 }
 0x17b   : > { %3851 = vmatpush.bf16.msra.mxu0 %v4515_v0  ;;  %v6740_v58 = vld [vmem:[%s7697_s6 + $0x594] sm:$0xf0]  ;;  %v5346_v59 = vld [vmem:[%s7697_s6 + $0x688] sm:$0xf]  ;;  %v5091_v7 = vor.u32 %v6708_v54, %v5090_v53  ;;  %v3645_v63 = vpop.f32.mrf.mxu0 }
 0x17c   : > { %3864 = vmatpush.bf16.msra.mxu1 %v4643_v4  ;;  %v6772_v60 = vld [vmem:[%s7697_s6 + $0x694] sm:$0xf0]  ;;  %v5474_v61 = vld [vmem:[%s7697_s6 + $0x788] sm:$0xf]  ;;  %v5219_v0 = vor.u32 %v6740_v58, %v5218_v55 }
 0x17d   : > { %3877 = vmatpush.bf16.msra.mxu2 %v4771_v5  ;;  %v6804_v62 = vld [vmem:[%s7697_s6 + $0x794] sm:$0xf0]  ;;  %v5347_v1 = vor.u32 %v6772_v60, %v5346_v59  ;;  %v5074_v2 = vld [vmem:[%s7697_s6 + $0x468] sm:$0xf]  ;;  %v3658_v5 = vpop.f32.mrf.mxu1 }
 0x17e   : > { %3890 = vmatpush.bf16.msra.mxu3 %v4899_v9  ;;  %3852 = vmatmul.bf16.vlgmr.msra.gmra.mxu0 %v7824_v28  ;;  %v6704_v3 = vld [vmem:[%s7697_s6 + $0x474] sm:$0xf0]  ;;  %v5202_v4 = vld [vmem:[%s7697_s6 + $0x568] sm:$0xf]  ;;  %v5475_v6 = vor.u32 %v6804_v62, %v5474_v61 }
 0x17f   : > { %3896 = vmatpush.bf16.msrb.mxu0 %v5139_v10  ;;  %3865 = vmatmul.bf16.vlgmr.msra.gmra.mxu1 %v7830_v34  ;;  %v6736_v8 = vld [vmem:[%s7697_s6 + $0x574] sm:$0xf0]  ;;  %v5330_v9 = vld [vmem:[%s7697_s6 + $0x668] sm:$0xf]  ;;  %v5075_v14 = vor.u32 %v6704_v3, %v5074_v2 }
 0x180   : > { %3909 = vmatpush.bf16.msrb.mxu1 %v5267_v11  ;;  %3878 = vmatmul.bf16.vlgmr.msra.gmra.mxu2 %v7822_v27  ;;  %v6768_v10 = vld [vmem:[%s7697_s6 + $0x674] sm:$0xf0]  ;;  %v3659_v11 = vadd.f32 %v3658_v5, %v3645_v63  ;;  %v5203_v15 = vor.u32 %v6736_v8, %v5202_v4  ;;  %v5058_v18 = vld [vmem:[%s7697_s6 + $0x448] sm:$0xf] }
 0x181   : > { %3922 = vmatpush.bf16.msrb.mxu2 %v5395_v12  ;;  %3891 = vmatmul.bf16.vlgmr.msra.gmra.mxu3 %v7828_v33  ;;  %v5458_v12 = vld [vmem:[%s7697_s6 + $0x768] sm:$0xf]  ;;  %v6800_v13 = vld [vmem:[%s7697_s6 + $0x774] sm:$0xf0] }
 0x182   : > { %3935 = vmatpush.bf16.msrb.mxu3 %v5523_v17  ;;  %v5331_v17 = vor.u32 %v6768_v10, %v5330_v9  ;;  %v6700_v19 = vld [vmem:[%s7697_s6 + $0x454] sm:$0xf0]  ;;  %v5186_v23 = vld [vmem:[%s7697_s6 + $0x548] sm:$0xf]  ;;  %v5459_v35 = vor.u32 %v6800_v13, %v5458_v12 }
 0x183   : > { %3897 = vmatpush.bf16.msrb.mxu0 %v5123_v36  ;;  %v3671_v32 = vpop.f32.mrf.mxu2  ;;  %v6732_v36 = vld [vmem:[%s7697_s6 + $0x554] sm:$0xf0]  ;;  %v5442_v41 = vld [vmem:[%s7697_s6 + $0x748] sm:$0xf]  ;;  %v5059_v46 = vor.u32 %v6700_v19, %v5058_v18  ;;  %v3647_v48 = vpop.f32.mrf.mxu0 }
 0x184   : > { %3910 = vmatpush.bf16.msrb.mxu1 %v5251_v37  ;;  %v5314_v37 = vld [vmem:[%s7697_s6 + $0x648] sm:$0xf]  ;;  %v3672_v38 = vadd.f32 %v3671_v32, %v3659_v11  ;;  %v3684_v40 = vpop.f32.mrf.mxu3  ;;  %v5187_v49 = vor.u32 %v6732_v36, %v5186_v23  ;;  %v6728_v55 = vld [vmem:[%s7697_s6 + $0x534] sm:$0xf0] }
 0x185   : > { %3923 = vmatpush.bf16.msrb.mxu2 %v5379_v31  ;;  %v6764_v31 = vld [vmem:[%s7697_s6 + $0x654] sm:$0xf0]  ;;  %v3660_v53 = vpop.f32.mrf.mxu1  ;;  %v5426_v59 = vld [vmem:[%s7697_s6 + $0x728] sm:$0xf] }
 0x186   : > { %3936 = vmatpush.bf16.msrb.mxu3 %v5507_v44  ;;  %v6796_v44 = vld [vmem:[%s7697_s6 + $0x754] sm:$0xf0]  ;;  %v8422_v47 = vadd.f32 %v3684_v40, %v3672_v38  ;;  %v5315_v56 = vor.u32 %v6764_v31, %v5314_v37  ;;  %v5026_v62 = vld [vmem:[%s7697_s6 + $0x408] sm:$0xf] }
 0x187   : > { %3898 = vmatpush.bf16.msrb.mxu0 %v5107_v50  ;;  %v5042_v50 = vld [vmem:[%s7697_s6 + $0x428] sm:$0xf]  ;;  %v5443_v54 = vor.u32 %v6796_v44, %v5442_v41  ;;  %v6760_v58 = vld [vmem:[%s7697_s6 + $0x634] sm:$0xf0] }
 0x188   : > { %3911 = vmatpush.bf16.msrb.mxu1 %v5235_v51  ;;  %v6696_v51 = vld [vmem:[%s7697_s6 + $0x434] sm:$0xf0]  ;;  %v5282_v3 = vld [vmem:[%s7697_s6 + $0x608] sm:$0xf] }
 0x189   : > { %3924 = vmatpush.bf16.msrb.mxu2 %v5363_v52  ;;  %v5170_v52 = vld [vmem:[%s7697_s6 + $0x528] sm:$0xf]  ;;  %v6792_v60 = vld [vmem:[%s7697_s6 + $0x734] sm:$0xf0]  ;;  %v5043_v61 = vor.u32 %v6696_v51, %v5042_v50 }
 0x18a   : > { %3937 = vmatpush.bf16.msrb.mxu3 %v5491_v57  ;;  %v5298_v57 = vld [vmem:[%s7697_s6 + $0x628] sm:$0xf]  ;;  %v5171_v63 = vor.u32 %v6728_v55, %v5170_v52  ;;  %v6724_v2 = vld [vmem:[%s7697_s6 + $0x514] sm:$0xf0]  ;;  %v5427_v5 = vor.u32 %v6792_v60, %v5426_v59 }
 0x18b   : > { %3899 = vmatpush.bf16.msrb.mxu0 %v5091_v7  ;;  %v6692_v7 = vld [vmem:[%s7697_s6 + $0x414] sm:$0xf0]  ;;  %v3673_v4 = vpop.f32.mrf.mxu2  ;;  %v5410_v8 = vld [vmem:[%s7697_s6 + $0x708] sm:$0xf] }
 0x18c   : > { %3912 = vmatpush.bf16.msrb.mxu1 %v5219_v0  ;;  %v5299_v0 = vor.u32 %v6760_v58, %v5298_v57  ;;  %v6788_v9 = vld [vmem:[%s7697_s6 + $0x714] sm:$0xf0]  ;;  %v3686_v10 = vpop.f32.mrf.mxu3  ;;  %v5650_v11 = vld [vmem:[%s7697_s6 + $0x8e8] sm:$0xf] }
 0x18d   : > { %3925 = vmatpush.bf16.msrb.mxu2 %v5347_v1  ;;  %v5154_v1 = vld [vmem:[%s7697_s6 + $0x508] sm:$0xf]  ;;  %v6848_v12 = vld [vmem:[%s7697_s6 + $0x8f4] sm:$0xf0]  ;;  %v5411_v36 = vor.u32 %v6788_v9, %v5410_v8 }
 0x18e   : > { %3938 = vmatpush.bf16.msrb.mxu3 %v5475_v6  ;;  %v6756_v6 = vld [vmem:[%s7697_s6 + $0x614] sm:$0xf0]  ;;  %v5778_v13 = vld [vmem:[%s7697_s6 + $0x9e8] sm:$0xf]  ;;  %v5155_v19 = vor.u32 %v6724_v2, %v5154_v1  ;;  %v5651_v37 = vor.u32 %v6848_v12, %v5650_v11 }
 0x18f   : > { %3900 = vmatpush.bf16.msrb.mxu0 %v5075_v14  ;;  %v5027_v14 = vor.u32 %v6692_v7, %v5026_v62  ;;  %v6912_v18 = vld [vmem:[%s7697_s6 + $0xaf4] sm:$0xf0]  ;;  %v5283_v23 = vor.u32 %v6756_v6, %v5282_v3  ;;  %v6034_v32 = vld [vmem:[%s7697_s6 + $0xbe8] sm:$0xf] }
 0x190   : > { %3913 = vmatpush.bf16.msrb.mxu1 %v5203_v15  ;;  %v6880_v15 = vld [vmem:[%s7697_s6 + $0x9f4] sm:$0xf0]  ;;  %v5634_v40 = vld [vmem:[%s7697_s6 + $0x8c8] sm:$0xf] }
 0x191   : > { %3926 = vmatpush.bf16.msrb.mxu2 %v5331_v17  ;;  %v5906_v17 = vld [vmem:[%s7697_s6 + $0xae8] sm:$0xf]  ;;  %v5779_v31 = vor.u32 %v6880_v15, %v5778_v13  ;;  %v6844_v41 = vld [vmem:[%s7697_s6 + $0x8d4] sm:$0xf0] }
 0x192   : > { %3939 = vmatpush.bf16.msrb.mxu3 %v5459_v35  ;;  %v6944_v35 = vld [vmem:[%s7697_s6 + $0xbf4] sm:$0xf0]  ;;  %v5907_v38 = vor.u32 %v6912_v18, %v5906_v17  ;;  %v5762_v44 = vld [vmem:[%s7697_s6 + $0x9c8] sm:$0xf]  ;;  %v5635_v52 = vor.u32 %v6844_v41, %v5634_v40 }
 0x193   : > { %3901 = vmatpush.bf16.msrb.mxu0 %v5059_v46  ;;  %v6035_v46 = vor.u32 %v6944_v35, %v6034_v32  ;;  %v6876_v48 = vld [vmem:[%s7697_s6 + $0x9d4] sm:$0xf0]  ;;  %v6018_v50 = vld [vmem:[%s7697_s6 + $0xbc8] sm:$0xf] }
 0x194   : > { %3914 = vmatpush.bf16.msrb.mxu1 %v5187_v49  ;;  %v5890_v49 = vld [vmem:[%s7697_s6 + $0xac8] sm:$0xf]  ;;  %v6940_v51 = vld [vmem:[%s7697_s6 + $0xbd4] sm:$0xf0]  ;;  %v5763_v53 = vor.u32 %v6876_v48, %v5762_v44 }
 0x195   : > { %3927 = vmatpush.bf16.msrb.mxu2 %v5315_v56  ;;  %v6908_v56 = vld [vmem:[%s7697_s6 + $0xad4] sm:$0xf0]  ;;  %v5618_v55 = vld [vmem:[%s7697_s6 + $0x8a8] sm:$0xf]  ;;  %v6019_v59 = vor.u32 %v6940_v51, %v6018_v50 }
 0x196   : > { %3940 = vmatpush.bf16.msrb.mxu3 %v5443_v54  ;;  %v5891_v54 = vor.u32 %v6908_v56, %v5890_v49  ;;  %v6840_v57 = vld [vmem:[%s7697_s6 + $0x8b4] sm:$0xf0]  ;;  %v5746_v58 = vld [vmem:[%s7697_s6 + $0x9a8] sm:$0xf] }
 0x197   : > { %3902 = vmatpush.bf16.msrb.mxu0 %v5043_v61  ;;  %v6872_v60 = vld [vmem:[%s7697_s6 + $0x9b4] sm:$0xf0]  ;;  %v5874_v61 = vld [vmem:[%s7697_s6 + $0xaa8] sm:$0xf] }
 0x198   : > { %3915 = vmatpush.bf16.msrb.mxu1 %v5171_v63  ;;  %v6904_v62 = vld [vmem:[%s7697_s6 + $0xab4] sm:$0xf0]  ;;  %v6002_v7 = vld [vmem:[%s7697_s6 + $0xba8] sm:$0xf]  ;;  %v5747_v1 = vor.u32 %v6872_v60, %v5746_v58 }
 0x199   : > { %3928 = vmatpush.bf16.msrb.mxu2 %v5299_v0  ;;  %v6936_v63 = vld [vmem:[%s7697_s6 + $0xbb4] sm:$0xf0]  ;;  %v5619_v0 = vor.u32 %v6840_v57, %v5618_v55  ;;  %v5875_v2 = vor.u32 %v6904_v62, %v5874_v61  ;;  %v5602_v3 = vld [vmem:[%s7697_s6 + $0x888] sm:$0xf] }
 0x19a   : > { %3941 = vmatpush.bf16.msrb.mxu3 %v5427_v5  ;;  %v6836_v4 = vld [vmem:[%s7697_s6 + $0x894] sm:$0xf0]  ;;  %v5730_v5 = vld [vmem:[%s7697_s6 + $0x988] sm:$0xf]  ;;  %v6003_v6 = vor.u32 %v6936_v63, %v6002_v7 }
 0x19b   : > { %3903 = vmatpush.bf16.msrb.mxu0 %v5027_v14  ;;  %v6868_v8 = vld [vmem:[%s7697_s6 + $0x994] sm:$0xf0]  ;;  %v5858_v9 = vld [vmem:[%s7697_s6 + $0xa88] sm:$0xf]  ;;  %v5603_v13 = vor.u32 %v6836_v4, %v5602_v3  ;;  %v3697_v14 = vpop.f32.mrf.mxu0 }
 0x19c   : > { %3916 = vmatpush.bf16.msrb.mxu1 %v5155_v19  ;;  %v6900_v10 = vld [vmem:[%s7697_s6 + $0xa94] sm:$0xf0]  ;;  %v5986_v11 = vld [vmem:[%s7697_s6 + $0xb88] sm:$0xf]  ;;  %v5731_v15 = vor.u32 %v6868_v8, %v5730_v5  ;;  %v3698_v32 = vadd.f32 %v3697_v14, %v8422_v47  ;;  %v3710_v35 = vpop.f32.mrf.mxu1 }
 0x19d   : > { %3929 = vmatpush.bf16.msrb.mxu2 %v5283_v23  ;;  %v6932_v12 = vld [vmem:[%s7697_s6 + $0xb94] sm:$0xf0]  ;;  %v5859_v17 = vor.u32 %v6900_v10, %v5858_v9  ;;  %v5586_v18 = vld [vmem:[%s7697_s6 + $0x868] sm:$0xf] }
 0x19e   : > { %3942 = vmatpush.bf16.msrb.mxu3 %v5411_v36  ;;  %3904 = vmatmul.bf16.vlgmr.msrb.gmra.mxu0 %v7880_v42  ;;  %v6832_v19 = vld [vmem:[%s7697_s6 + $0x874] sm:$0xf0]  ;;  %v5714_v23 = vld [vmem:[%s7697_s6 + $0x968] sm:$0xf]  ;;  %v5987_v36 = vor.u32 %v6932_v12, %v5986_v11  ;;  %v3711_v44 = vadd.f32 %v3710_v35, %v3698_v32 }
 0x19f   : > { %3948 = vmatpush.bf16.msra.mxu0 %v5651_v37  ;;  %3917 = vmatmul.bf16.vlgmr.msrb.gmra.mxu1 %v7884_v45  ;;  %v6864_v37 = vld [vmem:[%s7697_s6 + $0x974] sm:$0xf0]  ;;  %v5970_v40 = vld [vmem:[%s7697_s6 + $0xb68] sm:$0xf] }
 0x1a0   : > { %3961 = vmatpush.bf16.msra.mxu1 %v5779_v31  ;;  %3930 = vmatmul.bf16.vlgmr.msrb.gmra.mxu2 %v7876_v39  ;;  %v5842_v31 = vld [vmem:[%s7697_s6 + $0xa68] sm:$0xf]  ;;  %v6928_v41 = vld [vmem:[%s7697_s6 + $0xb74] sm:$0xf0]  ;;  %v5715_v47 = vor.u32 %v6864_v37, %v5714_v23 }
 0x1a1   : > { %3974 = vmatpush.bf16.msra.mxu2 %v5907_v38  ;;  %3943 = vmatmul.bf16.vlgmr.msrb.gmra.mxu3 %v7882_v43  ;;  %v6896_v38 = vld [vmem:[%s7697_s6 + $0xa74] sm:$0xf0]  ;;  %v5570_v49 = vld [vmem:[%s7697_s6 + $0x848] sm:$0xf] }
 0x1a2   : > { %3987 = vmatpush.bf16.msra.mxu3 %v6035_v46  ;;  %v5587_v46 = vor.u32 %v6832_v19, %v5586_v18  ;;  %v5843_v48 = vor.u32 %v6896_v38, %v5842_v31  ;;  %v6828_v56 = vld [vmem:[%s7697_s6 + $0x854] sm:$0xf0]  ;;  %v5698_v50 = vld [vmem:[%s7697_s6 + $0x948] sm:$0xf] }
 0x1a3   : > { %3949 = vmatpush.bf16.msra.mxu0 %v5635_v52  ;;  %v3723_v51 = vpop.f32.mrf.mxu2  ;;  %v5971_v52 = vor.u32 %v6928_v41, %v5970_v40  ;;  %v6892_v55 = vld [vmem:[%s7697_s6 + $0xa54] sm:$0xf0]  ;;  %v5571_v61 = vor.u32 %v6828_v56, %v5570_v49  ;;  %v3699_v7 = vpop.f32.mrf.mxu0  ;;  %v5682_v3 = vld [vmem:[%s7697_s6 + $0x928] sm:$0xf] }
 0x1a4   : > { %3962 = vmatpush.bf16.msra.mxu1 %v5763_v53  ;;  %v6860_v53 = vld [vmem:[%s7697_s6 + $0x954] sm:$0xf0]  ;;  %v3724_v57 = vadd.f32 %v3723_v51, %v3711_v44  ;;  %v3736_v58 = vpop.f32.mrf.mxu3  ;;  %v3712_v4 = vpop.f32.mrf.mxu1  ;;  %v5810_v8 = vld [vmem:[%s7697_s6 + $0xa28] sm:$0xf] }
 0x1a5   : > { %3975 = vmatpush.bf16.msra.mxu2 %v5891_v54  ;;  %v5826_v54 = vld [vmem:[%s7697_s6 + $0xa48] sm:$0xf]  ;;  %v6924_v60 = vld [vmem:[%s7697_s6 + $0xb54] sm:$0xf0]  ;;  %v5699_v63 = vor.u32 %v6860_v53, %v5698_v50 }
 0x1a6   : > { %3988 = vmatpush.bf16.msra.mxu3 %v6019_v59  ;;  %v5954_v59 = vld [vmem:[%s7697_s6 + $0xb48] sm:$0xf]  ;;  %v8493_v62 = vadd.f32 %v3736_v58, %v3724_v57  ;;  %v6888_v9 = vld [vmem:[%s7697_s6 + $0xa34] sm:$0xf0] }
 0x1a7   : > { %3950 = vmatpush.bf16.msra.mxu0 %v5619_v0  ;;  %v5827_v0 = vor.u32 %v6892_v55, %v5826_v54  ;;  %v5955_v5 = vor.u32 %v6924_v60, %v5954_v59  ;;  %v5938_v10 = vld [vmem:[%s7697_s6 + $0xb28] sm:$0xf]  ;;  %v6920_v11 = vld [vmem:[%s7697_s6 + $0xb34] sm:$0xf0] }
 0x1a8   : > { %3963 = vmatpush.bf16.msra.mxu1 %v5747_v1  ;;  %v5554_v1 = vld [vmem:[%s7697_s6 + $0x828] sm:$0xf]  ;;  %v6820_v14 = vld [vmem:[%s7697_s6 + $0x814] sm:$0xf0]  ;;  %v5939_v35 = vor.u32 %v6920_v11, %v5938_v10 }
 0x1a9   : > { %3976 = vmatpush.bf16.msra.mxu2 %v5875_v2  ;;  %v6824_v2 = vld [vmem:[%s7697_s6 + $0x834] sm:$0xf0]  ;;  %v5666_v18 = vld [vmem:[%s7697_s6 + $0x908] sm:$0xf] }
 0x1aa   : > { %3989 = vmatpush.bf16.msra.mxu3 %v6003_v6  ;;  %v6856_v6 = vld [vmem:[%s7697_s6 + $0x934] sm:$0xf0]  ;;  %v5555_v12 = vor.u32 %v6824_v2, %v5554_v1  ;;  %v5794_v23 = vld [vmem:[%s7697_s6 + $0xa08] sm:$0xf] }
 0x1ab   : > { %3951 = vmatpush.bf16.msra.mxu0 %v5603_v13  ;;  %v5538_v13 = vld [vmem:[%s7697_s6 + $0x808] sm:$0xf]  ;;  %v6852_v19 = vld [vmem:[%s7697_s6 + $0x914] sm:$0xf0]  ;;  %v3725_v32 = vpop.f32.mrf.mxu2 }
 0x1ac   : > { %3964 = vmatpush.bf16.msra.mxu1 %v5731_v15  ;;  %v5683_v15 = vor.u32 %v6856_v6, %v5682_v3  ;;  %v5922_v37 = vld [vmem:[%s7697_s6 + $0xb08] sm:$0xf]  ;;  %v6916_v31 = vld [vmem:[%s7697_s6 + $0xb14] sm:$0xf0]  ;;  %v3738_v38 = vpop.f32.mrf.mxu3  ;;  %v5667_v56 = vor.u32 %v6852_v19, %v5666_v18 }
 0x1ad   : > { %3977 = vmatpush.bf16.msra.mxu2 %v5859_v17  ;;  %v5811_v17 = vor.u32 %v6888_v9, %v5810_v8  ;;  %v6162_v40 = vld [vmem:[%s7697_s6 + $0xce8] sm:$0xf]  ;;  %v6976_v41 = vld [vmem:[%s7697_s6 + $0xcf4] sm:$0xf0]  ;;  %v5923_v53 = vor.u32 %v6916_v31, %v5922_v37 }
 0x1ae   : > { %3990 = vmatpush.bf16.msra.mxu3 %v5987_v36  ;;  %v6884_v36 = vld [vmem:[%s7697_s6 + $0xa14] sm:$0xf0]  ;;  %v6290_v44 = vld [vmem:[%s7697_s6 + $0xde8] sm:$0xf]  ;;  %v6163_v54 = vor.u32 %v6976_v41, %v6162_v40 }
 0x1af   : > { %3952 = vmatpush.bf16.msra.mxu0 %v5587_v46  ;;  %v5539_v46 = vor.u32 %v6820_v14, %v5538_v13  ;;  %v7040_v49 = vld [vmem:[%s7697_s6 + $0xef4] sm:$0xf0]  ;;  %v5795_v50 = vor.u32 %v6884_v36, %v5794_v23  ;;  %v6546_v51 = vld [vmem:[%s7697_s6 + $0xfe8] sm:$0xf] }
 0x1b0   : > { %3965 = vmatpush.bf16.msra.mxu1 %v5715_v47  ;;  %v7008_v47 = vld [vmem:[%s7697_s6 + $0xdf4] sm:$0xf0]  ;;  %v6146_v58 = vld [vmem:[%s7697_s6 + $0xcc8] sm:$0xf] }
 0x1b1   : > { %3978 = vmatpush.bf16.msra.mxu2 %v5843_v48  ;;  %v6418_v48 = vld [vmem:[%s7697_s6 + $0xee8] sm:$0xf]  ;;  %v6291_v55 = vor.u32 %v7008_v47, %v6290_v44  ;;  %v6972_v59 = vld [vmem:[%s7697_s6 + $0xcd4] sm:$0xf0] }
 0x1b2   : > { %3991 = vmatpush.bf16.msra.mxu3 %v5971_v52  ;;  %v7072_v52 = vld [vmem:[%s7697_s6 + $0xff4] sm:$0xf0]  ;;  %v6419_v57 = vor.u32 %v7040_v49, %v6418_v48  ;;  %v6274_v60 = vld [vmem:[%s7697_s6 + $0xdc8] sm:$0xf]  ;;  %v6147_v3 = vor.u32 %v6972_v59, %v6146_v58 }
 0x1b3   : > { %3953 = vmatpush.bf16.msra.mxu0 %v5571_v61  ;;  %v6547_v61 = vor.u32 %v7072_v52, %v6546_v51  ;;  %v7004_v7 = vld [vmem:[%s7697_s6 + $0xdd4] sm:$0xf0]  ;;  %v6530_v1 = vld [vmem:[%s7697_s6 + $0xfc8] sm:$0xf] }
 0x1b4   : > { %3966 = vmatpush.bf16.msra.mxu1 %v5699_v63  ;;  %v6402_v63 = vld [vmem:[%s7697_s6 + $0xec8] sm:$0xf]  ;;  %v7068_v2 = vld [vmem:[%s7697_s6 + $0xfd4] sm:$0xf0]  ;;  %v6275_v4 = vor.u32 %v7004_v7, %v6274_v60 }
 0x1b5   : > { %3979 = vmatpush.bf16.msra.mxu2 %v5827_v0  ;;  %v7036_v0 = vld [vmem:[%s7697_s6 + $0xed4] sm:$0xf0]  ;;  %v6130_v6 = vld [vmem:[%s7697_s6 + $0xca8] sm:$0xf]  ;;  %v6531_v10 = vor.u32 %v7068_v2, %v6530_v1 }
 0x1b6   : > { %3992 = vmatpush.bf16.msra.mxu3 %v5955_v5  ;;  %v6403_v5 = vor.u32 %v7036_v0, %v6402_v63  ;;  %v6968_v8 = vld [vmem:[%s7697_s6 + $0xcb4] sm:$0xf0]  ;;  %v6258_v9 = vld [vmem:[%s7697_s6 + $0xda8] sm:$0xf] }
 0x1b7   : > { %3954 = vmatpush.bf16.msra.mxu0 %v5555_v12  ;;  %v7000_v11 = vld [vmem:[%s7697_s6 + $0xdb4] sm:$0xf0]  ;;  %v6386_v12 = vld [vmem:[%s7697_s6 + $0xea8] sm:$0xf] }
 0x1b8   : > { %3967 = vmatpush.bf16.msra.mxu1 %v5683_v15  ;;  %v7032_v13 = vld [vmem:[%s7697_s6 + $0xeb4] sm:$0xf0]  ;;  %v6514_v14 = vld [vmem:[%s7697_s6 + $0xfa8] sm:$0xf]  ;;  %v6259_v18 = vor.u32 %v7000_v11, %v6258_v9 }
 0x1b9   : > { %3980 = vmatpush.bf16.msra.mxu2 %v5811_v17  ;;  %v7064_v15 = vld [vmem:[%s7697_s6 + $0xfb4] sm:$0xf0]  ;;  %v6131_v17 = vor.u32 %v6968_v8, %v6130_v6  ;;  %v6387_v19 = vor.u32 %v7032_v13, %v6386_v12  ;;  %v6114_v23 = vld [vmem:[%s7697_s6 + $0xc88] sm:$0xf] }
 0x1ba   : > { %3993 = vmatpush.bf16.msra.mxu3 %v5939_v35  ;;  %v6964_v32 = vld [vmem:[%s7697_s6 + $0xc94] sm:$0xf0]  ;;  %v6242_v35 = vld [vmem:[%s7697_s6 + $0xd88] sm:$0xf]  ;;  %v6515_v36 = vor.u32 %v7064_v15, %v6514_v14 }
 0x1bb   : > { %3955 = vmatpush.bf16.msra.mxu0 %v5539_v46  ;;  %v6996_v37 = vld [vmem:[%s7697_s6 + $0xd94] sm:$0xf0]  ;;  %v6370_v31 = vld [vmem:[%s7697_s6 + $0xe88] sm:$0xf]  ;;  %v3749_v40 = vpop.f32.mrf.mxu0  ;;  %v6115_v47 = vor.u32 %v6964_v32, %v6114_v23 }
 0x1bc   : > { %3968 = vmatpush.bf16.msra.mxu1 %v5667_v56  ;;  %v7028_v38 = vld [vmem:[%s7697_s6 + $0xe94] sm:$0xf0]  ;;  %v6498_v41 = vld [vmem:[%s7697_s6 + $0xf88] sm:$0xf]  ;;  %v3750_v46 = vadd.f32 %v3749_v40, %v8493_v62  ;;  %v3762_v48 = vpop.f32.mrf.mxu1  ;;  %v6243_v49 = vor.u32 %v6996_v37, %v6242_v35 }
 0x1bd   : > { %3981 = vmatpush.bf16.msra.mxu2 %v5795_v50  ;;  %v7060_v44 = vld [vmem:[%s7697_s6 + $0xf94] sm:$0xf0]  ;;  %v6371_v56 = vor.u32 %v7028_v38, %v6370_v31  ;;  %v6098_v50 = vld [vmem:[%s7697_s6 + $0xc68] sm:$0xf] }
 0x1be   : > { %3994 = vmatpush.bf16.msra.mxu3 %v5923_v53  ;;  %3956 = vmatmul.bf16.vlgmr.msra.gmra.mxu0 %v7949_v20  ;;  %v6960_v51 = vld [vmem:[%s7697_s6 + $0xc74] sm:$0xf0]  ;;  %v6226_v52 = vld [vmem:[%s7697_s6 + $0xd68] sm:$0xf]  ;;  %v6499_v53 = vor.u32 %v7060_v44, %v6498_v41 }
 0x1bf   : > { %4000 = vmatpush.bf16.msrb.mxu0 %v6163_v54  ;;  %3969 = vmatmul.bf16.vlgmr.msra.gmra.mxu1 %v7956_v25  ;;  %v3763_v54 = vadd.f32 %v3762_v48, %v3750_v46  ;;  %v7024_v62 = vld [vmem:[%s7697_s6 + $0xe74] sm:$0xf0]  ;;  %v6482_v58 = vld [vmem:[%s7697_s6 + $0xf68] sm:$0xf]  ;;  %v6099_v60 = vor.u32 %v6960_v51, %v6098_v50 }
 0x1c0   : > { %4013 = vmatpush.bf16.msrb.mxu1 %v6291_v55  ;;  %3982 = vmatmul.bf16.vlgmr.msra.gmra.mxu2 %v7954_v24  ;;  %v6992_v55 = vld [vmem:[%s7697_s6 + $0xd74] sm:$0xf0]  ;;  %v6082_v63 = vld [vmem:[%s7697_s6 + $0xc48] sm:$0xf] }
 0x1c1   : > { %4026 = vmatpush.bf16.msrb.mxu2 %v6419_v57  ;;  %3995 = vmatmul.bf16.vlgmr.msra.gmra.mxu3 %v7960_v30  ;;  %v6354_v57 = vld [vmem:[%s7697_s6 + $0xe68] sm:$0xf]  ;;  %v7056_v59 = vld [vmem:[%s7697_s6 + $0xf74] sm:$0xf0] }
 0x1c2   : > { %4039 = vmatpush.bf16.msrb.mxu3 %v6547_v61  ;;  %v6227_v61 = vor.u32 %v6992_v55, %v6226_v52  ;;  %v6355_v7 = vor.u32 %v7024_v62, %v6354_v57  ;;  %v6956_v0 = vld [vmem:[%s7697_s6 + $0xc54] sm:$0xf0]  ;;  %v6210_v1 = vld [vmem:[%s7697_s6 + $0xd48] sm:$0xf]  ;;  %v6483_v2 = vor.u32 %v7056_v59, %v6482_v58  ;;  %v6590_v57 = vld [vmem:[%s7697_s6 + $0xec] sm:$0xf] }
 0x1c3   : > { %4001 = vmatpush.bf16.msrb.mxu0 %v6147_v3  ;;  %v3775_v3 = vpop.f32.mrf.mxu2  ;;  %v7020_v6 = vld [vmem:[%s7697_s6 + $0xe54] sm:$0xf0]  ;;  %v3751_v12 = vpop.f32.mrf.mxu0  ;;  %v6083_v13 = vor.u32 %v6956_v0, %v6082_v63  ;;  %v6194_v32 = vld [vmem:[%s7697_s6 + $0xd28] sm:$0xf]  ;;  %v4628_v62 = vld [vmem:[%s7697_s6 + $0xf8] sm:$0xf0] }
 0x1c4   : > { %4014 = vmatpush.bf16.msrb.mxu1 %v6275_v4  ;;  %v6988_v4 = vld [vmem:[%s7697_s6 + $0xd54] sm:$0xf0]  ;;  %v3776_v8 = vadd.f32 %v3775_v3, %v3763_v54  ;;  %v3788_v9 = vpop.f32.mrf.mxu3  ;;  %v3764_v14 = vpop.f32.mrf.mxu1  ;;  %v6322_v37 = vld [vmem:[%s7697_s6 + $0xe28] sm:$0xf]  ;;  %v6622_v58 = vld [vmem:[%s7697_s6 + $0x1ec] sm:$0xf] }
 0x1c5   : > { %4027 = vmatpush.bf16.msrb.mxu2 %v6403_v5  ;;  %v6338_v5 = vld [vmem:[%s7697_s6 + $0xe48] sm:$0xf]  ;;  %v7052_v11 = vld [vmem:[%s7697_s6 + $0xf54] sm:$0xf0]  ;;  %v4884_v63 = vld [vmem:[%s7697_s6 + $0x2f8] sm:$0xf0] }
 0x1c6   : > { %4040 = vmatpush.bf16.msrb.mxu3 %v6531_v10  ;;  %v6466_v10 = vld [vmem:[%s7697_s6 + $0xf48] sm:$0xf]  ;;  %v8564_v15 = vadd.f32 %v3788_v9, %v3776_v8  ;;  %v6952_v23 = vld [vmem:[%s7697_s6 + $0xc34] sm:$0xf0]  ;;  %v5012_v3 = vld [vmem:[%s7697_s6 + $0x3f8] sm:$0xf0] }
 0x1c7   : > { %4002 = vmatpush.bf16.msrb.mxu0 %v6131_v17  ;;  %v6211_v17 = vor.u32 %v6988_v4, %v6210_v1  ;;  %v6467_v35 = vor.u32 %v7052_v11, %v6466_v10  ;;  %v7016_v31 = vld [vmem:[%s7697_s6 + $0xe34] sm:$0xf0]  ;;  %v6450_v38 = vld [vmem:[%s7697_s6 + $0xf28] sm:$0xf]  ;;  %v6586_v9 = vld [vmem:[%s7697_s6 + $0xcc] sm:$0xf] }
 0x1c8   : > { %4015 = vmatpush.bf16.msrb.mxu1 %v6259_v18  ;;  %v6339_v18 = vor.u32 %v7020_v6, %v6338_v5  ;;  %v7048_v40 = vld [vmem:[%s7697_s6 + $0xf34] sm:$0xf0]  ;;  %v6050_v44 = vld [vmem:[%s7697_s6 + $0xc08] sm:$0xf]  ;;  %v6323_v48 = vor.u32 %v7016_v31, %v6322_v37  ;;  %v4631_v5 = vor.u32 %v6590_v57, %v4628_v62  ;;  %v4612_v10 = vld [vmem:[%s7697_s6 + $0xd8] sm:$0xf0] }
 0x1c9   : > { %4028 = vmatpush.bf16.msrb.mxu2 %v6387_v19  ;;  %v6066_v19 = vld [vmem:[%s7697_s6 + $0xc28] sm:$0xf]  ;;  %v6948_v46 = vld [vmem:[%s7697_s6 + $0xc14] sm:$0xf0]  ;;  %v6451_v51 = vor.u32 %v7048_v40, %v6450_v38  ;;  %v6618_v11 = vld [vmem:[%s7697_s6 + $0x1cc] sm:$0xf] }
 0x1ca   : > { %4041 = vmatpush.bf16.msrb.mxu3 %v6515_v36  ;;  %v6984_v36 = vld [vmem:[%s7697_s6 + $0xd34] sm:$0xf0]  ;;  %v6067_v41 = vor.u32 %v6952_v23, %v6066_v19  ;;  %v6306_v50 = vld [vmem:[%s7697_s6 + $0xe08] sm:$0xf]  ;;  %v6650_v14 = vld [vmem:[%s7697_s6 + $0x2cc] sm:$0xf]  ;;  %v4615_v23 = vor.u32 %v6586_v9, %v4612_v10 }
 0x1cb   : > { %4003 = vmatpush.bf16.msrb.mxu0 %v6115_v47  ;;  %v6195_v47 = vor.u32 %v6984_v36, %v6194_v32  ;;  %v7012_v52 = vld [vmem:[%s7697_s6 + $0xe14] sm:$0xf0]  ;;  %v3777_v55 = vpop.f32.mrf.mxu2  ;;  %v4996_v19 = vld [vmem:[%s7697_s6 + $0x3d8] sm:$0xf0]  ;;  %v6582_v36 = vld [vmem:[%s7697_s6 + $0xac] sm:$0xf] }
 0x1cc   : > { %4016 = vmatpush.bf16.msrb.mxu1 %v6243_v49  ;;  %v6178_v49 = vld [vmem:[%s7697_s6 + $0xd08] sm:$0xf]  ;;  %v7044_v54 = vld [vmem:[%s7697_s6 + $0xf14] sm:$0xf0]  ;;  %v3790_v59 = vpop.f32.mrf.mxu3  ;;  %v6307_v1 = vor.u32 %v7012_v52, %v6306_v50  ;;  %v4596_v37 = vld [vmem:[%s7697_s6 + $0xb8] sm:$0xf0] }
 0x1cd   : > { %4029 = vmatpush.bf16.msrb.mxu2 %v6371_v56  ;;  %v6980_v56 = vld [vmem:[%s7697_s6 + $0xd14] sm:$0xf0]  ;;  %v6614_v31 = vld [vmem:[%s7697_s6 + $0x1ac] sm:$0xf]  ;;  %v4724_v40 = vld [vmem:[%s7697_s6 + $0x1b8] sm:$0xf0] }
 0x1ce   : > { %4042 = vmatpush.bf16.msrb.mxu3 %v6499_v53  ;;  %v6434_v53 = vld [vmem:[%s7697_s6 + $0xf08] sm:$0xf]  ;;  %v6179_v0 = vor.u32 %v6980_v56, %v6178_v49  ;;  %v4727_v49 = vor.u32 %v6614_v31, %v4724_v40  ;;  %v6578_v50 = vld [vmem:[%s7697_s6 + $0x8c] sm:$0xf]  ;;  %v4836_v57 = vld [vmem:[%s7697_s6 + $0x298] sm:$0xf0] }
 0x1cf   : > { %4004 = vmatpush.bf16.msrb.mxu0 %v6099_v60  ;;  %v6051_v60 = vor.u32 %v6948_v46, %v6050_v44  ;;  %v6435_v4 = vor.u32 %v7044_v54, %v6434_v53  ;;  %v4852_v44 = vld [vmem:[%s7697_s6 + $0x2b8] sm:$0xf0]  ;;  %v6678_v46 = vld [vmem:[%s7697_s6 + $0x3ac] sm:$0xf] }
 0x1d0   : > { %4017 = vmatpush.bf16.msrb.mxu1 %v6227_v61  ;;  %v4756_v61 = vld [vmem:[%s7697_s6 + $0x1f8] sm:$0xf0]  ;;  %v6610_v52 = vld [vmem:[%s7697_s6 + $0x18c] sm:$0xf] }
 0x1d1   : > { %4030 = vmatpush.bf16.msrb.mxu2 %v6355_v7  ;;  %v6654_v7 = vld [vmem:[%s7697_s6 + $0x2ec] sm:$0xf]  ;;  %v4759_v6 = vor.u32 %v6622_v58, %v4756_v61  ;;  %v4708_v54 = vld [vmem:[%s7697_s6 + $0x198] sm:$0xf0] }
 0x1d2   : > { %4043 = vmatpush.bf16.msrb.mxu3 %v6483_v2  ;;  %v6686_v2 = vld [vmem:[%s7697_s6 + $0x3ec] sm:$0xf]  ;;  %v4887_v8 = vor.u32 %v6654_v7, %v4884_v63  ;;  %v4964_v59 = vld [vmem:[%s7697_s6 + $0x398] sm:$0xf0]  ;;  %v4711_v63 = vor.u32 %v6610_v52, %v4708_v54 }
 0x1d3   : > { %4005 = vmatpush.bf16.msrb.mxu0 %v6083_v13  ;;  %v5015_v12 = vor.u32 %v6686_v2, %v5012_v3  ;;  %v4740_v13 = vld [vmem:[%s7697_s6 + $0x1d8] sm:$0xf0]  ;;  %v6642_v55 = vld [vmem:[%s7697_s6 + $0x28c] sm:$0xf] }
 0x1d4   : > { %4018 = vmatpush.bf16.msrb.mxu1 %v6211_v17  ;;  %v4868_v17 = vld [vmem:[%s7697_s6 + $0x2d8] sm:$0xf0]  ;;  %v4743_v32 = vor.u32 %v6618_v11, %v4740_v13  ;;  %v6674_v58 = vld [vmem:[%s7697_s6 + $0x38c] sm:$0xf] }
 0x1d5   : > { %4031 = vmatpush.bf16.msrb.mxu2 %v6339_v18  ;;  %v6682_v18 = vld [vmem:[%s7697_s6 + $0x3cc] sm:$0xf]  ;;  %v4564_v2 = vld [vmem:[%s7697_s6 + $0x78] sm:$0xf0] }
 0x1d6   : > { %4044 = vmatpush.bf16.msrb.mxu3 %v6467_v35  ;;  %v4871_v35 = vor.u32 %v6650_v14, %v4868_v17  ;;  %v4999_v38 = vor.u32 %v6682_v18, %v4996_v19  ;;  %v6606_v3 = vld [vmem:[%s7697_s6 + $0x16c] sm:$0xf]  ;;  %v4948_v10 = vld [vmem:[%s7697_s6 + $0x378] sm:$0xf0] }
 0x1d7   : > { %4006 = vmatpush.bf16.msrb.mxu0 %v6067_v41  ;;  %v6646_v41 = vld [vmem:[%s7697_s6 + $0x2ac] sm:$0xf]  ;;  %v4548_v17 = vld [vmem:[%s7697_s6 + $0x58] sm:$0xf0] }
 0x1d8   : > { %4019 = vmatpush.bf16.msrb.mxu1 %v6195_v47  ;;  %v4980_v47 = vld [vmem:[%s7697_s6 + $0x3b8] sm:$0xf0]  ;;  %v4855_v56 = vor.u32 %v6646_v41, %v4852_v44  ;;  %v6670_v9 = vld [vmem:[%s7697_s6 + $0x36c] sm:$0xf] }
 0x1d9   : > { %4032 = vmatpush.bf16.msrb.mxu2 %v6323_v48  ;;  %v4599_v48 = vor.u32 %v6582_v36, %v4596_v37  ;;  %v4983_v53 = vor.u32 %v6678_v46, %v4980_v47  ;;  %v6570_v14 = vld [vmem:[%s7697_s6 + $0x4c] sm:$0xf]  ;;  %v4951_v19 = vor.u32 %v6670_v9, %v4948_v10  ;;  %v4804_v36 = vld [vmem:[%s7697_s6 + $0x258] sm:$0xf0] }
 0x1da   : > { %4045 = vmatpush.bf16.msrb.mxu3 %v6451_v51  ;;  %v4580_v51 = vld [vmem:[%s7697_s6 + $0x98] sm:$0xf0]  ;;  %v6602_v18 = vld [vmem:[%s7697_s6 + $0x14c] sm:$0xf]  ;;  %v4551_v44 = vor.u32 %v6570_v14, %v4548_v17 }
 0x1db   : > { %4007 = vmatpush.bf16.msrb.mxu0 %v6051_v60  ;;  %v3801_v62 = vpop.f32.mrf.mxu0  ;;  %v4583_v61 = vor.u32 %v6578_v50, %v4580_v51  ;;  %v4932_v40 = vld [vmem:[%s7697_s6 + $0x358] sm:$0xf0]  ;;  %v6598_v51 = vld [vmem:[%s7697_s6 + $0x12c] sm:$0xf] }
 0x1dc   : > { %4020 = vmatpush.bf16.msrb.mxu1 %v6179_v0  ;;  %v3802_v60 = vadd.f32 %v3801_v62, %v8564_v15  ;;  %v3814_v7 = vpop.f32.mrf.mxu1  ;;  %v4839_v0 = vor.u32 %v6642_v55, %v4836_v57  ;;  %v4820_v15 = vld [vmem:[%s7697_s6 + $0x278] sm:$0xf0]  ;;  %v6630_v54 = vld [vmem:[%s7697_s6 + $0x22c] sm:$0xf] }
 0x1dd   : > { %4033 = vmatpush.bf16.msrb.mxu2 %v6307_v1  ;;  %v6574_v1 = vld [vmem:[%s7697_s6 + $0x6c] sm:$0xf]  ;;  %v4532_v50 = vld [vmem:[%s7697_s6 + $0x38] sm:$0xf0] }
 0x1de   : > { %4046 = vmatpush.bf16.msrb.mxu3 %v6435_v4  ;;  %4008 = vmatmul.bf16.vlgmr.msrb.gmra.mxu0 %v8025_v16  ;;  %v4967_v4 = vor.u32 %v6674_v58, %v4964_v59  ;;  %v4567_v11 = vor.u32 %v6574_v1, %v4564_v2  ;;  %v4788_v55 = vld [vmem:[%s7697_s6 + $0x238] sm:$0xf0]  ;;  %v6662_v62 = vld [vmem:[%s7697_s6 + $0x32c] sm:$0xf] }
 0x1df   : > { %4052 = vmatpush.bf16.msra.mxu0 %v4631_v5  ;;  %4021 = vmatmul.bf16.vlgmr.msrb.gmra.mxu1 %v8032_v22  ;;  %v3815_v5 = vadd.f32 %v3814_v7, %v3802_v60  ;;  %v4916_v58 = vld [vmem:[%s7697_s6 + $0x338] sm:$0xf0]  ;;  %v6562_v60 = vld [vmem:[%s7697_s6 + $0xc] sm:$0xf] }
 0x1e0   : > { %4065 = vmatpush.bf16.msra.mxu1 %v4759_v6  ;;  %4034 = vmatmul.bf16.vlgmr.msrb.gmra.mxu2 %v8030_v21  ;;  %v4692_v6 = vld [vmem:[%s7697_s6 + $0x178] sm:$0xf0]  ;;  %v6594_v1 = vld [vmem:[%s7697_s6 + $0x10c] sm:$0xf] }
 0x1e1   : > { %4078 = vmatpush.bf16.msra.mxu2 %v4887_v8  ;;  %4047 = vmatmul.bf16.vlgmr.msrb.gmra.mxu3 %v8036_v29  ;;  %v6638_v8 = vld [vmem:[%s7697_s6 + $0x26c] sm:$0xf]  ;;  %v4644_v2 = vld [vmem:[%s7697_s6 + $0x118] sm:$0xf0] }
 0x1e2   : > { %4091 = vmatpush.bf16.msra.mxu3 %v5015_v12  ;;  %v4695_v12 = vor.u32 %v6606_v3, %v4692_v6  ;;  %v4823_v13 = vor.u32 %v6638_v8, %v4820_v15  ;;  %v6626_v3 = vld [vmem:[%s7697_s6 + $0x20c] sm:$0xf]  ;;  %v4900_v8 = vld [vmem:[%s7697_s6 + $0x318] sm:$0xf0] }
 0x1e3   : > { %4053 = vmatpush.bf16.msra.mxu0 %v4615_v23  ;;  %v3827_v23 = vpop.f32.mrf.mxu2  ;;  %v3803_v41 = vpop.f32.mrf.mxu0  ;;  %v6658_v6 = vld [vmem:[%s7697_s6 + $0x30c] sm:$0xf]  ;;  %v5140_v9 = vld [vmem:[%s7697_s6 + $0x4f8] sm:$0xf0] }
 0x1e4   : > { %4066 = vmatpush.bf16.msra.mxu1 %v4743_v32  ;;  %v4676_v32 = vld [vmem:[%s7697_s6 + $0x158] sm:$0xf0]  ;;  %v3828_v37 = vadd.f32 %v3827_v23, %v3815_v5  ;;  %v3840_v31 = vpop.f32.mrf.mxu3  ;;  %v3816_v46 = vpop.f32.mrf.mxu1  ;;  %v6718_v15 = vld [vmem:[%s7697_s6 + $0x4ec] sm:$0xf] }
 0x1e5   : > { %4079 = vmatpush.bf16.msra.mxu2 %v4871_v35  ;;  %v6634_v35 = vld [vmem:[%s7697_s6 + $0x24c] sm:$0xf]  ;;  %v4772_v5 = vld [vmem:[%s7697_s6 + $0x218] sm:$0xf0] }
 0x1e6   : > { %4092 = vmatpush.bf16.msra.mxu3 %v4999_v38  ;;  %v6666_v38 = vld [vmem:[%s7697_s6 + $0x34c] sm:$0xf]  ;;  %v3841_v47 = vadd.f32 %v3840_v31, %v3828_v37  ;;  %v5396_v17 = vld [vmem:[%s7697_s6 + $0x6f8] sm:$0xf0] }
 0x1e7   : > { %4054 = vmatpush.bf16.msra.mxu0 %v4599_v48  ;;  %v4679_v48 = vor.u32 %v6602_v18, %v4676_v32  ;;  %v4935_v52 = vor.u32 %v6666_v38, %v4932_v40  ;;  %v6750_v10 = vld [vmem:[%s7697_s6 + $0x5ec] sm:$0xf]  ;;  %v4647_v18 = vor.u32 %v6594_v1, %v4644_v2  ;;  %v5524_v32 = vld [vmem:[%s7697_s6 + $0x7f8] sm:$0xf0] }
 0x1e8   : > { %4067 = vmatpush.bf16.msra.mxu1 %v4727_v49  ;;  %v4807_v49 = vor.u32 %v6634_v35, %v4804_v36  ;;  %v4264_v57 = vrot.slane %v3841_v47, 6  ;;  %v6782_v14 = vld [vmem:[%s7697_s6 + $0x6ec] sm:$0xf]  ;;  %v4903_v35 = vor.u32 %v6658_v6, %v4900_v8  ;;  %v5143_v36 = vor.u32 %v6718_v15, %v5140_v9  ;;  %v5124_v40 = vld [vmem:[%s7697_s6 + $0x4d8] sm:$0xf0] }
 0x1e9   : > { %4080 = vmatpush.bf16.msra.mxu2 %v4855_v56  ;;  %v6566_v56 = vld [vmem:[%s7697_s6 + $0x2c] sm:$0xf]  ;;  %v5399_v31 = vor.u32 %v6782_v14, %v5396_v17  ;;  %v5252_v46 = vld [vmem:[%s7697_s6 + $0x5d8] sm:$0xf0] }
 0x1ea   : > { %4093 = vmatpush.bf16.msra.mxu3 %v4983_v53  ;;  %v4660_v53 = vld [vmem:[%s7697_s6 + $0x138] sm:$0xf0]  ;;  %v4535_v59 = vor.u32 %v6566_v56, %v4532_v50  ;;  %v8647_v7 = vsel %vm4267_vm0, %v8352_v26, %v4264_v57  ;;  %v6814_v23 = vld [vmem:[%s7697_s6 + $0x7ec] sm:$0xf] }
 0x1eb   : > { %4055 = vmatpush.bf16.msra.mxu0 %v4583_v61  ;;  %v4516_v61 = vld [vmem:[%s7697_s6 + $0x18] sm:$0xf0]  ;;  %v3829_v26 = vpop.f32.mrf.mxu2  ;;  %v6714_v38 = vld [vmem:[%s7697_s6 + $0x4cc] sm:$0xf] }
 0x1ec   : > { %4068 = vmatpush.bf16.msra.mxu1 %v4711_v63  ;;  %v4663_v63 = vor.u32 %v6598_v51, %v4660_v53  ;;  %v6746_v41 = vld [vmem:[%s7697_s6 + $0x5cc] sm:$0xf]  ;;  %v5508_v56 = vld [vmem:[%s7697_s6 + $0x7d8] sm:$0xf0]  ;;  %v5127_v50 = vor.u32 %v6714_v38, %v5124_v40 }
 0x1ed   : > { %4081 = vmatpush.bf16.msra.mxu2 %v4839_v0  ;;  %v4791_v0 = vor.u32 %v6630_v54, %v4788_v55  ;;  %v6778_v47 = vld [vmem:[%s7697_s6 + $0x6cc] sm:$0xf]  ;;  %v5255_v51 = vor.u32 %v6746_v41, %v5252_v46  ;;  %v5108_v54 = vld [vmem:[%s7697_s6 + $0x4b8] sm:$0xf0] }
 0x1ee   : > { %4094 = vmatpush.bf16.msra.mxu3 %v4967_v4  ;;  %v4919_v4 = vor.u32 %v6662_v62, %v4916_v58  ;;  %v6710_v53 = vld [vmem:[%s7697_s6 + $0x4ac] sm:$0xf]  ;;  %v5236_v62 = vld [vmem:[%s7697_s6 + $0x5b8] sm:$0xf0] }
 0x1ef   : > { %4056 = vmatpush.bf16.msra.mxu0 %v4567_v11  ;;  %v3842_v11 = vpop.f32.mrf.mxu3  ;;  %v6742_v55 = vld [vmem:[%s7697_s6 + $0x5ac] sm:$0xf]  ;;  %v5092_v2 = vld [vmem:[%s7697_s6 + $0x498] sm:$0xf0] }
 0x1f0   : > { %4069 = vmatpush.bf16.msra.mxu1 %v4695_v12  ;;  %v4519_v12 = vor.u32 %v6562_v60, %v4516_v61  ;;  %v6774_v58 = vld [vmem:[%s7697_s6 + $0x6ac] sm:$0xf]  ;;  %v5492_v61 = vld [vmem:[%s7697_s6 + $0x7b8] sm:$0xf0] }
 0x1f1   : > { %4082 = vmatpush.bf16.msra.mxu2 %v4823_v13  ;;  %v5268_v13 = vld [vmem:[%s7697_s6 + $0x5f8] sm:$0xf0]  ;;  %v6806_v60 = vld [vmem:[%s7697_s6 + $0x7ac] sm:$0xf] }
 0x1f2   : > { %4095 = vmatpush.bf16.msra.mxu3 %v4951_v19  ;;  %v4775_v19 = vor.u32 %v6626_v3, %v4772_v5  ;;  %v5271_v37 = vor.u32 %v6750_v10, %v5268_v13  ;;  %v6738_v3 = vld [vmem:[%s7697_s6 + $0x58c] sm:$0xf]  ;;  %v5348_v5 = vld [vmem:[%s7697_s6 + $0x698] sm:$0xf0] }
 0x1f3   : > { %4057 = vmatpush.bf16.msra.mxu0 %v4551_v44  ;;  %v5527_v44 = vor.u32 %v6814_v23, %v5524_v32  ;;  %v6802_v6 = vld [vmem:[%s7697_s6 + $0x78c] sm:$0xf]  ;;  %v5476_v8 = vld [vmem:[%s7697_s6 + $0x798] sm:$0xf0] }
 0x1f4   : > { %4070 = vmatpush.bf16.msra.mxu1 %v4679_v48  ;;  %v5380_v48 = vld [vmem:[%s7697_s6 + $0x6d8] sm:$0xf0]  ;;  %v6702_v10 = vld [vmem:[%s7697_s6 + $0x46c] sm:$0xf]  ;;  %v5479_v14 = vor.u32 %v6802_v6, %v5476_v8 }
 0x1f5   : > { %4083 = vmatpush.bf16.msra.mxu2 %v4807_v49  ;;  %v6810_v49 = vld [vmem:[%s7697_s6 + $0x7cc] sm:$0xf]  ;;  %v5076_v11 = vld [vmem:[%s7697_s6 + $0x478] sm:$0xf0] }
 0x1f6   : > { %4096 = vmatpush.bf16.msra.mxu3 %v4935_v52  ;;  %v5383_v52 = vor.u32 %v6778_v47, %v5380_v48  ;;  %v5511_v57 = vor.u32 %v6810_v49, %v5508_v56  ;;  %v5204_v17 = vld [vmem:[%s7697_s6 + $0x578] sm:$0xf0]  ;;  %v6798_v32 = vld [vmem:[%s7697_s6 + $0x76c] sm:$0xf] }
 0x1f7   : > { %4058 = vmatpush.bf16.msra.mxu0 %v4535_v59  ;;  %v5364_v59 = vld [vmem:[%s7697_s6 + $0x6b8] sm:$0xf0]  ;;  %v6698_v38 = vld [vmem:[%s7697_s6 + $0x44c] sm:$0xf] }
 0x1f8   : > { %4071 = vmatpush.bf16.msra.mxu1 %v4663_v63  ;;  %v5111_v63 = vor.u32 %v6710_v53, %v5108_v54  ;;  %v5367_v1 = vor.u32 %v6774_v58, %v5364_v59  ;;  %v5060_v40 = vld [vmem:[%s7697_s6 + $0x458] sm:$0xf0]  ;;  %v6730_v41 = vld [vmem:[%s7697_s6 + $0x54c] sm:$0xf] }
 0x1f9   : > { %4084 = vmatpush.bf16.msra.mxu2 %v4791_v0  ;;  %v5239_v0 = vor.u32 %v6742_v55, %v5236_v62  ;;  %v5188_v47 = vld [vmem:[%s7697_s6 + $0x558] sm:$0xf0]  ;;  %v6762_v48 = vld [vmem:[%s7697_s6 + $0x64c] sm:$0xf]  ;;  %v5063_v53 = vor.u32 %v6698_v38, %v5060_v40 }
 0x1fa   : > { %4097 = vmatpush.bf16.msra.mxu3 %v4919_v4  ;;  %v5220_v4 = vld [vmem:[%s7697_s6 + $0x598] sm:$0xf0]  ;;  %v6694_v58 = vld [vmem:[%s7697_s6 + $0x42c] sm:$0xf] }
 0x1fb   : > { %4059 = vmatpush.bf16.msra.mxu0 %v4519_v12  ;;  %v3853_v26 = vpop.f32.mrf.mxu0  ;;  %v5223_v15 = vor.u32 %v6738_v3, %v5220_v4  ;;  %v6734_v12 = vld [vmem:[%s7697_s6 + $0x56c] sm:$0xf]  ;;  %v5316_v49 = vld [vmem:[%s7697_s6 + $0x658] sm:$0xf0] }
 0x1fc   : > { %4072 = vmatpush.bf16.msra.mxu1 %v4647_v18  ;;  %v3866_v13 = vpop.f32.mrf.mxu1  ;;  %v6766_v18 = vld [vmem:[%s7697_s6 + $0x66c] sm:$0xf]  ;;  %v5319_v62 = vor.u32 %v6762_v48, %v5316_v49  ;;  %v5044_v59 = vld [vmem:[%s7697_s6 + $0x438] sm:$0xf0] }
 0x1fd   : > { %4085 = vmatpush.bf16.msra.mxu2 %v4775_v19  ;;  %v5332_v19 = vld [vmem:[%s7697_s6 + $0x678] sm:$0xf0]  ;;  %v3867_v23 = vadd.f32 %v3866_v13, %v3853_v26  ;;  %v6690_v4 = vld [vmem:[%s7697_s6 + $0x40c] sm:$0xf] }
 0x1fe   : > { %4098 = vmatpush.bf16.msra.mxu3 %v4903_v35  ;;  %4060 = vmatmul.bf16.vlgmr.msra.gmra.mxu0 %v7824_v28  ;;  %v5495_v28 = vor.u32 %v6806_v60, %v5492_v61  ;;  %v5460_v35 = vld [vmem:[%s7697_s6 + $0x778] sm:$0xf0]  ;;  %v6726_v60 = vld [vmem:[%s7697_s6 + $0x52c] sm:$0xf] }
 0x1ff   : > { %4104 = vmatpush.bf16.msrb.mxu0 %v5143_v36  ;;  %4073 = vmatmul.bf16.vlgmr.msra.gmra.mxu1 %v7830_v34  ;;  %v5079_v36 = vor.u32 %v6702_v10, %v5076_v11  ;;  %v5463_v46 = vor.u32 %v6798_v32, %v5460_v35  ;;  %v5428_v3 = vld [vmem:[%s7697_s6 + $0x738] sm:$0xf0]  ;;  %v6722_v8 = vld [vmem:[%s7697_s6 + $0x50c] sm:$0xf] }
 0x200   : > { %4117 = vmatpush.bf16.msrb.mxu1 %v5271_v37  ;;  %4086 = vmatmul.bf16.vlgmr.msra.gmra.mxu2 %v7822_v27  ;;  %v6706_v27 = vld [vmem:[%s7697_s6 + $0x48c] sm:$0xf]  ;;  %v5207_v37 = vor.u32 %v6734_v12, %v5204_v17  ;;  %v5284_v10 = vld [vmem:[%s7697_s6 + $0x618] sm:$0xf0] }
 0x201   : > { %4130 = vmatpush.bf16.msrb.mxu2 %v5399_v31  ;;  %4099 = vmatmul.bf16.vlgmr.msra.gmra.mxu3 %v7828_v33  ;;  %v6770_v33 = vld [vmem:[%s7697_s6 + $0x68c] sm:$0xf]  ;;  %v5095_v34 = vor.u32 %v6706_v27, %v5092_v2  ;;  %v5335_v31 = vor.u32 %v6766_v18, %v5332_v19  ;;  %v5300_v27 = vld [vmem:[%s7697_s6 + $0x638] sm:$0xf0] }
 0x202   : > { %4143 = vmatpush.bf16.msrb.mxu3 %v5527_v44  ;;  %v5351_v9 = vor.u32 %v6770_v33, %v5348_v5  ;;  %v6790_v2 = vld [vmem:[%s7697_s6 + $0x72c] sm:$0xf]  ;;  %v5028_v33 = vld [vmem:[%s7697_s6 + $0x418] sm:$0xf0] }
 0x203   : > { %4105 = vmatpush.bf16.msrb.mxu0 %v5127_v50  ;;  %v3879_v44 = vpop.f32.mrf.mxu2  ;;  %v3855_v55 = vpop.f32.mrf.mxu0  ;;  %v6754_v26 = vld [vmem:[%s7697_s6 + $0x60c] sm:$0xf]  ;;  %v5412_v12 = vld [vmem:[%s7697_s6 + $0x718] sm:$0xf0]  ;;  %v5031_v19 = vor.u32 %v6690_v4, %v5028_v33 }
 0x204   : > { %4118 = vmatpush.bf16.msrb.mxu1 %v5255_v51  ;;  %v3880_v56 = vadd.f32 %v3879_v44, %v3867_v23  ;;  %v3892_v50 = vpop.f32.mrf.mxu3  ;;  %v6794_v51 = vld [vmem:[%s7697_s6 + $0x74c] sm:$0xf]  ;;  %v3868_v61 = vpop.f32.mrf.mxu1  ;;  %v5652_v17 = vld [vmem:[%s7697_s6 + $0x8f8] sm:$0xf0] }
 0x205   : > { %4131 = vmatpush.bf16.msrb.mxu2 %v5383_v52  ;;  %v5444_v52 = vld [vmem:[%s7697_s6 + $0x758] sm:$0xf0]  ;;  %v6786_v11 = vld [vmem:[%s7697_s6 + $0x70c] sm:$0xf] }
 0x206   : > { %4144 = vmatpush.bf16.msrb.mxu3 %v5511_v57  ;;  %v8707_v54 = vadd.f32 %v3892_v50, %v3880_v56  ;;  %v5191_v57 = vor.u32 %v6730_v41, %v5188_v47  ;;  %v6878_v18 = vld [vmem:[%s7697_s6 + $0x9ec] sm:$0xf]  ;;  %v5780_v23 = vld [vmem:[%s7697_s6 + $0x9f8] sm:$0xf0]  ;;  %v5415_v40 = vor.u32 %v6786_v11, %v5412_v12 }
 0x207   : > { %4106 = vmatpush.bf16.msrb.mxu0 %v5111_v63  ;;  %v5447_v63 = vor.u32 %v6794_v51, %v5444_v52  ;;  %v6910_v32 = vld [vmem:[%s7697_s6 + $0xaec] sm:$0xf]  ;;  %v5908_v35 = vld [vmem:[%s7697_s6 + $0xaf8] sm:$0xf0]  ;;  %v5783_v44 = vor.u32 %v6878_v18, %v5780_v23 }
 0x208   : > { %4119 = vmatpush.bf16.msrb.mxu1 %v5239_v0  ;;  %v5172_v0 = vld [vmem:[%s7697_s6 + $0x538] sm:$0xf0]  ;;  %v6842_v47 = vld [vmem:[%s7697_s6 + $0x8cc] sm:$0xf] }
 0x209   : > { %4132 = vmatpush.bf16.msrb.mxu2 %v5367_v1  ;;  %v6758_v1 = vld [vmem:[%s7697_s6 + $0x62c] sm:$0xf]  ;;  %v5175_v5 = vor.u32 %v6726_v60, %v5172_v0  ;;  %v6036_v38 = vld [vmem:[%s7697_s6 + $0xbf8] sm:$0xf0] }
 0x20a   : > { %4145 = vmatpush.bf16.msrb.mxu3 %v5495_v28  ;;  %v5047_v28 = vor.u32 %v6694_v58, %v5044_v59  ;;  %v5303_v6 = vor.u32 %v6758_v1, %v5300_v27  ;;  %v5636_v48 = vld [vmem:[%s7697_s6 + $0x8d8] sm:$0xf0]  ;;  %v6874_v49 = vld [vmem:[%s7697_s6 + $0x9cc] sm:$0xf] }
 0x20b   : > { %4107 = vmatpush.bf16.msrb.mxu0 %v5095_v34  ;;  %v5156_v34 = vld [vmem:[%s7697_s6 + $0x518] sm:$0xf0]  ;;  %v6906_v51 = vld [vmem:[%s7697_s6 + $0xacc] sm:$0xf] }
 0x20c   : > { %4120 = vmatpush.bf16.msrb.mxu1 %v5223_v15  ;;  %v3881_v15 = vpop.f32.mrf.mxu2  ;;  %v3894_v13 = vpop.f32.mrf.mxu3  ;;  %v5764_v50 = vld [vmem:[%s7697_s6 + $0x9d8] sm:$0xf0]  ;;  %v6838_v59 = vld [vmem:[%s7697_s6 + $0x8ac] sm:$0xf] }
 0x20d   : > { %4133 = vmatpush.bf16.msrb.mxu2 %v5351_v9  ;;  %v5431_v9 = vor.u32 %v6790_v2, %v5428_v3  ;;  %v5892_v52 = vld [vmem:[%s7697_s6 + $0xad8] sm:$0xf0]  ;;  %v6870_v61 = vld [vmem:[%s7697_s6 + $0x9ac] sm:$0xf] }
 0x20e   : > { %4146 = vmatpush.bf16.msrb.mxu3 %v5479_v14  ;;  %v6846_v14 = vld [vmem:[%s7697_s6 + $0x8ec] sm:$0xf]  ;;  %v6020_v55 = vld [vmem:[%s7697_s6 + $0xbd8] sm:$0xf0]  ;;  %v5895_v58 = vor.u32 %v6906_v51, %v5892_v52 }
 0x20f   : > { %4108 = vmatpush.bf16.msrb.mxu0 %v5079_v36  ;;  %v5159_v36 = vor.u32 %v6722_v8, %v5156_v34  ;;  %v5655_v41 = vor.u32 %v6846_v14, %v5652_v17  ;;  %v5620_v60 = vld [vmem:[%s7697_s6 + $0x8b8] sm:$0xf0]  ;;  %v6902_v1 = vld [vmem:[%s7697_s6 + $0xaac] sm:$0xf] }
 0x210   : > { %4121 = vmatpush.bf16.msrb.mxu1 %v5207_v37  ;;  %v5287_v37 = vor.u32 %v6754_v26, %v5284_v10  ;;  %v5748_v0 = vld [vmem:[%s7697_s6 + $0x9b8] sm:$0xf0]  ;;  %v6934_v2 = vld [vmem:[%s7697_s6 + $0xbac] sm:$0xf] }
 0x211   : > { %4134 = vmatpush.bf16.msrb.mxu2 %v5335_v31  ;;  %v6942_v31 = vld [vmem:[%s7697_s6 + $0xbec] sm:$0xf]  ;;  %v5876_v27 = vld [vmem:[%s7697_s6 + $0xab8] sm:$0xf0] }
 0x212   : > { %4147 = vmatpush.bf16.msrb.mxu3 %v5463_v46  ;;  %v5911_v46 = vor.u32 %v6910_v32, %v5908_v35  ;;  %v6039_v56 = vor.u32 %v6942_v31, %v6036_v38  ;;  %v6004_v3 = vld [vmem:[%s7697_s6 + $0xbb8] sm:$0xf0]  ;;  %v5879_v4 = vor.u32 %v6902_v1, %v5876_v27  ;;  %v6834_v33 = vld [vmem:[%s7697_s6 + $0x88c] sm:$0xf] }
 0x213   : > { %4109 = vmatpush.bf16.msrb.mxu0 %v5063_v53  ;;  %v6938_v53 = vld [vmem:[%s7697_s6 + $0xbcc] sm:$0xf]  ;;  %v5860_v34 = vld [vmem:[%s7697_s6 + $0xa98] sm:$0xf0] }
 0x214   : > { %4122 = vmatpush.bf16.msrb.mxu1 %v5191_v57  ;;  %v5639_v57 = vor.u32 %v6842_v47, %v5636_v48  ;;  %v6898_v8 = vld [vmem:[%s7697_s6 + $0xa8c] sm:$0xf]  ;;  %v5988_v15 = vld [vmem:[%s7697_s6 + $0xb98] sm:$0xf0] }
 0x215   : > { %4135 = vmatpush.bf16.msrb.mxu2 %v5319_v62  ;;  %v5767_v62 = vor.u32 %v6874_v49, %v5764_v50  ;;  %v6930_v26 = vld [vmem:[%s7697_s6 + $0xb8c] sm:$0xf]  ;;  %v5863_v11 = vor.u32 %v6898_v8, %v5860_v34  ;;  %v5588_v13 = vld [vmem:[%s7697_s6 + $0x878] sm:$0xf0] }
 0x216   : > { %4148 = vmatpush.bf16.msrb.mxu3 %v5447_v63  ;;  %v6023_v63 = vor.u32 %v6938_v53, %v6020_v55  ;;  %v6830_v12 = vld [vmem:[%s7697_s6 + $0x86c] sm:$0xf]  ;;  %v5716_v23 = vld [vmem:[%s7697_s6 + $0x978] sm:$0xf0] }
 0x217   : > { %4110 = vmatpush.bf16.msrb.mxu0 %v5047_v28  ;;  %v5623_v28 = vor.u32 %v6838_v59, %v5620_v60  ;;  %v6862_v14 = vld [vmem:[%s7697_s6 + $0x96c] sm:$0xf]  ;;  %v5844_v35 = vld [vmem:[%s7697_s6 + $0xa78] sm:$0xf0]  ;;  %v5591_v38 = vor.u32 %v6830_v12, %v5588_v13 }
 0x218   : > { %4123 = vmatpush.bf16.msrb.mxu1 %v5175_v5  ;;  %v5604_v5 = vld [vmem:[%s7697_s6 + $0x898] sm:$0xf0]  ;;  %v6894_v32 = vld [vmem:[%s7697_s6 + $0xa6c] sm:$0xf] }
 0x219   : > { %4136 = vmatpush.bf16.msrb.mxu2 %v5303_v6  ;;  %v5732_v6 = vld [vmem:[%s7697_s6 + $0x998] sm:$0xf0]  ;;  %v6922_v53 = vld [vmem:[%s7697_s6 + $0xb4c] sm:$0xf] }
 0x21a   : > { %4149 = vmatpush.bf16.msrb.mxu3 %v5431_v9  ;;  %v5700_v49 = vld [vmem:[%s7697_s6 + $0x958] sm:$0xf0]  ;;  %v6850_v8 = vld [vmem:[%s7697_s6 + $0x90c] sm:$0xf] }
 0x21b   : > { %4111 = vmatpush.bf16.msrb.mxu0 %v5031_v19  ;;  %v3905_v9 = vpop.f32.mrf.mxu0  ;;  %v5991_v19 = vor.u32 %v6930_v26, %v5988_v15  ;;  %v5828_v50 = vld [vmem:[%s7697_s6 + $0xa58] sm:$0xf0]  ;;  %v6882_v26 = vld [vmem:[%s7697_s6 + $0xa0c] sm:$0xf] }
 0x21c   : > { %4124 = vmatpush.bf16.msrb.mxu1 %v5159_v36  ;;  %v3906_v17 = vadd.f32 %v3905_v9, %v8707_v54  ;;  %v3918_v18 = vpop.f32.mrf.mxu1  ;;  %v6926_v36 = vld [vmem:[%s7697_s6 + $0xb6c] sm:$0xf]  ;;  %v5719_v54 = vor.u32 %v6862_v14, %v5716_v23  ;;  %v5956_v55 = vld [vmem:[%s7697_s6 + $0xb58] sm:$0xf0] }
 0x21d   : > { %4137 = vmatpush.bf16.msrb.mxu2 %v5287_v37  ;;  %v5972_v37 = vld [vmem:[%s7697_s6 + $0xb78] sm:$0xf0]  ;;  %v5959_v27 = vor.u32 %v6922_v53, %v5956_v55  ;;  %v6974_v13 = vld [vmem:[%s7697_s6 + $0xcec] sm:$0xf] }
 0x21e   : > { %4150 = vmatpush.bf16.msrb.mxu3 %v5415_v40  ;;  %4112 = vmatmul.bf16.vlgmr.msrb.gmra.mxu0 %v7880_v42  ;;  %v6866_v42 = vld [vmem:[%s7697_s6 + $0x98c] sm:$0xf]  ;;  %v3919_v31 = vadd.f32 %v3918_v18, %v3906_v17  ;;  %v5847_v40 = vor.u32 %v6894_v32, %v5844_v35  ;;  %v5975_v48 = vor.u32 %v6926_v36, %v5972_v37  ;;  %v5668_v34 = vld [vmem:[%s7697_s6 + $0x918] sm:$0xf0] }
 0x21f   : > { %4156 = vmatpush.bf16.msra.mxu0 %v5655_v41  ;;  %4125 = vmatmul.bf16.vlgmr.msrb.gmra.mxu1 %v7884_v45  ;;  %v5607_v45 = vor.u32 %v6834_v33, %v5604_v5  ;;  %v5735_v10 = vor.u32 %v6866_v42, %v5732_v6  ;;  %v6826_v41 = vld [vmem:[%s7697_s6 + $0x84c] sm:$0xf]  ;;  %v5540_v42 = vld [vmem:[%s7697_s6 + $0x818] sm:$0xf0]  ;;  %v5671_v35 = vor.u32 %v6850_v8, %v5668_v34 }
 0x220   : > { %4169 = vmatpush.bf16.msra.mxu1 %v5783_v44  ;;  %4138 = vmatmul.bf16.vlgmr.msrb.gmra.mxu2 %v7876_v39  ;;  %v5751_v39 = vor.u32 %v6870_v61, %v5748_v0  ;;  %v5572_v44 = vld [vmem:[%s7697_s6 + $0x858] sm:$0xf0]  ;;  %v6822_v61 = vld [vmem:[%s7697_s6 + $0x82c] sm:$0xf] }
 0x221   : > { %4182 = vmatpush.bf16.msra.mxu2 %v5911_v46  ;;  %4151 = vmatmul.bf16.vlgmr.msrb.gmra.mxu3 %v7882_v43  ;;  %v6007_v43 = vor.u32 %v6934_v2, %v6004_v3  ;;  %v6858_v46 = vld [vmem:[%s7697_s6 + $0x94c] sm:$0xf]  ;;  %v5684_v2 = vld [vmem:[%s7697_s6 + $0x938] sm:$0xf0] }
 0x222   : > { %4195 = vmatpush.bf16.msra.mxu3 %v6039_v56  ;;  %v6890_v56 = vld [vmem:[%s7697_s6 + $0xa4c] sm:$0xf]  ;;  %v5703_v59 = vor.u32 %v6858_v46, %v5700_v49  ;;  %v5796_v9 = vld [vmem:[%s7697_s6 + $0xa18] sm:$0xf0] }
 0x223   : > { %4157 = vmatpush.bf16.msra.mxu0 %v5639_v57  ;;  %v3931_v47 = vpop.f32.mrf.mxu2  ;;  %v5575_v57 = vor.u32 %v6826_v41, %v5572_v44  ;;  %v5831_v60 = vor.u32 %v6890_v56, %v5828_v50  ;;  %v6854_v0 = vld [vmem:[%s7697_s6 + $0x92c] sm:$0xf]  ;;  %v6164_v14 = vld [vmem:[%s7697_s6 + $0xcf8] sm:$0xf0]  ;;  %v5799_v36 = vor.u32 %v6882_v26, %v5796_v9 }
 0x224   : > { %4170 = vmatpush.bf16.msra.mxu1 %v5767_v62  ;;  %v3932_v51 = vadd.f32 %v3931_v47, %v3919_v31  ;;  %v3944_v52 = vpop.f32.mrf.mxu3  ;;  %v3920_v1 = vpop.f32.mrf.mxu1  ;;  %v6886_v3 = vld [vmem:[%s7697_s6 + $0xa2c] sm:$0xf]  ;;  %v6420_v32 = vld [vmem:[%s7697_s6 + $0xef8] sm:$0xf0] }
 0x225   : > { %4183 = vmatpush.bf16.msra.mxu2 %v5895_v58  ;;  %v3907_v58 = vpop.f32.mrf.mxu0  ;;  %v6818_v5 = vld [vmem:[%s7697_s6 + $0x80c] sm:$0xf]  ;;  %v6548_v31 = vld [vmem:[%s7697_s6 + $0xff8] sm:$0xf0] }
 0x226   : > { %4196 = vmatpush.bf16.msra.mxu3 %v6023_v63  ;;  %v8778_v62 = vadd.f32 %v3944_v52, %v3932_v51  ;;  %v5556_v63 = vld [vmem:[%s7697_s6 + $0x838] sm:$0xf0]  ;;  %v7006_v17 = vld [vmem:[%s7697_s6 + $0xdec] sm:$0xf]  ;;  %v5543_v18 = vor.u32 %v6818_v5, %v5540_v42 }
 0x227   : > { %4158 = vmatpush.bf16.msra.mxu0 %v5623_v28  ;;  %v5812_v28 = vld [vmem:[%s7697_s6 + $0xa38] sm:$0xf0]  ;;  %v5559_v33 = vor.u32 %v6822_v61, %v5556_v63  ;;  %v7038_v23 = vld [vmem:[%s7697_s6 + $0xeec] sm:$0xf] }
 0x228   : > { %4171 = vmatpush.bf16.msra.mxu1 %v5751_v39  ;;  %v6918_v39 = vld [vmem:[%s7697_s6 + $0xb2c] sm:$0xf]  ;;  %v5815_v6 = vor.u32 %v6886_v3, %v5812_v28  ;;  %v6423_v41 = vor.u32 %v7038_v23, %v6420_v32  ;;  %v6148_v46 = vld [vmem:[%s7697_s6 + $0xcd8] sm:$0xf0] }
 0x229   : > { %4184 = vmatpush.bf16.msra.mxu2 %v5879_v4  ;;  %v5940_v4 = vld [vmem:[%s7697_s6 + $0xb38] sm:$0xf0]  ;;  %v7070_v37 = vld [vmem:[%s7697_s6 + $0xfec] sm:$0xf] }
 0x22a   : > { %4197 = vmatpush.bf16.msra.mxu3 %v6007_v43  ;;  %v5687_v43 = vor.u32 %v6854_v0, %v5684_v2  ;;  %v6970_v44 = vld [vmem:[%s7697_s6 + $0xccc] sm:$0xf]  ;;  %v6276_v49 = vld [vmem:[%s7697_s6 + $0xdd8] sm:$0xf0] }
 0x22b   : > { %4159 = vmatpush.bf16.msra.mxu0 %v5607_v45  ;;  %v3933_v15 = vpop.f32.mrf.mxu2  ;;  %v5943_v45 = vor.u32 %v6918_v39, %v5940_v4  ;;  %v7002_v47 = vld [vmem:[%s7697_s6 + $0xdcc] sm:$0xf]  ;;  %v6404_v50 = vld [vmem:[%s7697_s6 + $0xed8] sm:$0xf0]  ;;  %v6151_v53 = vor.u32 %v6970_v44, %v6148_v46 }
 0x22c   : > { %4172 = vmatpush.bf16.msra.mxu1 %v5735_v10  ;;  %v6914_v10 = vld [vmem:[%s7697_s6 + $0xb0c] sm:$0xf]  ;;  %v3946_v12 = vpop.f32.mrf.mxu3  ;;  %v6532_v52 = vld [vmem:[%s7697_s6 + $0xfd8] sm:$0xf0]  ;;  %v6279_v55 = vor.u32 %v7002_v47, %v6276_v49 }
 0x22d   : > { %4185 = vmatpush.bf16.msra.mxu2 %v5863_v11  ;;  %v5924_v11 = vld [vmem:[%s7697_s6 + $0xb18] sm:$0xf0]  ;;  %v7034_v56 = vld [vmem:[%s7697_s6 + $0xecc] sm:$0xf] }
 0x22e   : > { %4198 = vmatpush.bf16.msra.mxu3 %v5991_v19  ;;  %v6292_v19 = vld [vmem:[%s7697_s6 + $0xdf8] sm:$0xf0]  ;;  %v7066_v51 = vld [vmem:[%s7697_s6 + $0xfcc] sm:$0xf] }
 0x22f   : > { %4160 = vmatpush.bf16.msra.mxu0 %v5591_v38  ;;  %v5927_v38 = vor.u32 %v6914_v10, %v5924_v11  ;;  %v6966_v58 = vld [vmem:[%s7697_s6 + $0xcac] sm:$0xf]  ;;  %v6535_v61 = vor.u32 %v7066_v51, %v6532_v52  ;;  %v6260_v63 = vld [vmem:[%s7697_s6 + $0xdb8] sm:$0xf0] }
 0x230   : > { %4173 = vmatpush.bf16.msra.mxu1 %v5719_v54  ;;  %v6167_v54 = vor.u32 %v6974_v13, %v6164_v14  ;;  %v7030_v0 = vld [vmem:[%s7697_s6 + $0xeac] sm:$0xf]  ;;  %v6388_v1 = vld [vmem:[%s7697_s6 + $0xeb8] sm:$0xf0] }
 0x231   : > { %4186 = vmatpush.bf16.msra.mxu2 %v5847_v40  ;;  %v6295_v40 = vor.u32 %v7006_v17, %v6292_v19  ;;  %v6516_v2 = vld [vmem:[%s7697_s6 + $0xfb8] sm:$0xf0]  ;;  %v6391_v28 = vor.u32 %v7030_v0, %v6388_v1  ;;  %v6962_v39 = vld [vmem:[%s7697_s6 + $0xc8c] sm:$0xf] }
 0x232   : > { %4199 = vmatpush.bf16.msra.mxu3 %v5975_v48  ;;  %v6551_v48 = vor.u32 %v7070_v37, %v6548_v31  ;;  %v6116_v4 = vld [vmem:[%s7697_s6 + $0xc98] sm:$0xf0]  ;;  %v7026_v5 = vld [vmem:[%s7697_s6 + $0xe8c] sm:$0xf] }
 0x233   : > { %4161 = vmatpush.bf16.msra.mxu0 %v5575_v57  ;;  %v6407_v57 = vor.u32 %v7034_v56, %v6404_v50  ;;  %v6372_v42 = vld [vmem:[%s7697_s6 + $0xe98] sm:$0xf0]  ;;  %v6119_v34 = vor.u32 %v6962_v39, %v6116_v4  ;;  %v6958_v9 = vld [vmem:[%s7697_s6 + $0xc6c] sm:$0xf] }
 0x234   : > { %4174 = vmatpush.bf16.msra.mxu1 %v5703_v59  ;;  %v6132_v59 = vld [vmem:[%s7697_s6 + $0xcb8] sm:$0xf0]  ;;  %v6990_v11 = vld [vmem:[%s7697_s6 + $0xd6c] sm:$0xf] }
 0x235   : > { %4187 = vmatpush.bf16.msra.mxu2 %v5831_v60  ;;  %v6998_v60 = vld [vmem:[%s7697_s6 + $0xdac] sm:$0xf]  ;;  %v6100_v10 = vld [vmem:[%s7697_s6 + $0xc78] sm:$0xf0] }
 0x236   : > { %4200 = vmatpush.bf16.msra.mxu3 %v5959_v27  ;;  %v7062_v27 = vld [vmem:[%s7697_s6 + $0xfac] sm:$0xf]  ;;  %v6263_v3 = vor.u32 %v6998_v60, %v6260_v63  ;;  %v6228_v14 = vld [vmem:[%s7697_s6 + $0xd78] sm:$0xf0]  ;;  %v6103_v23 = vor.u32 %v6958_v9, %v6100_v10 }
 0x237   : > { %4162 = vmatpush.bf16.msra.mxu0 %v5559_v33  ;;  %v6244_v33 = vld [vmem:[%s7697_s6 + $0xd98] sm:$0xf0]  ;;  %v7022_v17 = vld [vmem:[%s7697_s6 + $0xe6c] sm:$0xf]  ;;  %v6231_v32 = vor.u32 %v6990_v11, %v6228_v14 }
 0x238   : > { %4175 = vmatpush.bf16.msra.mxu1 %v5687_v43  ;;  %v7058_v43 = vld [vmem:[%s7697_s6 + $0xf8c] sm:$0xf]  ;;  %v6484_v19 = vld [vmem:[%s7697_s6 + $0xf78] sm:$0xf0] }
 0x239   : > { %4188 = vmatpush.bf16.msra.mxu2 %v5815_v6  ;;  %v6500_v6 = vld [vmem:[%s7697_s6 + $0xf98] sm:$0xf0]  ;;  %v6986_v31 = vld [vmem:[%s7697_s6 + $0xd4c] sm:$0xf] }
 0x23a   : > { %4201 = vmatpush.bf16.msra.mxu3 %v5943_v45  ;;  %v6375_v45 = vor.u32 %v7026_v5, %v6372_v42  ;;  %v6503_v12 = vor.u32 %v7058_v43, %v6500_v6  ;;  %v6084_v37 = vld [vmem:[%s7697_s6 + $0xc58] sm:$0xf0]  ;;  %v7014_v63 = vld [vmem:[%s7697_s6 + $0xe2c] sm:$0xf] }
 0x23b   : > { %4163 = vmatpush.bf16.msra.mxu0 %v5543_v18  ;;  %v7054_v18 = vld [vmem:[%s7697_s6 + $0xf6c] sm:$0xf]  ;;  %v6340_v44 = vld [vmem:[%s7697_s6 + $0xe58] sm:$0xf0] }
 0x23c   : > { %4176 = vmatpush.bf16.msra.mxu1 %v5671_v35  ;;  %v3970_v26 = vpop.f32.mrf.mxu1  ;;  %v6468_v49 = vld [vmem:[%s7697_s6 + $0xf58] sm:$0xf0]  ;;  %v7046_v1 = vld [vmem:[%s7697_s6 + $0xf2c] sm:$0xf] }
 0x23d   : > { %4189 = vmatpush.bf16.msra.mxu2 %v5799_v36  ;;  %v6954_v36 = vld [vmem:[%s7697_s6 + $0xc4c] sm:$0xf]  ;;  %v6324_v0 = vld [vmem:[%s7697_s6 + $0xe38] sm:$0xf0] }
 0x23e   : > { %4202 = vmatpush.bf16.msra.mxu3 %v5927_v38  ;;  %4164 = vmatmul.bf16.vlgmr.msra.gmra.mxu0 %v7949_v20  ;;  %v6135_v20 = vor.u32 %v6966_v58, %v6132_v59  ;;  %v6487_v38 = vor.u32 %v7054_v18, %v6484_v19  ;;  %v6087_v50 = vor.u32 %v6954_v36, %v6084_v37  ;;  %v6068_v58 = vld [vmem:[%s7697_s6 + $0xc38] sm:$0xf0]  ;;  %v6982_v59 = vld [vmem:[%s7697_s6 + $0xd2c] sm:$0xf] }
 0x23f   : > { %4208 = vmatpush.bf16.msrb.mxu0 %v6167_v54  ;;  %4177 = vmatmul.bf16.vlgmr.msra.gmra.mxu1 %v7956_v25  ;;  %v6519_v25 = vor.u32 %v7062_v27, %v6516_v2  ;;  %v6452_v27 = vld [vmem:[%s7697_s6 + $0xf38] sm:$0xf0]  ;;  %v6978_v4 = vld [vmem:[%s7697_s6 + $0xd0c] sm:$0xf] }
 0x240   : > { %4221 = vmatpush.bf16.msrb.mxu1 %v6295_v40  ;;  %4190 = vmatmul.bf16.vlgmr.msra.gmra.mxu2 %v7954_v24  ;;  %v6994_v24 = vld [vmem:[%s7697_s6 + $0xd8c] sm:$0xf]  ;;  %v6212_v40 = vld [vmem:[%s7697_s6 + $0xd58] sm:$0xf0] }
 0x241   : > { %4234 = vmatpush.bf16.msrb.mxu2 %v6423_v41  ;;  %4203 = vmatmul.bf16.vlgmr.msra.gmra.mxu3 %v7960_v30  ;;  %v3957_v30 = vpop.f32.mrf.mxu0  ;;  %v6247_v15 = vor.u32 %v6994_v24, %v6244_v33  ;;  %v7018_v41 = vld [vmem:[%s7697_s6 + $0xe4c] sm:$0xf]  ;;  %v6052_v39 = vld [vmem:[%s7697_s6 + $0xc18] sm:$0xf0]  ;;  %v6455_v24 = vor.u32 %v7046_v1, %v6452_v27 }
 0x242   : > { %4247 = vmatpush.bf16.msrb.mxu3 %v6551_v48  ;;  %v3958_v8 = vadd.f32 %v3957_v30, %v8778_v62  ;;  %v6356_v62 = vld [vmem:[%s7697_s6 + $0xe78] sm:$0xf0]  ;;  %v7050_v48 = vld [vmem:[%s7697_s6 + $0xf4c] sm:$0xf] }
 0x243   : > { %4209 = vmatpush.bf16.msrb.mxu0 %v6151_v53  ;;  %v6359_v35 = vor.u32 %v7022_v17, %v6356_v62  ;;  %v3983_v54 = vpop.f32.mrf.mxu2  ;;  %v6215_v53 = vor.u32 %v6986_v31, %v6212_v40  ;;  %v6471_v60 = vor.u32 %v7050_v48, %v6468_v49  ;;  %v7010_v33 = vld [vmem:[%s7697_s6 + $0xe0c] sm:$0xf]  ;;  %v6308_v5 = vld [vmem:[%s7697_s6 + $0xe18] sm:$0xf0] }
 0x244   : > { %4222 = vmatpush.bf16.msrb.mxu1 %v6279_v55  ;;  %v3971_v13 = vadd.f32 %v3970_v26, %v3958_v8  ;;  %v3996_v47 = vpop.f32.mrf.mxu3  ;;  %v3972_v51 = vpop.f32.mrf.mxu1  ;;  %v6343_v55 = vor.u32 %v7018_v41, %v6340_v44  ;;  %v7042_v30 = vld [vmem:[%s7697_s6 + $0xf0c] sm:$0xf]  ;;  %v6436_v43 = vld [vmem:[%s7697_s6 + $0xf18] sm:$0xf0]  ;;  %v6311_v26 = vor.u32 %v7010_v33, %v6308_v5 }
 0x245   : > { %4235 = vmatpush.bf16.msrb.mxu2 %v6407_v57  ;;  %v6950_v57 = vld [vmem:[%s7697_s6 + $0xc2c] sm:$0xf] }
 0x246   : > { %4248 = vmatpush.bf16.msrb.mxu3 %v6535_v61  ;;  %v3984_v46 = vadd.f32 %v3983_v54, %v3971_v13  ;;  %v6196_v61 = vld [vmem:[%s7697_s6 + $0xd38] sm:$0xf0]  ;;  %v6071_v2 = vor.u32 %v6950_v57, %v6068_v58 }
 0x247   : > { %4210 = vmatpush.bf16.msrb.mxu0 %v6135_v20  ;;  %v6199_v20 = vor.u32 %v6982_v59, %v6196_v61 }
 0x248   : > { %4223 = vmatpush.bf16.msrb.mxu1 %v6263_v3  ;;  %v3997_v52 = vadd.f32 %v3996_v47, %v3984_v46  ;;  %v6327_v3 = vor.u32 %v7014_v63, %v6324_v0 }
 0x249   : > { %4236 = vmatpush.bf16.msrb.mxu2 %v6391_v28  ;;  %v3959_v56 = vpop.f32.mrf.mxu0  ;;  %v6946_v28 = vld [vmem:[%s7697_s6 + $0xc0c] sm:$0xf] }
 0x24a   : > { %4249 = vmatpush.bf16.msrb.mxu3 %v6519_v25  ;;  %v6180_v25 = vld [vmem:[%s7697_s6 + $0xd18] sm:$0xf0]  ;;  %v6055_v8 = vor.u32 %v6946_v28, %v6052_v39 }
 0x24b   : > { %4211 = vmatpush.bf16.msrb.mxu0 %v6119_v34  ;;  %v3985_v42 = vpop.f32.mrf.mxu2  ;;  %v6183_v34 = vor.u32 %v6978_v4, %v6180_v25 }
 0x24c   : > { %4224 = vmatpush.bf16.msrb.mxu1 %v6247_v15  ;;  %v3998_v6 = vpop.f32.mrf.mxu3  ;;  %v6439_v15 = vor.u32 %v7042_v30, %v6436_v43 }
 0x24d   : > { %4237 = vmatpush.bf16.msrb.mxu2 %v6375_v45 }
 0x24e   : > { %4250 = vmatpush.bf16.msrb.mxu3 %v6503_v12 }
 0x24f   : > { %4212 = vmatpush.bf16.msrb.mxu0 %v6103_v23 }
 0x250   : > { %4225 = vmatpush.bf16.msrb.mxu1 %v6231_v32 }
 0x251   : > { %4238 = vmatpush.bf16.msrb.mxu2 %v6359_v35 }
 0x252   : > { %4251 = vmatpush.bf16.msrb.mxu3 %v6487_v38 }
 0x253   : > { %4213 = vmatpush.bf16.msrb.mxu0 %v6087_v50 }
 0x254   : > { %4226 = vmatpush.bf16.msrb.mxu1 %v6215_v53 }
 0x255   : > { %4239 = vmatpush.bf16.msrb.mxu2 %v6343_v55 }
 0x256   : > { %4252 = vmatpush.bf16.msrb.mxu3 %v6471_v60 }
 0x257   : > { %4214 = vmatpush.bf16.msrb.mxu0 %v6071_v2 }
 0x258   : > { %4227 = vmatpush.bf16.msrb.mxu1 %v6199_v20 }
 0x259   : > { %4240 = vmatpush.bf16.msrb.mxu2 %v6327_v3 }
 0x25a   : > { %4253 = vmatpush.bf16.msrb.mxu3 %v6455_v24 }
 0x25b   : > { %4215 = vmatpush.bf16.msrb.mxu0 %v6055_v8  ;;  %v4009_v45 = vpop.f32.mrf.mxu0  ;;  %v294_v8 = vld [vmem:[%s7714_s28] sm:$0xff] }
 0x25c   : > { %4228 = vmatpush.bf16.msrb.mxu1 %v6183_v34  ;;  %v4010_v9 = vadd.f32 %v4009_v45, %v3997_v52  ;;  %v4022_v10 = vpop.f32.mrf.mxu1 }
 0x25d   : > { %4241 = vmatpush.bf16.msrb.mxu2 %v6311_v26 }
 0x25e   : > { %4254 = vmatpush.bf16.msrb.mxu3 %v6439_v15  ;;  %4216 = vmatmul.bf16.vlgmr.msrb.gmra.mxu0 %v8025_v16  ;;  %v4023_v11 = vadd.f32 %v4022_v10, %v4010_v9 }
 0x25f   : > { %4229 = vmatmul.bf16.vlgmr.msrb.gmra.mxu1 %v8032_v22 }
 0x260   : > { %4242 = vmatmul.bf16.vlgmr.msrb.gmra.mxu2 %v8030_v21 }
 0x261   : > { %4255 = vmatmul.bf16.vlgmr.msrb.gmra.mxu3 %v8036_v29 }
 0x263   : > { %v4035_v12 = vpop.f32.mrf.mxu2  ;;  %v4011_v17 = vpop.f32.mrf.mxu0 }
 0x264   : > { %v4036_v13 = vadd.f32 %v4035_v12, %v4023_v11  ;;  %v4048_v14 = vpop.f32.mrf.mxu3  ;;  %v4024_v62 = vpop.f32.mrf.mxu1 }
 0x266   : > { %v4049_v18 = vadd.f32 %v4048_v14, %v4036_v13 }
 0x268   : > { %v4265_v43 = vrot.slane %v4049_v18, 4 }
 0x26b   : > { %v4037_v19 = vpop.f32.mrf.mxu2 }
 0x26c   : > { %v4050_v23 = vpop.f32.mrf.mxu3 }
 0x27b   : > { %v4061_v32 = vpop.f32.mrf.mxu0 }
 0x27c   : > { %v4074_v16 = vpop.f32.mrf.mxu1 }
 0x27d   : > { %v4075_v35 = vadd.f32 %v4074_v16, %v4061_v32 }
 0x283   : > { %v4087_v22 = vpop.f32.mrf.mxu2  ;;  %v4063_v29 = vpop.f32.mrf.mxu0 }
 0x284   : > { %v4088_v36 = vadd.f32 %v4087_v22, %v4075_v35  ;;  %v4100_v21 = vpop.f32.mrf.mxu3  ;;  %v4076_v31 = vpop.f32.mrf.mxu1 }
 0x286   : > { %v4101_v37 = vadd.f32 %v4100_v21, %v4088_v36 }
 0x28b   : > { %v4089_v38 = vpop.f32.mrf.mxu2 }
 0x28c   : > { %v4102_v54 = vpop.f32.mrf.mxu3 }
 0x29b   : > { %v4113_v40 = vpop.f32.mrf.mxu0 }
 0x29c   : > { %v4126_v41 = vpop.f32.mrf.mxu1  ;;  %v4114_v52 = vadd.f32 %v4113_v40, %v4101_v37 }
 0x29e   : > { %v4127_v58 = vadd.f32 %v4126_v41, %v4114_v52 }
 0x2a3   : > { %v4139_v44 = vpop.f32.mrf.mxu2  ;;  %v4115_v47 = vpop.f32.mrf.mxu0 }
 0x2a4   : > { %v4152_v46 = vpop.f32.mrf.mxu3  ;;  %v4128_v48 = vpop.f32.mrf.mxu1  ;;  %v4140_v60 = vadd.f32 %v4139_v44, %v4127_v58 }
 0x2a6   : > { %v4153_v0 = vadd.f32 %v4152_v46, %v4140_v60 }
 0x2ab   : > { %v4141_v49 = vpop.f32.mrf.mxu2 }
 0x2ac   : > { %v4154_v56 = vpop.f32.mrf.mxu3 }
 0x2bb   : > { %v4165_v50 = vpop.f32.mrf.mxu0 }
 0x2bc   : > { %v4178_v51 = vpop.f32.mrf.mxu1  ;;  %v4166_v1 = vadd.f32 %v4165_v50, %v4153_v0 }
 0x2be   : > { %v4179_v27 = vadd.f32 %v4178_v51, %v4166_v1 }
 0x2c3   : > { %v4191_v53 = vpop.f32.mrf.mxu2  ;;  %v4167_v57 = vpop.f32.mrf.mxu0 }
 0x2c4   : > { %v4204_v55 = vpop.f32.mrf.mxu3  ;;  %v4180_v59 = vpop.f32.mrf.mxu1  ;;  %v4192_v2 = vadd.f32 %v4191_v53, %v4179_v27 }
 0x2c6   : > { %v4205_v20 = vadd.f32 %v4204_v55, %v4192_v2 }
 0x2cb   : > { %v4193_v61 = vpop.f32.mrf.mxu2 }
 0x2cc   : > { %v4206_v63 = vpop.f32.mrf.mxu3 }
 0x2db   : > { %v4217_v3 = vpop.f32.mrf.mxu0 }
 0x2dc   : > { %v4230_v28 = vpop.f32.mrf.mxu1  ;;  %v4218_v39 = vadd.f32 %v4217_v3, %v4205_v20 }
 0x2de   : > { %v4231_v4 = vadd.f32 %v4230_v28, %v4218_v39 }
 0x2e3   : > { %v4243_v24 = vpop.f32.mrf.mxu2  ;;  %v4219_v5 = vpop.f32.mrf.mxu0 }
 0x2e4   : > { %v4244_v25 = vadd.f32 %v4243_v24, %v4231_v4  ;;  %v4256_v33 = vpop.f32.mrf.mxu3  ;;  %v4232_v42 = vpop.f32.mrf.mxu1 }
 0x2e6   : > { %v4257_v30 = vadd.f32 %v4256_v33, %v4244_v25 }
 0x2e8   : > { %v4266_v6 = vrot.slane %v4257_v30, 2 }
 0x2ea   : > { %v4270_v34 = vsel %vm4269_vm1, %v4265_v43, %v4266_v6  ;;  %4279 = sbr.rel (%p6552_p8) target bundleno = 812 (0x32c), region = 52 }
 0x2eb   : > { %v4272_v26 = vsel %vm4271_vm2, %v8647_v7, %v4270_v34  ;;  %v4245_v15 = vpop.f32.mrf.mxu2 }
 0x2ec   : > { %v4274_v45 = vadd.f32 %v4272_v26, %v294_v8  ;;  %v4258_v9 = vpop.f32.mrf.mxu3 }
 0x2ee   : > { %4275 = vst [vmem:[%s7714_s28] sm:$0xff] %v4274_v45 }
 0x2ef   : > { %v4281_v10 = vld [vmem:[%s7707_s5] sm:$0xf] }
 0x2f0   : > { %v4283_v11 = vperm.slane %v4281_v10, 0  ;;  %v4284_v12 = vperm.slane %v4281_v10, 1  ;;  %v4285_v13 = vperm.slane %v4281_v10, 2  ;;  %v4286_v14 = vperm.slane %v4281_v10, 3 }
 0x2f2   : > { %v4287_v17 = vrot.slane %v4284_v12, 6  ;;  %v4288_v62 = vrot.slane %v4285_v13, 4  ;;  %v4289_v18 = vrot.slane %v4286_v14, 2 }
 0x2f4   : > { %v4290_v7 = vsel %vm4267_vm0, %v4283_v11, %v4287_v17  ;;  %v4291_v23 = vsel %vm4269_vm1, %v4288_v62, %v4289_v18 }
 0x2f5   : > { %v4280_v19 = vld [vmem:[%s7714_s28] sm:$0xff]  ;;  %v4292_v32 = vsel %vm4271_vm2, %v4290_v7, %v4291_v23 }
 0x2f6   : > { %v4294_v16 = vadd.f32 %v4292_v32, %v4280_v19 }
 0x2f8   : > { %v4296_v35 = vmul.f32 0.70710677, %v4294_v16  ;;  %v4295_v39 = vmul.f32 0.5, %v4294_v16 }
 0x2fa   : > { %v4297_v22 = vmul.f32 %v4296_v35, %v4296_v35 }
 0x2fc   : > { %v4298_v36 = vmin.f32 %v4297_v22, 16.0 }
 0x2fe   : > { %v4299_v21 = vmul.f32 2.1237322e-06, %v4298_v36  ;;  %v4310_v37 = vmul.f32 3.8918573e-05, %v4298_v36 }
 0x300   : > { %v4300_v29 = vadd.f32 0.00028619796, %v4299_v21  ;;  %v4311_v31 = vadd.f32 0.001143296, %v4310_v37 }
 0x302   : > { %v4301_v38 = vmul.f32 %v4300_v29, %v4298_v36  ;;  %v4312_v54 = vmul.f32 %v4311_v31, %v4298_v36 }
 0x304   : > { %v4302_v40 = vadd.f32 0.0036580483, %v4301_v38  ;;  %v4313_v41 = vadd.f32 0.014752088, %v4312_v54 }
 0x306   : > { %v4303_v44 = vmul.f32 %v4302_v40, %v4298_v36  ;;  %v4314_v46 = vmul.f32 %v4313_v41, %v4298_v36 }
 0x308   : > { %v4315_v47 = vadd.f32 0.112945676, %v4314_v46  ;;  %v4304_v48 = vadd.f32 0.05243302, %v4303_v44 }
 0x30a   : > { %v4316_v49 = vmul.f32 %v4315_v47, %v4298_v36  ;;  %v4305_v50 = vmul.f32 %v4304_v48, %v4298_v36 }
 0x30c   : > { %v4317_v56 = vadd.f32 0.4994258, %v4316_v49  ;;  %v4306_v53 = vadd.f32 0.18741608, %v4305_v50 }
 0x30e   : > { %v4318_v51 = vmul.f32 %v4317_v56, %v4298_v36  ;;  %v4307_v55 = vmul.f32 %v4306_v53, %v4298_v36 }
 0x310   : > { %v4319_v52 = vadd.f32 1.0, %v4318_v51  ;;  %v4308_v59 = vadd.f32 1.1283791, %v4307_v55 }
 0x312   : > { %7214 = vrcp.f32 %v4319_v52  ;;  %v4331_v60 = vand.u32 2147483648, %v4319_v52  ;;  %vm4325_vm3 = vweird.f32 %v4319_v52  ;;  %v4329_v63 = vand.u32 2147483647, %v4319_v52 }
 0x313   : > { %v4309_v27 = vmul.f32 %v4308_v59, %v4296_v35 }
 0x314   : > { %v4332_v1 = vor.u32 1.1754944e-38, %v4331_v60  ;;  %vm4330_vm6 = vcmp.eq.f32.partialorder %v4329_v63, 8.507059e+37 }
 0x318   : > { %v7215_v57 = vpop.eup %7214 }
 0x319   : > { %v4321_v58 = vmul.f32 %v7215_v57, %v4319_v52  ;;  %vm4326_vm4 = vweird.f32 %v7215_v57 }
 0x31a   : > { %vm4327_vm5 = vmor %vm4325_vm3, %vm4326_vm4 }
 0x31b   : > { %v4322_v61 = vsub.f32 1.0, %v4321_v58 }
 0x31d   : > { %v4323_v0 = vmul.f32 %v7215_v57, %v4322_v61 }
 0x31f   : > { %v4324_v2 = vadd.f32 %v7215_v57, %v4323_v0 }
 0x321   : > { %v4328_v20 = vsel %vm4327_vm5, %v7215_v57, %v4324_v2 }
 0x322   : > { %v4333_v3 = vsel %vm4330_vm6, %v4332_v1, %v4328_v20 }
 0x323   : > { %v4334_v28 = vmul.f32 %v4333_v3, %v4309_v27 }
 0x325   : > { %v6553_v4 = vclamps-f32 %v4334_v28, 1.0 }
 0x327   : > { %v4337_v24 = vadd.f32 1.0, %v6553_v4 }
 0x329   : > { %v4338_v25 = vmul.f32 %v4337_v24, %v4295_v39 }
 0x32b   : > { %4339 = vst [vmem:[%s7714_s28] sm:$0xff] %v4338_v25 }
 0x32c PF: > { %s7073_s17 = sshll.u32 %s7448_s22, 3  ;;  %s8984_s3 = sld [smem:[#allocation23_spill]] }
 0x32d   : > { %s4354_s27 = sshll.u32 %s7714_s28, 4  ;;  %s4341_s11 = scalar_lea.sflag [#allocation4], %s7704_s24  ;;  %s4355_s27 = int_to_ptr.vmem [resolvable:$true] %s4354_s27 }
 0x332   : > { %s4352_s15 = scalar_lea.hbm %s8984_s3, %s7073_s17  ;;  %s7326_s22 = scalar_lea.hbm %s8984_s3, 16 }
 0x333   : > { %s4356_s8 = sshll.u32 %s4352_s15, 4  ;;  %s4357_s8 = int_to_ptr.hbm [resolvable:$true] %s4356_s8 }
 0x334   : > { %s7320_s20 = sshra.s32 %s4357_s8, 4  ;;  %s7321_s20 = int_to_ptr.hbm [resolvable:$true] %s7320_s20 }
 0x335   : > { %s7322_s23 = scalar_lea.hbm %s7321_s20, 8  ;;  %p7327_p10 = scmp.lt.s32.totalorder %s7321_s20, %s8984_s3 }
 0x336   : > { %p7323_p3 = scmp.ne.s32.totalorder %s7321_s20, %s7322_s23  ;;  %p7328_p11 = scmp.lt.s32.totalorder %s7326_s22, %s7322_s23 }
 0x338   : > { %p7324_p5 = pnand %p7323_p3, %p7668_p2  ;;  %p7329_p13 = por %p7328_p11, %p7327_p10 }
 0x33a   : > { %p7325_p6 = pneg %p7324_p5 }
 0x33c   : > { %p7330_p1 = pnand %p7329_p13, %p7325_p6 }
 0x33e   : > { %7333 = shalt.err (!%p7330_p1)
}
 0x33f   : > { %7080 = dma.vmem_to_hbm [thread:$0]  (%p7668_p2), %s4355_s27, 128, %s4357_s8, %s4341_s11  }
 0x340 PF: > { %p7097_p12 = scmp.ge.s32.totalorder %s7460_s25, 2  ;;  %s4368_s6 = sand.u32 1, %s7408_s12  }
 0x341   : > { %s4369_s24 = scalar_lea.sflag [#allocation4], %s4368_s6 }
 0x342   : > { %p7093_p7 = pnand %p7097_p12, %p7672_p9 }
 0x344   : > { %p7094_p0 = pneg %p7093_p7 }
 0x346   : > { %7403 = dma.done.wait (%p7094_p0), %s4369_s24, 128  }
 0x347   : > { %7405 = vsyncadd (%p7094_p0), %s4369_s24, 4294967168  ;;  %s22_s25 = sadd.s32 1, %s7460_s25   ;;  %s8986_s7 = sld [smem:[#allocation13_spill]] }
 0x348   : > { %p8902_p4 = scmp.ge.s32.totalorder %s22_s25, 6   ;;  %s8987_s17 = sld [smem:[#allocation20_spill]] }
 0x349   : > { %s8988_s5 = sld [smem:[#allocation14_spill]]  ;;  %s8995_s12 = smov %s7412_s13 }
 0x34a   : > { %s8989_s20 = sld [smem:[#allocation19_spill]]  ;;  %s8996_s13 = smov %s7416_s14 }
 0x34b   : > { %s8990_s21 = sld [smem:[#allocation15_spill]]  ;;  %s8997_s14 = smov %s7650_s26 }
 0x34c   : > { %s8991_s22 = sld [smem:[#allocation16_spill]]  ;;  %s8998_s15 = smov %s7424_s16 }
 0x34d   : > { %s8992_s23 = sld [smem:[#allocation17_spill]]  ;;  %s8999_s16 = smov %s8986_s7 }
 0x34e   : > { %s8993_s24 = sld [smem:[#allocation18_spill]]  ;;  %s9000_s18 = smov %s7436_s19 }
 0x34f   : > { %s9001_s19 = smov %s8988_s5  ;;  %21 = sbr.rel (!%p8902_p4) target bundleno = 16 (0x10), region = 110 }
 0x354   :  { %4375 = vsyncpa [#allocation3], 1 }
 0x355   :  { %4377 = vsyncpa [#allocation3 + $0x1], 1 }
 0x356   :  { %4378 = vsyncpa [#allocation6], 1 }
 0x357   :  { %4380 = vsyncpa [#allocation6 + $0x1], 1 }
 0x358   :  { %4381 = vsyncpa [#allocation4], 1 }
 0x359   :  { %4383 = vsyncpa [#allocation4 + $0x1], 1 }

</bundles_post_ra>
